<compile_context>
chip_gen: v7x
topology: tpu7x:2x2x1
jax: 0.10.0
libtpu: 0.0.40
codegen_flags: <defaults>
</compile_context>

<pallas_src>
import jax
import jax.numpy as jnp
from jax import lax
from jax.experimental import pallas as pl
from jax.experimental.pallas import tpu as pltpu

EPS = 1e-5
LANE = 128


def _round_up(x, m):
    return (x + m - 1) // m * m


def _bn_act(h, p_ref, relu):
    """Training-mode BatchNorm over rows (N*H*W), one-pass statistics.

    TODO(synk): one-pass E[x^2]-mean^2 can cancel catastrophically at very
    large NHW; switch to a centered second pass if tolerances tighten.
    """
    nrows = h.shape[0]
    s1 = jnp.sum(h, axis=0, keepdims=True)
    s2 = jnp.sum(h * h, axis=0, keepdims=True)
    mean = s1 * (1.0 / nrows)
    var = jnp.maximum(s2 * (1.0 / nrows) - mean * mean, 0.0)
    y = (h - mean) * (lax.rsqrt(var + EPS) * p_ref[0:1, :]) + p_ref[1:2, :]
    return jnp.maximum(y, 0.0) if relu else y


def bottleneck_kernel(x_ref, w1_ref, p1_ref, w2_ref, p2_ref, w3_ref, p3_ref,
                      o_ref, pad_ref):
    # x_ref : (N, H, W, CPin) f32
    # w1_ref: (CPin, CPmid) bf16    w2_ref: (9, CPmid, CPmid) bf16
    # w3_ref: (CPmid, CPout) bf16   p*_ref: (2, CP*) f32 rows = [gamma, beta]
    # pad_ref: VMEM scratch (N, H+2, Wp, CPmid) bf16 — 3x3 halo, Wp = rnd16(W+2)
    N, H, W, cp_in = x_ref.shape
    cp_mid = w1_ref.shape[1]
    cp_out = w3_ref.shape[1]
    wp = pad_ref.shape[2]
    NHW = N * H * W

    # ---- 1x1 conv (one MXU matmul, bf16 operands, f32 accum) + BN + ReLU -----
    # Only the bf16 view of x is kept live here; f32 x is re-read at the end.
    xm_bf = x_ref[...].reshape(NHW, cp_in).astype(jnp.bfloat16)
    h1 = jnp.dot(xm_bf, w1_ref[...], preferred_element_type=jnp.float32)
    h1 = _bn_act(h1, p1_ref, relu=True)

    # ---- 3x3 conv, padding=1 --------------------------------------------------
    # Write the bf16 interior once; zero only the 1-pixel halo (columns beyond
    # W+1 in the sublane-aligned scratch are never read, so they stay untouched).
    pad_ref[:, 1:H + 1, 1:W + 1, :] = (
        h1.reshape(N, H, W, cp_mid).astype(jnp.bfloat16))
    zrow = jnp.zeros((N, 1, wp, cp_mid), jnp.bfloat16)
    zcol = jnp.zeros((N, H, 1, cp_mid), jnp.bfloat16)
    pad_ref[:, 0:1, :, :] = zrow
    pad_ref[:, H + 1:H + 2, :, :] = zrow
    pad_ref[:, 1:H + 1, 0:1, :] = zcol
    pad_ref[:, 1:H + 1, W + 1:W + 2, :] = zcol

    # Nine accumulating per-tap matmuls (K = CPmid each) reading pad_ref
    # directly — no (NHW, 9*CP) im2col materialization.
    acc = jnp.zeros((NHW, cp_mid), jnp.float32)
    for tap in range(9):
        dy, dx = tap // 3, tap % 3
        patch = pad_ref[:, dy:dy + H, dx:dx + W, :].reshape(NHW, cp_mid)
        acc = acc + jnp.dot(patch, w2_ref[tap],
                            preferred_element_type=jnp.float32)
    h2 = _bn_act(acc, p2_ref, relu=True)

    # ---- 1x1 conv + BN --------------------------------------------------------
    h3 = jnp.dot(h2.astype(jnp.bfloat16), w3_ref[...],
                 preferred_element_type=jnp.float32)
    h3 = _bn_act(h3, p3_ref, relu=False)

    # ---- residual (lane-dense store); x re-read from VMEM only here ----------
    o_ref[...] = (h3.reshape(N, H, W, cp_out) + x_ref[...]).astype(o_ref.dtype)


def _prepare_params(torch_params, cp_in, cp_mid, cp_out):
    """PyTorch-layout params -> per-layer padded, lane-dense kernel params."""
    (c1w, _c1b, g1, b1), (c2w, _c2b, g2, b2), (c3w, _c3b, g3, b3) = torch_params
    cmid = c1w.shape[0]

    def pad2(w, rows, cols):
        return jnp.pad(w, ((0, rows - w.shape[0]), (0, cols - w.shape[1])))

    w1 = pad2(c1w[:, :, 0, 0].T, cp_in, cp_mid).astype(jnp.bfloat16)   # (CPin, CPmid)
    w3 = pad2(c3w[:, :, 0, 0].T, cp_mid, cp_out).astype(jnp.bfloat16)  # (CPmid, CPout)

    w2 = jnp.transpose(c2w, (2, 3, 1, 0))                              # (3,3,in,out)
    w2 = jnp.pad(w2, ((0, 0), (0, 0), (0, cp_mid - cmid), (0, cp_mid - cmid)))
    w2 = w2.reshape(9, cp_mid, cp_mid).astype(jnp.bfloat16)            # (9, CPmid, CPmid)

    def pbn(g, b, cp):
        # gamma/beta zero-padded: padded-channel BN output collapses to exactly 0.
        return jnp.stack([jnp.pad(g, (0, cp - g.shape[0])),
                          jnp.pad(b, (0, cp - b.shape[0]))]).astype(jnp.float32)

    # Conv biases intentionally dropped: training-mode BN cancels them.
    return (w1, pbn(g1, b1, cp_mid), w2, pbn(g2, b2, cp_mid),
            w3, pbn(g3, b3, cp_out))


def bottleneck_forward(x_nchw, torch_params):
    N, Cin, H, W = x_nchw.shape
    Cmid = torch_params[0][0].shape[0]
    Cout = torch_params[2][0].shape[0]
    assert Cin == Cout, "residual add requires in_channels == out_channels"

    cp_in = _round_up(Cin, LANE)
    cp_mid = _round_up(Cmid, LANE)
    cp_out = _round_up(Cout, LANE)
    wp = _round_up(W + 2, 16)          # bf16 sublane alignment for the 3x3 halo

    w1, p1, w2, p2, w3, p3 = _prepare_params(torch_params, cp_in, cp_mid, cp_out)

    # NHWC with channels zero-padded to a lane-dense multiple of 128.
    x_nhwc = jnp.pad(jnp.transpose(x_nchw, (0, 2, 3, 1)).astype(jnp.float32),
                     ((0, 0), (0, 0), (0, 0), (0, cp_in - Cin)))

    NHW = N * H * W
    x_bytes = NHW * cp_in * 4
    out_bytes = NHW * cp_out * 4
    w_bytes = (cp_in * cp_mid + 9 * cp_mid * cp_mid + cp_mid * cp_out) * 2 \
        + (4 * cp_mid + 2 * cp_out) * 4
    pad_bytes = N * (H + 2) * wp * cp_mid * 2
    interm_bytes = NHW * (2 * cp_in + 14 * cp_mid + 4 * cp_out)
    vmem_limit = int(min(64 << 20,
                         max(16 << 20,
                             2 * (x_bytes + out_bytes + w_bytes
                                  + pad_bytes + interm_bytes))))

    flops = 2 * NHW * (cp_in * cp_mid + 9 * cp_mid * cp_mid + cp_mid * cp_out)

    vmem = pl.BlockSpec(memory_space=pltpu.MemorySpace.VMEM)
    out = pl.pallas_call(
        bottleneck_kernel,
        out_shape=jax.ShapeDtypeStruct((N, H, W, cp_out), jnp.float32),
        in_specs=[vmem] * 7,
        out_specs=vmem,
        scratch_shapes=[
            pltpu.VMEM((N, H + 2, wp, cp_mid), jnp.bfloat16),   # 3x3 halo scratch
        ],
        compiler_params=pltpu.CompilerParams(vmem_limit_bytes=vmem_limit),
        cost_estimate=pl.CostEstimate(
            flops=flops,
            transcendentals=2 * cp_mid + cp_out,
            bytes_accessed=x_bytes + out_bytes + w_bytes),
    )(x_nhwc, w1, p1, w2, p2, w3, p3)

    return jnp.transpose(out[..., :Cout], (0, 3, 1, 2))


def reference_forward(x_nchw, torch_params):
    """Pure-JAX reference for the PyTorch training-mode forward.  Conv operands
    are rounded to bf16 (f32 accumulation) to mirror the kernel's MXU-native
    precision; BN / residual math stays in f32."""
    (c1w, c1b, g1, b1), (c2w, c2b, g2, b2), (c3w, c3b, g3, b3) = torch_params
    x = jnp.transpose(x_nchw, (0, 2, 3, 1)).astype(jnp.float32)
    dn = ('NHWC', 'HWIO', 'NHWC')

    def bn(h, g, b):
        m = jnp.mean(h, axis=(0, 1, 2), keepdims=True)
        v = jnp.mean((h - m) ** 2, axis=(0, 1, 2), keepdims=True)
        return (h - m) / jnp.sqrt(v + EPS) * g + b

    def conv(h, w_oihw, b, pad):
        w_hwio = jnp.transpose(w_oihw, (2, 3, 1, 0))
        y = lax.conv_general_dilated(
            h.astype(jnp.bfloat16), w_hwio.astype(jnp.bfloat16), (1, 1), pad,
            dimension_numbers=dn, preferred_element_type=jnp.float32)
        return y + b

    h = jax.nn.relu(bn(conv(x, c1w, c1b, 'VALID'), g1, b1))
    h = jax.nn.relu(bn(conv(h, c2w, c2b, ((1, 1), (1, 1))), g2, b2))
    h = bn(conv(h, c3w, c3b, 'VALID'), g3, b3)
    return jnp.transpose(h + x, (0, 3, 1, 2))


if __name__ == "__main__":
    in_channels = out_channels = 16
    reduction = 4
    Cmid = in_channels // reduction
    N, H, W = 2, 8, 8

    key = jax.random.PRNGKey(0)
    ks = jax.random.split(key, 13)

    # PyTorch-layout parameters (Conv2d: OIHW; BN: per-channel gamma/beta).
    c1w = 0.2 * jax.random.normal(ks[0], (Cmid, in_channels, 1, 1), jnp.float32)
    c1b = 0.1 * jax.random.normal(ks[1], (Cmid,), jnp.float32)
    c2w = 0.2 * jax.random.normal(ks[2], (Cmid, Cmid, 3, 3), jnp.float32)
    c2b = 0.1 * jax.random.normal(ks[3], (Cmid,), jnp.float32)
    c3w = 0.2 * jax.random.normal(ks[4], (out_channels, Cmid, 1, 1), jnp.float32)
    c3b = 0.1 * jax.random.normal(ks[5], (out_channels,), jnp.float32)
    g1 = 1.0 + 0.1 * jax.random.normal(ks[6], (Cmid,), jnp.float32)
    b1 = 0.1 * jax.random.normal(ks[7], (Cmid,), jnp.float32)
    g2 = 1.0 + 0.1 * jax.random.normal(ks[8], (Cmid,), jnp.float32)
    b2 = 0.1 * jax.random.normal(ks[9], (Cmid,), jnp.float32)
    g3 = 1.0 + 0.1 * jax.random.normal(ks[10], (out_channels,), jnp.float32)
    b3 = 0.1 * jax.random.normal(ks[11], (out_channels,), jnp.float32)

    torch_params = ((c1w, c1b, g1, b1),
                    (c2w, c2b, g2, b2),
                    (c3w, c3b, g3, b3))

    x = jax.random.normal(ks[12], (N, in_channels, H, W), jnp.float32)

    out = bottleneck_forward(x, torch_params)
    out = jax.block_until_ready(out)

    ref = reference_forward(x, torch_params)
    assert out.shape == x.shape
    assert jnp.allclose(out, ref, atol=1e-3, rtol=1e-3), (
        f"max abs err {jnp.max(jnp.abs(out - ref))}")
    print("KERNEL_OK")
</pallas_src>

<mosaic_0001>
module attributes {stable_mosaic.version = 11 : i64} {
  func.func @bottleneck_kernel(%arg0: memref<2x8x8x128xf32, #tpu.memory_space<vmem>>, %arg1: memref<128x128xbf16, #tpu.memory_space<vmem>>, %arg2: memref<2x128xf32, #tpu.memory_space<vmem>>, %arg3: memref<9x128x128xbf16, #tpu.memory_space<vmem>>, %arg4: memref<2x128xf32, #tpu.memory_space<vmem>>, %arg5: memref<128x128xbf16, #tpu.memory_space<vmem>>, %arg6: memref<2x128xf32, #tpu.memory_space<vmem>>, %arg7: memref<2x8x8x128xf32, #tpu.memory_space<vmem>>, %arg8: memref<2x10x16x128xbf16, #tpu.memory_space<vmem>>) attributes {dimension_semantics = [], scalar_prefetch = 0 : i64, scratch_operands = 1 : i64, tpu.core_type = #tpu.core_type<tc>} {
    %c0 = arith.constant 0 : index
    %c0_0 = arith.constant 0 : index
    %c0_1 = arith.constant 0 : index
    %c0_2 = arith.constant 0 : index
    %0 = vector.load %arg0[%c0, %c0_0, %c0_1, %c0_2] : memref<2x8x8x128xf32, #tpu.memory_space<vmem>>, vector<2x8x8x128xf32>
    %1 = vector.shape_cast %0 : vector<2x8x8x128xf32> to vector<128x128xf32>
    %2 = arith.truncf %1 : vector<128x128xf32> to vector<128x128xbf16>
    %c0_3 = arith.constant 0 : index
    %c0_4 = arith.constant 0 : index
    %3 = vector.load %arg1[%c0_3, %c0_4] : memref<128x128xbf16, #tpu.memory_space<vmem>>, vector<128x128xbf16>
    %cst = arith.constant dense<0.000000e+00> : vector<128x128xf32>
    %4 = tpu.matmul %2, %3, %cst {dimension_numbers = #tpu.dot_dimension_numbers<[1], [0], [0], [1], [0, 0, 1, 1], [], []>} : vector<128x128xbf16>, vector<128x128xbf16>, vector<128x128xf32> -> vector<128x128xf32>
    %cst_5 = arith.constant dense<0.000000e+00> : vector<128xf32>
    %5 = vector.multi_reduction <add>, %4, %cst_5 [0] : vector<128x128xf32> to vector<128xf32>
    %6 = vector.shape_cast %5 : vector<128xf32> to vector<1x128xf32>
    %7 = arith.mulf %4, %4 : vector<128x128xf32>
    %cst_6 = arith.constant dense<0.000000e+00> : vector<128xf32>
    %8 = vector.multi_reduction <add>, %7, %cst_6 [0] : vector<128x128xf32> to vector<128xf32>
    %9 = vector.shape_cast %8 : vector<128xf32> to vector<1x128xf32>
    %cst_7 = arith.constant 7.812500e-03 : f32
    %10 = vector.broadcast %cst_7 : f32 to vector<1x128xf32>
    %11 = arith.mulf %6, %10 : vector<1x128xf32>
    %cst_8 = arith.constant 7.812500e-03 : f32
    %12 = vector.broadcast %cst_8 : f32 to vector<1x128xf32>
    %13 = arith.mulf %9, %12 : vector<1x128xf32>
    %14 = arith.mulf %11, %11 : vector<1x128xf32>
    %15 = arith.subf %13, %14 : vector<1x128xf32>
    %cst_9 = arith.constant 0.000000e+00 : f32
    %16 = vector.broadcast %cst_9 : f32 to vector<1x128xf32>
    %17 = arith.maximumf %15, %16 : vector<1x128xf32>
    %18 = vector.broadcast %11 : vector<1x128xf32> to vector<128x128xf32>
    %19 = arith.subf %4, %18 : vector<128x128xf32>
    %cst_10 = arith.constant 9.99999974E-6 : f32
    %20 = vector.broadcast %cst_10 : f32 to vector<1x128xf32>
    %21 = arith.addf %17, %20 : vector<1x128xf32>
    %22 = math.rsqrt %21 : vector<1x128xf32>
    %c0_11 = arith.constant 0 : index
    %c0_12 = arith.constant 0 : index
    %23 = vector.load %arg2[%c0_11, %c0_12] : memref<2x128xf32, #tpu.memory_space<vmem>>, vector<1x128xf32>
    %24 = arith.mulf %22, %23 : vector<1x128xf32>
    %25 = vector.broadcast %24 : vector<1x128xf32> to vector<128x128xf32>
    %26 = arith.mulf %19, %25 : vector<128x128xf32>
    %c1 = arith.constant 1 : index
    %c0_13 = arith.constant 0 : index
    %27 = vector.load %arg2[%c1, %c0_13] : memref<2x128xf32, #tpu.memory_space<vmem>>, vector<1x128xf32>
    %28 = vector.broadcast %27 : vector<1x128xf32> to vector<128x128xf32>
    %29 = arith.addf %26, %28 : vector<128x128xf32>
    %cst_14 = arith.constant 0.000000e+00 : f32
    %30 = vector.broadcast %cst_14 : f32 to vector<128x128xf32>
    %31 = arith.maximumf %29, %30 : vector<128x128xf32>
    %32 = vector.shape_cast %31 : vector<128x128xf32> to vector<2x8x8x128xf32>
    %33 = arith.truncf %32 : vector<2x8x8x128xf32> to vector<2x8x8x128xbf16>
    %c0_15 = arith.constant 0 : index
    %c1_16 = arith.constant 1 : index
    %c1_17 = arith.constant 1 : index
    %c0_18 = arith.constant 0 : index
    %34 = vector.load %arg8[%c0_15, %c1_16, %c1_17, %c0_18] : memref<2x10x16x128xbf16, #tpu.memory_space<vmem>>, vector<2x8x8x128xbf16>
    tpu.vector_store %arg8[%c0_15, %c1_16, %c1_17, %c0_18], %33 {strides = array<i32>} : memref<2x10x16x128xbf16, #tpu.memory_space<vmem>>, vector<2x8x8x128xbf16>,
    %cst_19 = arith.constant 0.000000e+00 : bf16
    %35 = vector.broadcast %cst_19 : bf16 to vector<2x1x16x128xbf16>
    %cst_20 = arith.constant 0.000000e+00 : bf16
    %36 = vector.broadcast %cst_20 : bf16 to vector<2x8x1x128xbf16>
    %c0_21 = arith.constant 0 : index
    %c0_22 = arith.constant 0 : index
    %c0_23 = arith.constant 0 : index
    %c0_24 = arith.constant 0 : index
    %37 = vector.load %arg8[%c0_21, %c0_22, %c0_23, %c0_24] : memref<2x10x16x128xbf16, #tpu.memory_space<vmem>>, vector<2x1x16x128xbf16>
    tpu.vector_store %arg8[%c0_21, %c0_22, %c0_23, %c0_24], %35 {strides = array<i32>} : memref<2x10x16x128xbf16, #tpu.memory_space<vmem>>, vector<2x1x16x128xbf16>,
    %c0_25 = arith.constant 0 : index
    %c9 = arith.constant 9 : index
    %c0_26 = arith.constant 0 : index
    %c0_27 = arith.constant 0 : index
    %38 = vector.load %arg8[%c0_25, %c9, %c0_26, %c0_27] : memref<2x10x16x128xbf16, #tpu.memory_space<vmem>>, vector<2x1x16x128xbf16>
    tpu.vector_store %arg8[%c0_25, %c9, %c0_26, %c0_27], %35 {strides = array<i32>} : memref<2x10x16x128xbf16, #tpu.memory_space<vmem>>, vector<2x1x16x128xbf16>,
    %c0_28 = arith.constant 0 : index
    %c1_29 = arith.constant 1 : index
    %c0_30 = arith.constant 0 : index
    %c0_31 = arith.constant 0 : index
    %39 = vector.load %arg8[%c0_28, %c1_29, %c0_30, %c0_31] : memref<2x10x16x128xbf16, #tpu.memory_space<vmem>>, vector<2x8x1x128xbf16>
    tpu.vector_store %arg8[%c0_28, %c1_29, %c0_30, %c0_31], %36 {strides = array<i32>} : memref<2x10x16x128xbf16, #tpu.memory_space<vmem>>, vector<2x8x1x128xbf16>,
    %c0_32 = arith.constant 0 : index
    %c1_33 = arith.constant 1 : index
    %c9_34 = arith.constant 9 : index
    %c0_35 = arith.constant 0 : index
    %40 = vector.load %arg8[%c0_32, %c1_33, %c9_34, %c0_35] : memref<2x10x16x128xbf16, #tpu.memory_space<vmem>>, vector<2x8x1x128xbf16>
    tpu.vector_store %arg8[%c0_32, %c1_33, %c9_34, %c0_35], %36 {strides = array<i32>} : memref<2x10x16x128xbf16, #tpu.memory_space<vmem>>, vector<2x8x1x128xbf16>,
    %cst_36 = arith.constant 0.000000e+00 : f32
    %41 = vector.broadcast %cst_36 : f32 to vector<128x128xf32>
    %c0_37 = arith.constant 0 : index
    %c0_38 = arith.constant 0 : index
    %c0_39 = arith.constant 0 : index
    %c0_40 = arith.constant 0 : index
    %42 = vector.load %arg8[%c0_37, %c0_38, %c0_39, %c0_40] : memref<2x10x16x128xbf16, #tpu.memory_space<vmem>>, vector<2x8x8x128xbf16>
    %43 = vector.shape_cast %42 : vector<2x8x8x128xbf16> to vector<128x128xbf16>
    %c0_41 = arith.constant 0 : index
    %c0_42 = arith.constant 0 : index
    %c0_43 = arith.constant 0 : index
    %44 = vector.load %arg3[%c0_41, %c0_42, %c0_43] : memref<9x128x128xbf16, #tpu.memory_space<vmem>>, vector<1x128x128xbf16>
    %45 = vector.shape_cast %44 : vector<1x128x128xbf16> to vector<128x128xbf16>
    %cst_44 = arith.constant dense<0.000000e+00> : vector<128x128xf32>
    %46 = tpu.matmul %43, %45, %cst_44 {dimension_numbers = #tpu.dot_dimension_numbers<[1], [0], [0], [1], [0, 0, 1, 1], [], []>} : vector<128x128xbf16>, vector<128x128xbf16>, vector<128x128xf32> -> vector<128x128xf32>
    %47 = arith.addf %41, %46 : vector<128x128xf32>
    %c0_45 = arith.constant 0 : index
    %c0_46 = arith.constant 0 : index
    %c1_47 = arith.constant 1 : index
    %c0_48 = arith.constant 0 : index
    %48 = vector.load %arg8[%c0_45, %c0_46, %c1_47, %c0_48] : memref<2x10x16x128xbf16, #tpu.memory_space<vmem>>, vector<2x8x8x128xbf16>
    %49 = vector.shape_cast %48 : vector<2x8x8x128xbf16> to vector<128x128xbf16>
    %c1_49 = arith.constant 1 : index
    %c0_50 = arith.constant 0 : index
    %c0_51 = arith.constant 0 : index
    %50 = vector.load %arg3[%c1_49, %c0_50, %c0_51] : memref<9x128x128xbf16, #tpu.memory_space<vmem>>, vector<1x128x128xbf16>
    %51 = vector.shape_cast %50 : vector<1x128x128xbf16> to vector<128x128xbf16>
    %cst_52 = arith.constant dense<0.000000e+00> : vector<128x128xf32>
    %52 = tpu.matmul %49, %51, %cst_52 {dimension_numbers = #tpu.dot_dimension_numbers<[1], [0], [0], [1], [0, 0, 1, 1], [], []>} : vector<128x128xbf16>, vector<128x128xbf16>, vector<128x128xf32> -> vector<128x128xf32>
    %53 = arith.addf %47, %52 : vector<128x128xf32>
    %c0_53 = arith.constant 0 : index
    %c0_54 = arith.constant 0 : index
    %c2 = arith.constant 2 : index
    %c0_55 = arith.constant 0 : index
    %54 = vector.load %arg8[%c0_53, %c0_54, %c2, %c0_55] : memref<2x10x16x128xbf16, #tpu.memory_space<vmem>>, vector<2x8x8x128xbf16>
    %55 = vector.shape_cast %54 : vector<2x8x8x128xbf16> to vector<128x128xbf16>
    %c2_56 = arith.constant 2 : index
    %c0_57 = arith.constant 0 : index
    %c0_58 = arith.constant 0 : index
    %56 = vector.load %arg3[%c2_56, %c0_57, %c0_58] : memref<9x128x128xbf16, #tpu.memory_space<vmem>>, vector<1x128x128xbf16>
    %57 = vector.shape_cast %56 : vector<1x128x128xbf16> to vector<128x128xbf16>
    %cst_59 = arith.constant dense<0.000000e+00> : vector<128x128xf32>
    %58 = tpu.matmul %55, %57, %cst_59 {dimension_numbers = #tpu.dot_dimension_numbers<[1], [0], [0], [1], [0, 0, 1, 1], [], []>} : vector<128x128xbf16>, vector<128x128xbf16>, vector<128x128xf32> -> vector<128x128xf32>
    %59 = arith.addf %53, %58 : vector<128x128xf32>
    %c0_60 = arith.constant 0 : index
    %c1_61 = arith.constant 1 : index
    %c0_62 = arith.constant 0 : index
    %c0_63 = arith.constant 0 : index
    %60 = vector.load %arg8[%c0_60, %c1_61, %c0_62, %c0_63] : memref<2x10x16x128xbf16, #tpu.memory_space<vmem>>, vector<2x8x8x128xbf16>
    %61 = vector.shape_cast %60 : vector<2x8x8x128xbf16> to vector<128x128xbf16>
    %c3 = arith.constant 3 : index
    %c0_64 = arith.constant 0 : index
    %c0_65 = arith.constant 0 : index
    %62 = vector.load %arg3[%c3, %c0_64, %c0_65] : memref<9x128x128xbf16, #tpu.memory_space<vmem>>, vector<1x128x128xbf16>
    %63 = vector.shape_cast %62 : vector<1x128x128xbf16> to vector<128x128xbf16>
    %cst_66 = arith.constant dense<0.000000e+00> : vector<128x128xf32>
    %64 = tpu.matmul %61, %63, %cst_66 {dimension_numbers = #tpu.dot_dimension_numbers<[1], [0], [0], [1], [0, 0, 1, 1], [], []>} : vector<128x128xbf16>, vector<128x128xbf16>, vector<128x128xf32> -> vector<128x128xf32>
    %65 = arith.addf %59, %64 : vector<128x128xf32>
    %c0_67 = arith.constant 0 : index
    %c1_68 = arith.constant 1 : index
    %c1_69 = arith.constant 1 : index
    %c0_70 = arith.constant 0 : index
    %66 = vector.load %arg8[%c0_67, %c1_68, %c1_69, %c0_70] : memref<2x10x16x128xbf16, #tpu.memory_space<vmem>>, vector<2x8x8x128xbf16>
    %67 = vector.shape_cast %66 : vector<2x8x8x128xbf16> to vector<128x128xbf16>
    %c4 = arith.constant 4 : index
    %c0_71 = arith.constant 0 : index
    %c0_72 = arith.constant 0 : index
    %68 = vector.load %arg3[%c4, %c0_71, %c0_72] : memref<9x128x128xbf16, #tpu.memory_space<vmem>>, vector<1x128x128xbf16>
    %69 = vector.shape_cast %68 : vector<1x128x128xbf16> to vector<128x128xbf16>
    %cst_73 = arith.constant dense<0.000000e+00> : vector<128x128xf32>
    %70 = tpu.matmul %67, %69, %cst_73 {dimension_numbers = #tpu.dot_dimension_numbers<[1], [0], [0], [1], [0, 0, 1, 1], [], []>} : vector<128x128xbf16>, vector<128x128xbf16>, vector<128x128xf32> -> vector<128x128xf32>
    %71 = arith.addf %65, %70 : vector<128x128xf32>
    %c0_74 = arith.constant 0 : index
    %c1_75 = arith.constant 1 : index
    %c2_76 = arith.constant 2 : index
    %c0_77 = arith.constant 0 : index
    %72 = vector.load %arg8[%c0_74, %c1_75, %c2_76, %c0_77] : memref<2x10x16x128xbf16, #tpu.memory_space<vmem>>, vector<2x8x8x128xbf16>
    %73 = vector.shape_cast %72 : vector<2x8x8x128xbf16> to vector<128x128xbf16>
    %c5 = arith.constant 5 : index
    %c0_78 = arith.constant 0 : index
    %c0_79 = arith.constant 0 : index
    %74 = vector.load %arg3[%c5, %c0_78, %c0_79] : memref<9x128x128xbf16, #tpu.memory_space<vmem>>, vector<1x128x128xbf16>
    %75 = vector.shape_cast %74 : vector<1x128x128xbf16> to vector<128x128xbf16>
    %cst_80 = arith.constant dense<0.000000e+00> : vector<128x128xf32>
    %76 = tpu.matmul %73, %75, %cst_80 {dimension_numbers = #tpu.dot_dimension_numbers<[1], [0], [0], [1], [0, 0, 1, 1], [], []>} : vector<128x128xbf16>, vector<128x128xbf16>, vector<128x128xf32> -> vector<128x128xf32>
    %77 = arith.addf %71, %76 : vector<128x128xf32>
    %c0_81 = arith.constant 0 : index
    %c2_82 = arith.constant 2 : index
    %c0_83 = arith.constant 0 : index
    %c0_84 = arith.constant 0 : index
    %78 = vector.load %arg8[%c0_81, %c2_82, %c0_83, %c0_84] : memref<2x10x16x128xbf16, #tpu.memory_space<vmem>>, vector<2x8x8x128xbf16>
    %79 = vector.shape_cast %78 : vector<2x8x8x128xbf16> to vector<128x128xbf16>
    %c6 = arith.constant 6 : index
    %c0_85 = arith.constant 0 : index
    %c0_86 = arith.constant 0 : index
    %80 = vector.load %arg3[%c6, %c0_85, %c0_86] : memref<9x128x128xbf16, #tpu.memory_space<vmem>>, vector<1x128x128xbf16>
    %81 = vector.shape_cast %80 : vector<1x128x128xbf16> to vector<128x128xbf16>
    %cst_87 = arith.constant dense<0.000000e+00> : vector<128x128xf32>
    %82 = tpu.matmul %79, %81, %cst_87 {dimension_numbers = #tpu.dot_dimension_numbers<[1], [0], [0], [1], [0, 0, 1, 1], [], []>} : vector<128x128xbf16>, vector<128x128xbf16>, vector<128x128xf32> -> vector<128x128xf32>
    %83 = arith.addf %77, %82 : vector<128x128xf32>
    %c0_88 = arith.constant 0 : index
    %c2_89 = arith.constant 2 : index
    %c1_90 = arith.constant 1 : index
    %c0_91 = arith.constant 0 : index
    %84 = vector.load %arg8[%c0_88, %c2_89, %c1_90, %c0_91] : memref<2x10x16x128xbf16, #tpu.memory_space<vmem>>, vector<2x8x8x128xbf16>
    %85 = vector.shape_cast %84 : vector<2x8x8x128xbf16> to vector<128x128xbf16>
    %c7 = arith.constant 7 : index
    %c0_92 = arith.constant 0 : index
    %c0_93 = arith.constant 0 : index
    %86 = vector.load %arg3[%c7, %c0_92, %c0_93] : memref<9x128x128xbf16, #tpu.memory_space<vmem>>, vector<1x128x128xbf16>
    %87 = vector.shape_cast %86 : vector<1x128x128xbf16> to vector<128x128xbf16>
    %cst_94 = arith.constant dense<0.000000e+00> : vector<128x128xf32>
    %88 = tpu.matmul %85, %87, %cst_94 {dimension_numbers = #tpu.dot_dimension_numbers<[1], [0], [0], [1], [0, 0, 1, 1], [], []>} : vector<128x128xbf16>, vector<128x128xbf16>, vector<128x128xf32> -> vector<128x128xf32>
    %89 = arith.addf %83, %88 : vector<128x128xf32>
    %c0_95 = arith.constant 0 : index
    %c2_96 = arith.constant 2 : index
    %c2_97 = arith.constant 2 : index
    %c0_98 = arith.constant 0 : index
    %90 = vector.load %arg8[%c0_95, %c2_96, %c2_97, %c0_98] : memref<2x10x16x128xbf16, #tpu.memory_space<vmem>>, vector<2x8x8x128xbf16>
    %91 = vector.shape_cast %90 : vector<2x8x8x128xbf16> to vector<128x128xbf16>
    %c8 = arith.constant 8 : index
    %c0_99 = arith.constant 0 : index
    %c0_100 = arith.constant 0 : index
    %92 = vector.load %arg3[%c8, %c0_99, %c0_100] : memref<9x128x128xbf16, #tpu.memory_space<vmem>>, vector<1x128x128xbf16>
    %93 = vector.shape_cast %92 : vector<1x128x128xbf16> to vector<128x128xbf16>
    %cst_101 = arith.constant dense<0.000000e+00> : vector<128x128xf32>
    %94 = tpu.matmul %91, %93, %cst_101 {dimension_numbers = #tpu.dot_dimension_numbers<[1], [0], [0], [1], [0, 0, 1, 1], [], []>} : vector<128x128xbf16>, vector<128x128xbf16>, vector<128x128xf32> -> vector<128x128xf32>
    %95 = arith.addf %89, %94 : vector<128x128xf32>
    %cst_102 = arith.constant dense<0.000000e+00> : vector<128xf32>
    %96 = vector.multi_reduction <add>, %95, %cst_102 [0] : vector<128x128xf32> to vector<128xf32>
    %97 = vector.shape_cast %96 : vector<128xf32> to vector<1x128xf32>
    %98 = arith.mulf %95, %95 : vector<128x128xf32>
    %cst_103 = arith.constant dense<0.000000e+00> : vector<128xf32>
    %99 = vector.multi_reduction <add>, %98, %cst_103 [0] : vector<128x128xf32> to vector<128xf32>
    %100 = vector.shape_cast %99 : vector<128xf32> to vector<1x128xf32>
    %cst_104 = arith.constant 7.812500e-03 : f32
    %101 = vector.broadcast %cst_104 : f32 to vector<1x128xf32>
    %102 = arith.mulf %97, %101 : vector<1x128xf32>
    %cst_105 = arith.constant 7.812500e-03 : f32
    %103 = vector.broadcast %cst_105 : f32 to vector<1x128xf32>
    %104 = arith.mulf %100, %103 : vector<1x128xf32>
    %105 = arith.mulf %102, %102 : vector<1x128xf32>
    %106 = arith.subf %104, %105 : vector<1x128xf32>
    %cst_106 = arith.constant 0.000000e+00 : f32
    %107 = vector.broadcast %cst_106 : f32 to vector<1x128xf32>
    %108 = arith.maximumf %106, %107 : vector<1x128xf32>
    %109 = vector.broadcast %102 : vector<1x128xf32> to vector<128x128xf32>
    %110 = arith.subf %95, %109 : vector<128x128xf32>
    %cst_107 = arith.constant 9.99999974E-6 : f32
    %111 = vector.broadcast %cst_107 : f32 to vector<1x128xf32>
    %112 = arith.addf %108, %111 : vector<1x128xf32>
    %113 = math.rsqrt %112 : vector<1x128xf32>
    %c0_108 = arith.constant 0 : index
    %c0_109 = arith.constant 0 : index
    %114 = vector.load %arg4[%c0_108, %c0_109] : memref<2x128xf32, #tpu.memory_space<vmem>>, vector<1x128xf32>
    %115 = arith.mulf %113, %114 : vector<1x128xf32>
    %116 = vector.broadcast %115 : vector<1x128xf32> to vector<128x128xf32>
    %117 = arith.mulf %110, %116 : vector<128x128xf32>
    %c1_110 = arith.constant 1 : index
    %c0_111 = arith.constant 0 : index
    %118 = vector.load %arg4[%c1_110, %c0_111] : memref<2x128xf32, #tpu.memory_space<vmem>>, vector<1x128xf32>
    %119 = vector.broadcast %118 : vector<1x128xf32> to vector<128x128xf32>
    %120 = arith.addf %117, %119 : vector<128x128xf32>
    %cst_112 = arith.constant 0.000000e+00 : f32
    %121 = vector.broadcast %cst_112 : f32 to vector<128x128xf32>
    %122 = arith.maximumf %120, %121 : vector<128x128xf32>
    %123 = arith.truncf %122 : vector<128x128xf32> to vector<128x128xbf16>
    %c0_113 = arith.constant 0 : index
    %c0_114 = arith.constant 0 : index
    %124 = vector.load %arg5[%c0_113, %c0_114] : memref<128x128xbf16, #tpu.memory_space<vmem>>, vector<128x128xbf16>
    %cst_115 = arith.constant dense<0.000000e+00> : vector<128x128xf32>
    %125 = tpu.matmul %123, %124, %cst_115 {dimension_numbers = #tpu.dot_dimension_numbers<[1], [0], [0], [1], [0, 0, 1, 1], [], []>} : vector<128x128xbf16>, vector<128x128xbf16>, vector<128x128xf32> -> vector<128x128xf32>
    %cst_116 = arith.constant dense<0.000000e+00> : vector<128xf32>
    %126 = vector.multi_reduction <add>, %125, %cst_116 [0] : vector<128x128xf32> to vector<128xf32>
    %127 = vector.shape_cast %126 : vector<128xf32> to vector<1x128xf32>
    %128 = arith.mulf %125, %125 : vector<128x128xf32>
    %cst_117 = arith.constant dense<0.000000e+00> : vector<128xf32>
    %129 = vector.multi_reduction <add>, %128, %cst_117 [0] : vector<128x128xf32> to vector<128xf32>
    %130 = vector.shape_cast %129 : vector<128xf32> to vector<1x128xf32>
    %cst_118 = arith.constant 7.812500e-03 : f32
    %131 = vector.broadcast %cst_118 : f32 to vector<1x128xf32>
    %132 = arith.mulf %127, %131 : vector<1x128xf32>
    %cst_119 = arith.constant 7.812500e-03 : f32
    %133 = vector.broadcast %cst_119 : f32 to vector<1x128xf32>
    %134 = arith.mulf %130, %133 : vector<1x128xf32>
    %135 = arith.mulf %132, %132 : vector<1x128xf32>
    %136 = arith.subf %134, %135 : vector<1x128xf32>
    %cst_120 = arith.constant 0.000000e+00 : f32
    %137 = vector.broadcast %cst_120 : f32 to vector<1x128xf32>
    %138 = arith.maximumf %136, %137 : vector<1x128xf32>
    %139 = vector.broadcast %132 : vector<1x128xf32> to vector<128x128xf32>
    %140 = arith.subf %125, %139 : vector<128x128xf32>
    %cst_121 = arith.constant 9.99999974E-6 : f32
    %141 = vector.broadcast %cst_121 : f32 to vector<1x128xf32>
    %142 = arith.addf %138, %141 : vector<1x128xf32>
    %143 = math.rsqrt %142 : vector<1x128xf32>
    %c0_122 = arith.constant 0 : index
    %c0_123 = arith.constant 0 : index
    %144 = vector.load %arg6[%c0_122, %c0_123] : memref<2x128xf32, #tpu.memory_space<vmem>>, vector<1x128xf32>
    %145 = arith.mulf %143, %144 : vector<1x128xf32>
    %146 = vector.broadcast %145 : vector<1x128xf32> to vector<128x128xf32>
    %147 = arith.mulf %140, %146 : vector<128x128xf32>
    %c1_124 = arith.constant 1 : index
    %c0_125 = arith.constant 0 : index
    %148 = vector.load %arg6[%c1_124, %c0_125] : memref<2x128xf32, #tpu.memory_space<vmem>>, vector<1x128xf32>
    %149 = vector.broadcast %148 : vector<1x128xf32> to vector<128x128xf32>
    %150 = arith.addf %147, %149 : vector<128x128xf32>
    %151 = vector.shape_cast %150 : vector<128x128xf32> to vector<2x8x8x128xf32>
    %c0_126 = arith.constant 0 : index
    %c0_127 = arith.constant 0 : index
    %c0_128 = arith.constant 0 : index
    %c0_129 = arith.constant 0 : index
    %152 = vector.load %arg0[%c0_126, %c0_127, %c0_128, %c0_129] : memref<2x8x8x128xf32, #tpu.memory_space<vmem>>, vector<2x8x8x128xf32>
    %153 = arith.addf %151, %152 : vector<2x8x8x128xf32>
    %c0_130 = arith.constant 0 : index
    %c0_131 = arith.constant 0 : index
    %c0_132 = arith.constant 0 : index
    %c0_133 = arith.constant 0 : index
    %154 = vector.load %arg7[%c0_130, %c0_131, %c0_132, %c0_133] : memref<2x8x8x128xf32, #tpu.memory_space<vmem>>, vector<2x8x8x128xf32>
    tpu.vector_store %arg7[%c0_130, %c0_131, %c0_132, %c0_133], %153 {strides = array<i32>} : memref<2x8x8x128xf32, #tpu.memory_space<vmem>>, vector<2x8x8x128xf32>,
    return
  }
}

</mosaic_0001>

<bundles_post_ra>
// kernel: tpu_custom_call.1
= control target key start
LH: loop header
LB: loop body
LE: loop exit
PB: predicated region body
PF: predicated region fallthrough
CT: control target
= control target key end

     0   :  { %12 = vsyncpa [#allocation4], 0  ;;  %s7273_s0 = inlined_call_operand.hbm [shape: f32[2,8,8,128], index: 0, kind: input, shape index: {}]   ;;  %s7274_s1 = inlined_call_operand.hbm [shape: bf16[128,128], index: 1, kind: input, shape index: {}]   ;;  %s7275_s2 = inlined_call_operand.vmem [shape: f32[2,128], index: 2, kind: input, shape index: {}]   ;;  %s7276_s3 = inlined_call_operand.hbm [shape: bf16[9,128,128], index: 3, kind: input, shape index: {}]   ;;  %s7277_s4 = inlined_call_operand.vmem [shape: f32[2,128], index: 4, kind: input, shape index: {}]   ;;  %s7278_s5 = inlined_call_operand.hbm [shape: bf16[128,128], index: 5, kind: input, shape index: {}]   ;;  %s7279_s6 = inlined_call_operand.vmem [shape: f32[2,128], index: 6, kind: input, shape index: {}]   ;;  %s7280_s7 = inlined_call_operand.hbm [shape: f32[2,8,8,128], index: 7, kind: output, shape index: {}]  }
   0x1   :  { %13 = vsyncpa [#allocation7], 0 }
   0x2   :  { %14 = vsyncpa [#allocation10], 0 }
   0x3   :  { %15 = vsyncpa [#allocation5], 0  ;;  %s6109_s24 = smov [#allocation6]   ;;  %s5991_s28 = scalar_lea.hbm %s7274_s1, 1024 }
   0x4   :  { %s33_s25 = sshll.u32 %s6109_s24, 4  ;;  %p5992_p0 = scmp.ne.s32.totalorder %s7274_s1, %s5991_s28  ;;  %s34_s25 = int_to_ptr.vmem [resolvable:$true] %s33_s25 }
   0x5   :  { %p5995_p1 = scmp.lt.u32.totalorder %s5991_s28, %s7274_s1 }
   0x7   :  { %p5997_p2 = pnand %p5995_p1, %p5992_p0 }
   0x9   :  { %6000 = shalt.err (!%p5997_p2)
}
   0xa   :  { %s6001_s10 = scalar_lea.vmem %s34_s25, 1024  ;;  %p6006_p4 = scmp.lt.s32.totalorder %s34_s25, %s34_s25 }
   0xb   :  { %p6002_p3 = scmp.ne.s32.totalorder %s34_s25, %s6001_s10  ;;  %p6007_p5 = scmp.lt.s32.totalorder %s6001_s10, %s6001_s10 }
   0xd   :  { %p6008_p6 = por %p6007_p5, %p6006_p4 }
   0xf   :  { %p6009_p7 = pnand %p6008_p6, %p6002_p3 }
  0x11   :  { %6012 = shalt.err (!%p6009_p7)
}
  0x12   :  { %s6110_s11 = smov 64   ;;  %s6111_s12 = smov 4  }
  0x13   :  { %39 = dma.hbm_to_vmem [thread:$0]  %s7274_s1, 1024, %s34_s25, [#allocation7], %s6110_s11, %s6110_s11, %s6111_s12  }
  0x14   :  { %s6112_s15 = smov [#allocation3]   ;;  %s6013_s19 = scalar_lea.hbm %s7273_s0, 2048 }
  0x15   :  { %s21_s16 = sshll.u32 %s6112_s15, 4  ;;  %p6014_p8 = scmp.ne.s32.totalorder %s7273_s0, %s6013_s19  ;;  %s22_s16 = int_to_ptr.vmem [resolvable:$true] %s21_s16 }
  0x16   :  { %p6017_p9 = scmp.lt.u32.totalorder %s6013_s19, %s7273_s0 }
  0x18   :  { %p6019_p10 = pnand %p6017_p9, %p6014_p8 }
  0x1a   :  { %6022 = shalt.err (!%p6019_p10)
}
  0x1b   :  { %s6023_s24 = scalar_lea.vmem %s22_s16, 2048  ;;  %p6028_p12 = scmp.lt.s32.totalorder %s22_s16, %s22_s16 }
  0x1c   :  { %p6024_p11 = scmp.ne.s32.totalorder %s22_s16, %s6023_s24  ;;  %p6029_p13 = scmp.lt.s32.totalorder %s6023_s24, %s6023_s24 }
  0x1e   :  { %p6030_p0 = por %p6029_p13, %p6028_p12 }
  0x20   :  { %p6031_p1 = pnand %p6030_p0, %p6024_p11 }
  0x22   :  { %6034 = shalt.err (!%p6031_p1)
}
  0x23   :  { %s6113_s1 = smov 128   ;;  %s6114_s25 = smov 8  }
  0x24   :  { %27 = dma.hbm_to_vmem [thread:$0]  %s7273_s0, 2048, %s22_s16, [#allocation4], %s6113_s1, %s6113_s1, %s6114_s25  }
  0x25   :  { %s6115_s28 = smov [#allocation8]   ;;  %s6116_s30 = smov [#allocation9]  }
  0x26   :  { %s47_s29 = sshll.u32 %s6115_s28, 4  ;;  %s61_s8 = sshll.u32 %s6116_s30, 4  ;;  %s48_s29 = int_to_ptr.vmem [resolvable:$true] %s47_s29  ;;  %s6189_s8 = int_to_ptr.vmem [resolvable:$true] %s61_s8 }
  0x27   :  { %s6035_s13 = scalar_lea.hbm %s7276_s3, 9216 }
  0x28   :  { %p6036_p2 = scmp.ne.s32.totalorder %s7276_s3, %s6035_s13  ;;  %p6039_p3 = scmp.lt.u32.totalorder %s6035_s13, %s7276_s3 }
  0x2a   :  { %p6041_p4 = pnand %p6039_p3, %p6036_p2 }
  0x2c   :  { %6044 = shalt.err (!%p6041_p4)
}
  0x2d   :  { %s6045_s0 = scalar_lea.vmem %s48_s29, 9216  ;;  %p6050_p6 = scmp.lt.s32.totalorder %s48_s29, %s48_s29 }
  0x2e   :  { %p6046_p5 = scmp.ne.s32.totalorder %s48_s29, %s6045_s0  ;;  %p6051_p7 = scmp.lt.s32.totalorder %s6045_s0, %s6045_s0 }
  0x30   :  { %p6052_p8 = por %p6051_p7, %p6050_p6 }
  0x32   :  { %p6053_p9 = pnand %p6052_p8, %p6046_p5 }
  0x34   :  { %6056 = shalt.err (!%p6053_p9)
}
  0x35   :  { %53 = dma.hbm_to_vmem [thread:$0]  %s7276_s3, 9216, %s48_s29, [#allocation7], %s6110_s11, %s6110_s11, %s6111_s12  }
  0x36   :  { %s6057_s22 = scalar_lea.hbm %s7278_s5, 1024 }
  0x37   :  { %p6058_p10 = scmp.ne.s32.totalorder %s7278_s5, %s6057_s22  ;;  %p6061_p11 = scmp.lt.u32.totalorder %s6057_s22, %s7278_s5 }
  0x39   :  { %p6063_p12 = pnand %p6061_p11, %p6058_p10 }
  0x3b   :  { %6066 = shalt.err (!%p6063_p12)
}
  0x3c   :  { %s6067_s28 = scalar_lea.vmem %s6189_s8, 1024  ;;  %p6072_p0 = scmp.lt.s32.totalorder %s6189_s8, %s6189_s8 }
  0x3d   :  { %p6068_p13 = scmp.ne.s32.totalorder %s6189_s8, %s6067_s28  ;;  %p6073_p1 = scmp.lt.s32.totalorder %s6067_s28, %s6067_s28 }
  0x3f   :  { %p6074_p2 = por %p6073_p1, %p6072_p0 }
  0x41   :  { %p6075_p3 = pnand %p6074_p2, %p6068_p13 }
  0x43   :  { %6078 = shalt.err (!%p6075_p3)
}
  0x44   :  { %67 = dma.hbm_to_vmem [thread:$0]  %s7278_s5, 1024, %s6189_s8, [#allocation10], %s6110_s11, %s6110_s11, %s6111_s12  }
  0x45   :  { %6101 = dma.done.wait [#allocation4], 2048  }
  0x46   :  { %6102 = vsyncadd [#allocation4], 4294965248 }
  0x47   :  { %6103 = dma.done.wait [#allocation7], 10240  }
  0x48   :  { %6104 = vsyncadd [#allocation7], 4294957056 }
  0x49   :  { %6105 = dma.done.wait [#allocation10], 1024  }
  0x4a   :  { %6106 = vsyncadd [#allocation10], 4294966272  ;;  %v5680_v0 = vld [vmem:[#allocation6] sm:$0xff]   ;;  %v5681_v1 = vld [vmem:[#allocation6 + $0x8] sm:$0xff]   ;;  %v6117_v49 = vmov 0   ;;  %vm553_vm0 = vcmask 1044480  }
  0x4b   :  { %5190 = vmatprep.subr.bf16.mxu0 %v5680_v0  ;;  %v5682_v2 = vld [vmem:[#allocation6 + $0x10] sm:$0xff]   ;;  %v5683_v3 = vld [vmem:[#allocation6 + $0x18] sm:$0xff]   ;;  %v83_v4 = vld [vmem:[#allocation3] sm:$0xff]  ;;  %604 = vst [vmem:[#allocation2] sm:$0xff] %v6117_v49  ;;  %vm554_vm1 = vsmask.f32 4354 }
  0x4c   :  { %5191 = vmatpush3.bf16.msra.mxu0 %v5680_v0  ;;  %v84_v5 = vld [vmem:[#allocation3 + $0x8] sm:$0xff]  ;;  %v5684_v7 = vld [vmem:[#allocation6 + $0x20] sm:$0xff]   ;;  %v5686_v9 = vld [vmem:[#allocation6 + $0x30] sm:$0xff]   ;;  %605 = vst [vmem:[#allocation2 + $0x50] sm:$0xff] %v6117_v49  ;;  %vm609_vm2 = vcmask 1040384   ;;  %vm660_vm4 = vcmask 1044484  }
  0x4d   :  { %5192 = vmatprep.subr.bf16.mxu0 %v5681_v1  ;;  %v99_v6 = vpack.c.bf16 %v84_v5, %v83_v4  ;;  %v5685_v8 = vld [vmem:[#allocation6 + $0x28] sm:$0xff]   ;;  %v5687_v10 = vld [vmem:[#allocation6 + $0x38] sm:$0xff]   ;;  %v85_v11 = vld [vmem:[#allocation3 + $0x10] sm:$0xff]  ;;  %607 = vst [vmem:[#allocation2 + $0x48] sm:$0xff] %v6117_v49  ;;  %vm610_vm3 = vsmask.f32 256 }
  0x4e   :  { %v86_v12 = vld [vmem:[#allocation3 + $0x18] sm:$0xff]  ;;  %v87_v13 = vld [vmem:[#allocation3 + $0x20] sm:$0xff]  ;;  %v88_v14 = vld [vmem:[#allocation3 + $0x28] sm:$0xff]  ;;  %608 = vst [vmem:[#allocation2 + $0x98] sm:$0xff] %v6117_v49  ;;  %vm661_vm5 = vsmask.f32 7954 }
  0x4f   :  { %5206 = vmatprep.mubr.bf16.mxu0 %v99_v6  ;;  %v100_v15 = vpack.c.bf16 %v86_v12, %v85_v11  ;;  %v101_v16 = vpack.c.bf16 %v88_v14, %v87_v13  ;;  %v89_v17 = vld [vmem:[#allocation3 + $0x30] sm:$0xff]  ;;  %v90_v18 = vld [vmem:[#allocation3 + $0x38] sm:$0xff]  ;;  %v91_v19 = vld [vmem:[#allocation3 + $0x40] sm:$0xff]  ;;  %vm839_vm7 = vsmask.f32 3328  ;;  %vm1549_vm12 = vcmask 1042432  }
  0x50   :  { %5193 = vmatpush3.bf16.msra.mxu0 %v5681_v1  ;;  %v92_v20 = vld [vmem:[#allocation3 + $0x48] sm:$0xff]  ;;  %v102_v21 = vpack.c.bf16 %v90_v18, %v89_v17  ;;  %v93_v23 = vld [vmem:[#allocation3 + $0x50] sm:$0xff]  ;;  %v94_v24 = vld [vmem:[#allocation3 + $0x58] sm:$0xff]  ;;  %vm840_vm8 = vsmask.f32 7440  ;;  %vm1550_vm13 = vcmask 1046532  }
  0x51   :  { %5194 = vmatprep.subr.bf16.mxu0 %v5682_v2  ;;  %v103_v22 = vpack.c.bf16 %v92_v20, %v91_v19  ;;  %v95_v25 = vld [vmem:[#allocation3 + $0x60] sm:$0xff]  ;;  %v96_v26 = vld [vmem:[#allocation3 + $0x68] sm:$0xff]  ;;  %v104_v27 = vpack.c.bf16 %v94_v24, %v93_v23  ;;  %v97_v29 = vld [vmem:[#allocation3 + $0x70] sm:$0xff] }
  0x52   :  { %v105_v28 = vpack.c.bf16 %v96_v26, %v95_v25  ;;  %v98_v30 = vld [vmem:[#allocation3 + $0x78] sm:$0xff]  ;;  %v5688_v32 = vld [vmem:[#allocation8 + $0xc0] sm:$0xff]   ;;  %v5689_v33 = vld [vmem:[#allocation8 + $0xc8] sm:$0xff]  }
  0x53   :  { %v106_v31 = vpack.c.bf16 %v98_v30, %v97_v29  ;;  %5318 = vmatprep.subr.bf16.mxu1 %v5688_v32  ;;  %v5690_v34 = vld [vmem:[#allocation8 + $0xd0] sm:$0xff]   ;;  %v5691_v35 = vld [vmem:[#allocation8 + $0x40] sm:$0xff]   ;;  %v5692_v36 = vld [vmem:[#allocation8 + $0xd8] sm:$0xff]  }
  0x54   :  { %5195 = vmatpush3.bf16.msra.mxu0 %v5682_v2  ;;  %5319 = vmatpush3.bf16.msra.mxu1 %v5688_v32  ;;  %v5693_v37 = vld [vmem:[#allocation8 + $0x48] sm:$0xff]   ;;  %v5694_v38 = vld [vmem:[#allocation8 + $0xe0] sm:$0xff]   ;;  %v5695_v39 = vld [vmem:[#allocation8 + $0x50] sm:$0xff]  }
  0x55   :  { %5196 = vmatprep.subr.bf16.mxu0 %v5683_v3  ;;  %5320 = vmatprep.subr.bf16.mxu1 %v5689_v33  ;;  %v5696_v40 = vld [vmem:[#allocation8 + $0xe8] sm:$0xff]   ;;  %v5697_v41 = vld [vmem:[#allocation8 + $0x58] sm:$0xff]   ;;  %v5698_v42 = vld [vmem:[#allocation8 + $0xf0] sm:$0xff]  }
  0x56   :  { %v5699_v43 = vld [vmem:[#allocation8 + $0x60] sm:$0xff]   ;;  %v5700_v44 = vld [vmem:[#allocation8 + $0xf8] sm:$0xff]   ;;  %v5701_v45 = vld [vmem:[#allocation8 + $0x68] sm:$0xff]  }
  0x57   :  { %v6226_v46 = vld [vmem:[#allocation8 + $0x100] sm:$0xff]   ;;  %v5706_v47 = vld [vmem:[#allocation8 + $0x70] sm:$0xff]   ;;  %v5708_v48 = vld [vmem:[#allocation8 + $0x78] sm:$0xff]  }
  0x58   :  { %5197 = vmatpush3.bf16.msra.mxu0 %v5683_v3  ;;  %5321 = vmatpush3.bf16.msra.mxu1 %v5689_v33  ;;  %v6229_v50 = vld [vmem:[#allocation8] sm:$0xff]   ;;  %vm6397_vm6 = vmand %vm553_vm0, %vm554_vm1 }
  0x59   :  { %5198 = vmatprep.subr.bf16.mxu0 %v5684_v7  ;;  %5322 = vmatprep.subr.bf16.mxu1 %v5690_v34  ;;  %vm6435_vm9 = vmand %vm609_vm2, %vm610_vm3 }
  0x5a   :  { %vm6448_vm10 = vmand %vm660_vm4, %vm661_vm5 }
  0x5b   :  { %vm6509_vm11 = vmor %vm839_vm7, %vm840_vm8 }
  0x5c   :  { %5199 = vmatpush3.bf16.msra.mxu0 %v5684_v7  ;;  %5323 = vmatpush3.bf16.msra.mxu1 %v5690_v34  ;;  %vm6751_vm14 = vmor %vm1549_vm12, %vm1550_vm13 }
  0x5d   :  { %5200 = vmatprep.subr.bf16.mxu0 %v5685_v8  ;;  %5324 = vmatprep.subr.bf16.mxu1 %v5692_v36 }
  0x60   :  { %5201 = vmatpush3.bf16.msra.mxu0 %v5685_v8  ;;  %5325 = vmatpush3.bf16.msra.mxu1 %v5692_v36 }
  0x61   :  { %5202 = vmatprep.subr.bf16.mxu0 %v5686_v9  ;;  %5326 = vmatprep.subr.bf16.mxu1 %v5694_v38 }
  0x64   :  { %5203 = vmatpush3.bf16.msra.mxu0 %v5686_v9  ;;  %5327 = vmatpush3.bf16.msra.mxu1 %v5694_v38 }
  0x65   :  { %5204 = vmatprep.subr.bf16.mxu0 %v5687_v10  ;;  %5328 = vmatprep.subr.bf16.mxu1 %v5696_v40 }
  0x68   :  { %5205 = vmatpush3.bf16.msra.mxu0 %v5687_v10  ;;  %5329 = vmatpush3.bf16.msra.mxu1 %v5696_v40 }
  0x69   :  { %5222 = vmatprep.subr.bf16.mxu0 %v5691_v35  ;;  %5330 = vmatprep.subr.bf16.mxu1 %v5698_v42 }
  0x6b   :  { %5207 = vmatmul.mubr.bf16.vlgmr.msra.gmra.mrb[0].mxu0 %v100_v15 }
  0x6c   :  { %5210 = vmatprep.mubr.bf16.mxu0 %v101_v16  ;;  %5223 = vmatpush3.bf16.msra.mxu0 %v5691_v35 }
  0x6d   :  { %5224 = vmatprep.subr.bf16.mxu0 %v5693_v37  ;;  %5331 = vmatpush3.bf16.msra.mxu1 %v5698_v42 }
  0x6e   :  { %5332 = vmatprep.subr.bf16.mxu1 %v5700_v44 }
  0x70   :  { %5225 = vmatpush3.bf16.msra.mxu0 %v5693_v37 }
  0x71   :  { %5226 = vmatprep.subr.bf16.mxu0 %v5695_v39  ;;  %5333 = vmatpush3.bf16.msra.mxu1 %v5700_v44 }
  0x72   :  { %5350 = vmatprep.subr.bf16.mxu1 %v6226_v46 }
  0x73   :  { %5211 = vmatmul.mubr.bf16.gmra.mrb[4].mxu0 %v102_v21 }
  0x74   :  { %5214 = vmatprep.mubr.bf16.mxu0 %v103_v22  ;;  %5227 = vmatpush3.bf16.msra.mxu0 %v5695_v39 }
  0x75   :  { %5228 = vmatprep.subr.bf16.mxu0 %v5697_v41 }
  0x78   :  { %5229 = vmatpush3.bf16.msra.mxu0 %v5697_v41 }
  0x79   :  { %5230 = vmatprep.subr.bf16.mxu0 %v5699_v43 }
  0x7b   :  { %5215 = vmatmul.mubr.bf16.gmra.mrb[8].mxu0 %v104_v27 }
  0x7c   :  { %5218 = vmatprep.mubr.bf16.mxu0 %v105_v28  ;;  %5231 = vmatpush3.bf16.msra.mxu0 %v5699_v43 }
  0x7d   :  { %5232 = vmatprep.subr.bf16.mxu0 %v5701_v45 }
  0x80   :  { %5233 = vmatpush3.bf16.msra.mxu0 %v5701_v45 }
  0x81   :  { %5234 = vmatprep.subr.bf16.mxu0 %v5706_v47 }
  0x83   :  { %5219 = vmatmul.mubr.bf16.gmra.mrb[12].mxu0 %v106_v31 }
  0x84   :  { %5235 = vmatpush3.bf16.msra.mxu0 %v5706_v47 }
  0x85   :  { %5236 = vmatprep.subr.bf16.mxu0 %v5708_v48 }
  0x88   :  { %5237 = vmatpush3.bf16.msra.mxu0 %v5708_v48 }
  0x89   :  { %5254 = vmatprep.subr.bf16.mxu0 %v6229_v50 }
 0x13e   :  { %v6232_v51 = vpop.f32.mrb[0].mxu0 }
 0x13f   :  { %v6234_v52 = vpop.f32.mrb[1].mxu0  ;;  %v291_v58 = vmul.f32 %v6232_v51, %v6232_v51 }
 0x140   :  { %v6236_v53 = vpop.f32.mrb[2].mxu0  ;;  %v289_v55 = vmul.f32 %v6234_v52, %v6234_v52 }
 0x141   :  { %v6238_v54 = vpop.f32.mrb[3].mxu0  ;;  %v292_v61 = vmul.f32 %v6236_v53, %v6236_v53 }
 0x142   :  { %v268_v56 = vadd.f32 %v6238_v54, %v6234_v52  ;;  %v290_v57 = vmul.f32 %v6238_v54, %v6238_v54 }
 0x144   :  { %v269_v59 = vadd.f32 %v6232_v51, %v268_v56  ;;  %v305_v60 = vadd.f32 %v290_v57, %v289_v55 }
 0x146   :  { %v306_v62 = vadd.f32 %v305_v60, %v291_v58  ;;  %v6251_v63 = vpop.f32.mrb[4].mxu0  ;;  %v270_v0 = vadd.f32 %v6236_v53, %v269_v59 }
 0x147   :  { %v6254_v1 = vpop.f32.mrb[5].mxu0  ;;  %v295_v10 = vmul.f32 %v6251_v63, %v6251_v63 }
 0x148   :  { %v271_v2 = vadd.f32 %v270_v0, %v6254_v1  ;;  %v293_v3 = vmul.f32 %v6254_v1, %v6254_v1  ;;  %v307_v4 = vadd.f32 %v306_v62, %v292_v61  ;;  %v6259_v5 = vpop.f32.mrb[6].mxu0 }
 0x149   :  { %v6261_v6 = vpop.f32.mrb[7].mxu0  ;;  %v296_v13 = vmul.f32 %v6259_v5, %v6259_v5 }
 0x14a   :  { %v308_v7 = vadd.f32 %v307_v4, %v293_v3  ;;  %v272_v8 = vadd.f32 %v271_v2, %v6261_v6  ;;  %v294_v9 = vmul.f32 %v6261_v6, %v6261_v6 }
 0x14c   :  { %v273_v11 = vadd.f32 %v6251_v63, %v272_v8  ;;  %v309_v12 = vadd.f32 %v308_v7, %v294_v9 }
 0x14e   :  { %v310_v14 = vadd.f32 %v309_v12, %v295_v10  ;;  %v6271_v15 = vpop.f32.mrb[8].mxu0  ;;  %v274_v16 = vadd.f32 %v6259_v5, %v273_v11 }
 0x14f   :  { %v6274_v17 = vpop.f32.mrb[9].mxu0  ;;  %v299_v26 = vmul.f32 %v6271_v15, %v6271_v15 }
 0x150   :  { %v275_v18 = vadd.f32 %v274_v16, %v6274_v17  ;;  %v297_v19 = vmul.f32 %v6274_v17, %v6274_v17  ;;  %v311_v20 = vadd.f32 %v310_v14, %v296_v13  ;;  %v6279_v21 = vpop.f32.mrb[10].mxu0 }
 0x151   :  { %v6281_v22 = vpop.f32.mrb[11].mxu0  ;;  %v300_v29 = vmul.f32 %v6279_v21, %v6279_v21 }
 0x152   :  { %v312_v23 = vadd.f32 %v311_v20, %v297_v19  ;;  %v276_v24 = vadd.f32 %v275_v18, %v6281_v22  ;;  %v298_v25 = vmul.f32 %v6281_v22, %v6281_v22 }
 0x154   :  { %v277_v27 = vadd.f32 %v6271_v15, %v276_v24  ;;  %v313_v28 = vadd.f32 %v312_v23, %v298_v25 }
 0x156   :  { %v314_v30 = vadd.f32 %v313_v28, %v299_v26  ;;  %v6291_v31 = vpop.f32.mrb[12].mxu0  ;;  %v278_v32 = vadd.f32 %v6279_v21, %v277_v27  ;;  %v751_v27 = vld [vmem:[#allocation2 + $0x50] sm:$0x1f]  ;;  %v351_v28 = vlaneseq }
 0x157   :  { %v6294_v33 = vpop.f32.mrb[13].mxu0  ;;  %v303_v42 = vmul.f32 %v6291_v31, %v6291_v31 }
 0x158   :  { %v279_v34 = vadd.f32 %v278_v32, %v6294_v33  ;;  %v301_v35 = vmul.f32 %v6294_v33, %v6294_v33  ;;  %v315_v36 = vadd.f32 %v314_v30, %v300_v29  ;;  %v6299_v37 = vpop.f32.mrb[14].mxu0  ;;  %v4636_v32 = vcombine.low %v751_v27, %v751_v27 }
 0x159   :  { %v6301_v38 = vpop.f32.mrb[15].mxu0  ;;  %v304_v45 = vmul.f32 %v6299_v37, %v6299_v37 }
 0x15a   :  { %v316_v39 = vadd.f32 %v315_v36, %v301_v35  ;;  %v280_v40 = vadd.f32 %v279_v34, %v6301_v38  ;;  %v302_v41 = vmul.f32 %v6301_v38, %v6301_v38  ;;  %v352_v34 = vshrl.u32 %v351_v28, 7 }
 0x15c   :  { %v281_v43 = vadd.f32 %v6291_v31, %v280_v40  ;;  %v317_v44 = vadd.f32 %v316_v39, %v302_v41  ;;  %v4637_v39 = vcombine.high %v751_v27, %v751_v27  ;;  %v955_v40 = vshrl.u32 %v4636_v32, 16 }
 0x15d   :  { %v958_v41 = vshll.u32 %v4636_v32, 16 }
 0x15e   :  { %v282_v47 = vadd.f32 %v6299_v37, %v281_v43  ;;  %v318_v48 = vadd.f32 %v317_v44, %v303_v42  ;;  %v349_v42 = vld [vmem:[%s7275_s2] sm:$0x1]  ;;  %v6351_v43 = vsub.s32 0, %v352_v34 }
 0x160   :  { %v283_v49 = vrot.slane %v282_v47, 4  ;;  %v319_v55 = vadd.f32 %v318_v48, %v304_v45  ;;  %v6355_v48 = vrot.slane %v955_v40, 4 }
 0x162   :  { %v284_v56 = vadd.f32 %v283_v49, %v282_v47  ;;  %v320_v57 = vrot.slane %v319_v55, 4  ;;  %v6357_v49 = vrot.slane %v958_v41, 5 }
 0x164   :  { %v285_v58 = vrot.slane %v284_v56, 2  ;;  %v321_v59 = vadd.f32 %v320_v57, %v319_v55  ;;  %v6359_v55 = vshll.u32 %v4637_v39, 16 }
 0x166   :  { %v286_v60 = vadd.f32 %v285_v58, %v284_v56  ;;  %v322_v61 = vrot.slane %v321_v59, 2  ;;  %v6367_v58 = vld [vmem:[%s7275_s2 + $0x1] ss:$0 sm:$0xff] }
 0x168   :  { %v287_v62 = vrot.slane %v286_v60, 1  ;;  %v323_v0 = vadd.f32 %v322_v61, %v321_v59  ;;  %v961_v61 = vor.u32 %v6357_v49, %v6355_v48 }
 0x16a   :  { %v288_v2 = vadd.f32 %v287_v62, %v286_v60  ;;  %v324_v3 = vrot.slane %v323_v0, 1  ;;  %v966_v62 = vrot.slane %v6359_v55, 5 }
 0x16c   :  { %v325_v4 = vadd.f32 %v324_v3, %v323_v0  ;;  %v6312_v7 = vmul.f32 0.0078125, %v288_v2 }
 0x16e   :  { %v327_v8 = vmul.f32 0.0078125, %v325_v4  ;;  %v328_v9 = vmul.f32 %v6312_v7, %v6312_v7  ;;  %v344_v10 = vsub.f32 %v6301_v38, %v6312_v7  ;;  %v331_v11 = vsub.f32 %v6234_v52, %v6312_v7 }
 0x16f   :  { %v332_v12 = vsub.f32 %v6238_v54, %v6312_v7  ;;  %v333_v13 = vsub.f32 %v6232_v51, %v6312_v7  ;;  %v334_v14 = vsub.f32 %v6236_v53, %v6312_v7  ;;  %v335_v16 = vsub.f32 %v6254_v1, %v6312_v7  ;;  %v743_v54 = vld [vmem:[#allocation2] sm:$0x1f] }
 0x170   :  { %v329_v18 = vsub.f32 %v327_v8, %v328_v9  ;;  %v336_v19 = vsub.f32 %v6261_v6, %v6312_v7  ;;  %v337_v20 = vsub.f32 %v6251_v63, %v6312_v7  ;;  %v338_v52 = vsub.f32 %v6259_v5, %v6312_v7 }
 0x171   :  { %v339_v51 = vsub.f32 %v6274_v17, %v6312_v7  ;;  %v340_v53 = vsub.f32 %v6281_v22, %v6312_v7  ;;  %v341_v1 = vsub.f32 %v6271_v15, %v6312_v7  ;;  %v342_v23 = vsub.f32 %v6279_v21, %v6312_v7 }
 0x172   :  { %v330_v6 = vmax.f32 %v329_v18, 0.0  ;;  %v343_v63 = vsub.f32 %v6294_v33, %v6312_v7  ;;  %v345_v5 = vsub.f32 %v6291_v31, %v6312_v7  ;;  %v346_v24 = vsub.f32 %v6299_v37, %v6312_v7  ;;  %v577_v31 = vld [vmem:[#allocation2 + $0x40] sm:$0x1f] }
 0x173   :  { %v4620_v25 = vcombine.low %v743_v54, %v743_v54  ;;  %v4621_v35 = vcombine.high %v743_v54, %v743_v54 }
 0x174   :  { %v347_v26 = vadd.f32 1e-05, %v330_v6 }
 0x175   :  { %v843_v29 = vshrl.u32 %v4620_v25, 16  ;;  %v846_v30 = vshll.u32 %v4620_v25, 16  ;;  %v6353_v44 = vshll.u32 %v4621_v35, 16 }
 0x176   :  { %5984 = vrsqrt.f32 %v347_v26 }
 0x177   :  { %v845_v36 = vrot.slane %v843_v29, 4  ;;  %v848_v38 = vrot.slane %v846_v30, 5  ;;  %v854_v60 = vrot.slane %v6353_v44, 5 }
 0x179   :  { %v849_v47 = vor.u32 %v848_v38, %v845_v36 }
 0x17b   :  { %v6369_v59 = vrot.slane %v849_v47, 4 }
 0x180   :  { %v5985_v45 = vpop.eup %5984 }
 0x181   :  { %v350_v56 = vmul.f32 %v5985_v45, %v349_v42 }
 0x183   :  { %v6362_v57 = vrot.slane %v350_v56, %v6351_v43 }
 0x185   :  { %v368_v0 = vmul.f32 %v6362_v57, %v344_v10  ;;  %v355_v2 = vmul.f32 %v6362_v57, %v331_v11  ;;  %v356_v3 = vmul.f32 %v6362_v57, %v332_v12  ;;  %v357_v4 = vmul.f32 %v6362_v57, %v333_v13 }
 0x186   :  { %v358_v8 = vmul.f32 %v6362_v57, %v334_v14  ;;  %v359_v9 = vmul.f32 %v6362_v57, %v335_v16  ;;  %v360_v18 = vmul.f32 %v6362_v57, %v336_v19  ;;  %v361_v54 = vmul.f32 %v6362_v57, %v337_v20 }
 0x187   :  { %v389_v6 = vadd.f32 %v6367_v58, %v368_v0  ;;  %v376_v10 = vadd.f32 %v6367_v58, %v355_v2  ;;  %v377_v25 = vadd.f32 %v6367_v58, %v356_v3  ;;  %v378_v11 = vadd.f32 %v6367_v58, %v357_v4 }
 0x188   :  { %v379_v12 = vadd.f32 %v6367_v58, %v358_v8  ;;  %v380_v13 = vadd.f32 %v6367_v58, %v359_v9  ;;  %v381_v14 = vadd.f32 %v6367_v58, %v360_v18  ;;  %v362_v16 = vmul.f32 %v6362_v57, %v338_v52  ;;  %v595_v9 = vld [vmem:[#allocation2 + $0x80] sm:$0x1f] }
 0x189   :  { %v405_v26 = vmax.f32 %v389_v6, 0.0  ;;  %v392_v19 = vmax.f32 %v376_v10, 0.0  ;;  %v393_v27 = vmax.f32 %v377_v25, 0.0  ;;  %v394_v20 = vmax.f32 %v378_v11, 0.0  ;;  %v556_v11 = vld [vmem:[#allocation2 + $0x8] sm:$0x1f] }
 0x18a   :  { %v395_v28 = vmax.f32 %v379_v12, 0.0  ;;  %v396_v29 = vmax.f32 %v380_v13, 0.0  ;;  %v397_v30 = vmax.f32 %v381_v14, 0.0  ;;  %v6392_v32 = vadd.f32 %v6367_v58, %v361_v54 }
 0x18b   :  { %v421_v34 = vpack.c.bf16 %v405_v26, %v405_v26  ;;  %v408_v35 = vpack.c.bf16 %v392_v19, %v392_v19  ;;  %v409_v36 = vpack.c.bf16 %v393_v27, %v393_v27  ;;  %v410_v38 = vpack.c.bf16 %v394_v20, %v394_v20  ;;  %v559_v19 = vld [vmem:[#allocation2 + $0x10] sm:$0x1f]  ;;  %v562_v20 = vld [vmem:[#allocation2 + $0x18] sm:$0x1f] }
 0x18c   :  { %v411_v39 = vpack.c.bf16 %v395_v28, %v395_v28  ;;  %v412_v40 = vpack.c.bf16 %v396_v29, %v396_v29  ;;  %v413_v41 = vpack.c.bf16 %v397_v30, %v397_v30  ;;  %v383_v42 = vadd.f32 %v6367_v58, %v362_v16 }
 0x18d   :  { %v516_v52 = vshrl.u32 %v421_v34, 16  ;;  %v519_v45 = vshll.u32 %v421_v34, 16  ;;  %v425_v47 = vshrl.u32 %v408_v35, 16  ;;  %v428_v56 = vshll.u32 %v408_v35, 16  ;;  %v565_v34 = vld [vmem:[#allocation2 + $0x20] sm:$0x1f] }
 0x18e   :  { %v432_v0 = vshrl.u32 %v409_v36, 16  ;;  %v435_v2 = vshll.u32 %v409_v36, 16  ;;  %v439_v3 = vshrl.u32 %v410_v38, 16  ;;  %v442_v4 = vshll.u32 %v410_v38, 16 }
 0x18f   :  { %v518_v8 = vrot.slane %v516_v52, 7  ;;  %v427_v18 = vrot.slane %v425_v47, 7  ;;  %v446_v54 = vshrl.u32 %v411_v39, 16  ;;  %v449_v6 = vshll.u32 %v411_v39, 16 }
 0x190   :  { %v434_v25 = vrot.slane %v432_v0, 7  ;;  %v441_v12 = vrot.slane %v439_v3, 7  ;;  %v453_v13 = vshrl.u32 %v412_v40, 16  ;;  %v456_v14 = vshll.u32 %v412_v40, 16  ;;  %v568_v40 = vld [vmem:[#allocation2 + $0x28] sm:$0x1f] }
 0x191   :  { %v521_v16 = vor.u32 %v519_v45, %v518_v8  ;;  %v430_v26 = vor.u32 %v428_v56, %v427_v18  ;;  %v448_v27 = vrot.slane %v446_v54, 7  ;;  %v460_v28 = vshrl.u32 %v413_v41, 16 }
 0x192   :  { %v437_v29 = vor.u32 %v435_v2, %v434_v25  ;;  %v444_v30 = vor.u32 %v442_v4, %v441_v12  ;;  %v455_v35 = vrot.slane %v453_v13, 7  ;;  %v463_v36 = vshll.u32 %v413_v41, 16  ;;  %v571_v2 = vld [vmem:[#allocation2 + $0x30] sm:$0x1f] }
 0x193   :  { %v596_v38 = vsel %vm6397_vm6, %v521_v16, %v595_v9  ;;  %v557_v39 = vsel %vm6397_vm6, %v430_v26, %v556_v11  ;;  %v451_v52 = vor.u32 %v449_v6, %v448_v27  ;;  %v462_v47 = vrot.slane %v460_v28, 7  ;;  %v574_v26 = vld [vmem:[#allocation2 + $0x38] sm:$0x1f] }
 0x194   :  { %597 = vst [vmem:[#allocation2 + $0x80] sm:$0x1f] %v596_v38  ;;  %558 = vst [vmem:[#allocation2 + $0x8] sm:$0x1f] %v557_v39  ;;  %v560_v45 = vsel %vm6397_vm6, %v437_v29, %v559_v19  ;;  %v563_v56 = vsel %vm6397_vm6, %v444_v30, %v562_v20  ;;  %v458_v0 = vor.u32 %v456_v14, %v455_v35  ;;  %v398_v41 = vmax.f32 %v6392_v32, 0.0 }
 0x195   :  { %561 = vst [vmem:[#allocation2 + $0x10] sm:$0x1f] %v560_v45  ;;  %564 = vst [vmem:[#allocation2 + $0x18] sm:$0x1f] %v563_v56  ;;  %v566_v3 = vsel %vm6397_vm6, %v451_v52, %v565_v34  ;;  %v465_v4 = vor.u32 %v463_v36, %v462_v47  ;;  %v399_v8 = vmax.f32 %v383_v42, 0.0  ;;  %v363_v9 = vmul.f32 %v6362_v57, %v339_v51 }
 0x196   :  { %567 = vst [vmem:[#allocation2 + $0x20] sm:$0x1f] %v566_v3  ;;  %v569_v18 = vsel %vm6397_vm6, %v458_v0, %v568_v40  ;;  %v414_v54 = vpack.c.bf16 %v398_v41, %v398_v41  ;;  %v364_v32 = vmul.f32 %v6362_v57, %v340_v53  ;;  %v365_v42 = vmul.f32 %v6362_v57, %v341_v1 }
 0x197   :  { %570 = vst [vmem:[#allocation2 + $0x28] sm:$0x1f] %v569_v18  ;;  %v572_v17 = vsel %vm6397_vm6, %v465_v4, %v571_v2  ;;  %v415_v51 = vpack.c.bf16 %v399_v8, %v399_v8  ;;  %v384_v6 = vadd.f32 %v6367_v58, %v363_v9  ;;  %v366_v22 = vmul.f32 %v6362_v57, %v342_v23 }
 0x198   :  { %573 = vst [vmem:[#allocation2 + $0x30] sm:$0x1f] %v572_v17  ;;  %v467_v53 = vshrl.u32 %v414_v54, 16  ;;  %v385_v1 = vadd.f32 %v6367_v58, %v364_v32  ;;  %v386_v25 = vadd.f32 %v6367_v58, %v365_v42  ;;  %v6444_v11 = vrot.slane %v961_v61, 4 }
 0x199   :  { %v470_v23 = vshll.u32 %v414_v54, 16  ;;  %v474_v12 = vshrl.u32 %v415_v51, 16  ;;  %v477_v13 = vshll.u32 %v415_v51, 16  ;;  %v400_v14 = vmax.f32 %v384_v6, 0.0 }
 0x19a   :  { %v469_v16 = vrot.slane %v467_v53, 7  ;;  %v401_v19 = vmax.f32 %v385_v1, 0.0  ;;  %v402_v27 = vmax.f32 %v386_v25, 0.0  ;;  %v367_v48 = vmul.f32 %v6362_v57, %v343_v63  ;;  %v580_v1 = vld [vmem:[#allocation2 + $0x58] sm:$0x1f] }
 0x19b   :  { %v651_v49 = vld [vmem:[#allocation2 + $0x80] sm:$0x1]  ;;  %v702_v61 = vld [vmem:[#allocation2 + $0x80] sm:$0x10]  ;;  %v612_v20 = vld [vmem:[#allocation2 + $0x8] sm:$0x1]  ;;  %v6456_v28 = vpack.c.bf16 %v400_v14, %v400_v14  ;;  %v6459_v29 = vadd.f32 %v6367_v58, %v366_v22  ;;  %v369_v30 = vmul.f32 %v6362_v57, %v345_v5  ;;  %v6469_v33 = vmul.f32 %v6362_v57, %v346_v24 }
 0x19c   :  { %v652_v63 = vsel %vm6435_vm9, 0, %v651_v49  ;;  %v703_v34 = vsel %vm6448_vm10, 0, %v702_v61  ;;  %v613_v35 = vsel %vm6435_vm9, 0, %v612_v20  ;;  %v615_v36 = vld [vmem:[#allocation2 + $0x10] sm:$0x1]  ;;  %v472_v38 = vor.u32 %v470_v23, %v469_v16 }
 0x19d   :  { %653 = vst [vmem:[#allocation2 + $0x80] sm:$0x1] %v652_v63  ;;  %704 = vst [vmem:[#allocation2 + $0x80] sm:$0x10] %v703_v34  ;;  %v616_v37 = vsel %vm6435_vm9, 0, %v615_v36  ;;  %v476_v24 = vrot.slane %v474_v12, 7  ;;  %v417_v57 = vpack.c.bf16 %v401_v19, %v401_v19  ;;  %v6479_v39 = vpack.c.bf16 %v402_v27, %v402_v27 }
 0x19e   :  { %614 = vst [vmem:[#allocation2 + $0x8] sm:$0x1] %v613_v35  ;;  %v663_v7 = vld [vmem:[#allocation2 + $0x8] sm:$0x10]  ;;  %v666_v5 = vld [vmem:[#allocation2 + $0x10] sm:$0x10]  ;;  %v575_v56 = vsel %vm6397_vm6, %v472_v38, %v574_v26  ;;  %v388_v0 = vadd.f32 %v6367_v58, %v367_v48  ;;  %v6493_v9 = vadd.f32 %v6367_v58, %v369_v30 }
 0x19f   :  { %617 = vst [vmem:[#allocation2 + $0x10] sm:$0x1] %v616_v37  ;;  %v664_v52 = vsel %vm6448_vm10, 0, %v663_v7  ;;  %v667_v47 = vsel %vm6448_vm10, 0, %v666_v5  ;;  %v618_v40 = vld [vmem:[#allocation2 + $0x18] sm:$0x1]  ;;  %v479_v8 = vor.u32 %v477_v13, %v476_v24  ;;  %v6529_v37 = vsel %vm6509_vm11, %v6369_v59, %v854_v60 }
 0x1a0   :  { %v621_v45 = vld [vmem:[#allocation2 + $0x20] sm:$0x1]  ;;  %665 = vst [vmem:[#allocation2 + $0x8] sm:$0x10] %v664_v52  ;;  %668 = vst [vmem:[#allocation2 + $0x10] sm:$0x10] %v667_v47  ;;  %v6536_v7 = vsel %vm6509_vm11, %v6444_v11, %v966_v62 }
 0x1a1   :  { %v619_v2 = vsel %vm6435_vm9, 0, %v618_v40  ;;  %v622_v41 = vsel %vm6435_vm9, 0, %v621_v45  ;;  %v669_v3 = vld [vmem:[#allocation2 + $0x18] sm:$0x10]  ;;  %v624_v4 = vld [vmem:[#allocation2 + $0x28] sm:$0x1]  ;;  %v578_v6 = vsel %vm6397_vm6, %v479_v8, %v577_v31 }
 0x1a2   :  { %576 = vst [vmem:[#allocation2 + $0x38] sm:$0x1f] %v575_v56  ;;  %620 = vst [vmem:[#allocation2 + $0x18] sm:$0x1] %v619_v2  ;;  %v670_v18 = vsel %vm6448_vm10, 0, %v669_v3  ;;  %v625_v54 = vsel %vm6435_vm9, 0, %v624_v4 }
 0x1a3   :  { %623 = vst [vmem:[#allocation2 + $0x20] sm:$0x1] %v622_v41  ;;  %v627_v32 = vld [vmem:[#allocation2 + $0x30] sm:$0x1]  ;;  %v481_v42 = vshrl.u32 %v6456_v28, 16  ;;  %v484_v17 = vshll.u32 %v6456_v28, 16 }
 0x1a4   :  { %671 = vst [vmem:[#allocation2 + $0x18] sm:$0x10] %v670_v18  ;;  %626 = vst [vmem:[#allocation2 + $0x28] sm:$0x1] %v625_v54  ;;  %v628_v51 = vsel %vm6435_vm9, 0, %v627_v32  ;;  %v488_v22 = vshrl.u32 %v417_v57, 16  ;;  %v6554_v18 = vadd.f32 %v6367_v58, %v6469_v33 }
 0x1a5   :  { %v491_v53 = vshll.u32 %v417_v57, 16  ;;  %v672_v25 = vld [vmem:[#allocation2 + $0x20] sm:$0x10]  ;;  %629 = vst [vmem:[#allocation2 + $0x30] sm:$0x1] %v628_v51  ;;  %v483_v12 = vrot.slane %v481_v42, 7 }
 0x1a6   :  { %v6505_v23 = vld [vmem:[#allocation2] sm:$0x1e]  ;;  %579 = vst [vmem:[#allocation2 + $0x40] sm:$0x1f] %v578_v6  ;;  %v673_v16 = vsel %vm6448_vm10, 0, %v672_v25  ;;  %v403_v19 = vmax.f32 %v6459_v29, 0.0 }
 0x1a7   :  { %v583_v13 = vld [vmem:[#allocation2 + $0x60] sm:$0x1f]  ;;  %v675_v26 = vld [vmem:[#allocation2 + $0x28] sm:$0x10]  ;;  %v495_v27 = vshrl.u32 %v6479_v39, 16  ;;  %v490_v48 = vrot.slane %v488_v22, 7  ;;  %v486_v63 = vor.u32 %v484_v17, %v483_v12  ;;  %v4684_v59 = vcombine.low %v6505_v23, %v6505_v23 }
 0x1a8   :  { %674 = vst [vmem:[#allocation2 + $0x20] sm:$0x10] %v673_v16  ;;  %v676_v49 = vsel %vm6448_vm10, 0, %v675_v26  ;;  %v498_v61 = vshll.u32 %v6479_v39, 16  ;;  %v586_v20 = vld [vmem:[#allocation2 + $0x68] sm:$0x1f]  ;;  %v6520_v34 = vpack.c.bf16 %v403_v19, %v403_v19 }
 0x1a9   :  { %v404_v28 = vmax.f32 %v388_v0, 0.0  ;;  %v678_v30 = vld [vmem:[#allocation2 + $0x30] sm:$0x10]  ;;  %677 = vst [vmem:[#allocation2 + $0x28] sm:$0x10] %v676_v49  ;;  %v497_v35 = vrot.slane %v495_v27, 7  ;;  %v493_v31 = vor.u32 %v491_v53, %v490_v48  ;;  %v581_v57 = vsel %vm6397_vm6, %v486_v63, %v580_v1 }
 0x1aa   :  { %v679_v29 = vsel %vm6448_vm10, 0, %v678_v30  ;;  %v5702_v36 = vld [vmem:[#allocation2 + $0x8] ss:$8 sps:$4 sm:$0xff]   ;;  %v406_v5 = vmax.f32 %v6493_v9, 0.0  ;;  %v630_v24 = vld [vmem:[#allocation2 + $0x38] sm:$0x1] }
 0x1ab   :  { %v5707_v38 = vld [vmem:[#allocation8 + $0x108] sm:$0xff]   ;;  %680 = vst [vmem:[#allocation2 + $0x30] sm:$0x10] %v679_v29  ;;  %v745_v39 = vld [vmem:[#allocation2 + $0x10] sm:$0x1f]  ;;  %v500_v52 = vor.u32 %v498_v61, %v497_v35  ;;  %v6541_v47 = vpack.c.bf16 %v404_v28, %v404_v28  ;;  %5334 = vmatprep.mubr.bf16.mxu1 %v5702_v36  ;;  %v584_v60 = vsel %vm6397_vm6, %v493_v31, %v583_v13  ;;  %v631_v45 = vsel %vm6435_vm9, 0, %v630_v24 }
 0x1ac   :  { %v744_v44 = vld [vmem:[#allocation2 + $0x8] sm:$0x1f]  ;;  %v5704_v55 = vld [vmem:[#allocation2 + $0x18] ss:$8 sps:$4 sm:$0xff]   ;;  %582 = vst [vmem:[#allocation2 + $0x58] sm:$0x1f] %v581_v57  ;;  %v4624_v40 = vcombine.low %v745_v39, %v745_v39  ;;  %v4625_v0 = vcombine.high %v745_v39, %v745_v39  ;;  %v6556_v54 = vpack.c.bf16 %v406_v5, %v406_v5 }
 0x1ad   :  { %v4622_v62 = vcombine.low %v744_v44, %v744_v44  ;;  %v4623_v11 = vcombine.high %v744_v44, %v744_v44  ;;  %585 = vst [vmem:[#allocation2 + $0x60] sm:$0x1f] %v584_v60  ;;  %v746_v56 = vld [vmem:[#allocation2 + $0x18] sm:$0x1f]  ;;  %v502_v2 = vshrl.u32 %v6520_v34, 16  ;;  %v587_v41 = vsel %vm6397_vm6, %v500_v52, %v586_v20  ;;  %5335 = vmatmul.mubr.bf16.vlgmr.msra.gmra.mrb[0].mxu1 %v5704_v55  ;;  %v5709_v32 = vld [vmem:[#allocation8 + $0x110] sm:$0xff]  }
 0x1ae   :  { %v5705_v3 = vld [vmem:[#allocation2 + $0x28] ss:$8 sps:$4 sm:$0xff]   ;;  %632 = vst [vmem:[#allocation2 + $0x38] sm:$0x1] %v631_v45  ;;  %v633_v4 = vld [vmem:[#allocation2 + $0x40] sm:$0x1]  ;;  %v4626_v8 = vcombine.low %v746_v56, %v746_v56  ;;  %v4627_v9 = vcombine.high %v746_v56, %v746_v56  ;;  %5351 = vmatpush3.bf16.msra.mxu1 %v6226_v46 }
 0x1af   :  { %588 = vst [vmem:[#allocation2 + $0x68] sm:$0x1f] %v587_v41  ;;  %v634_v42 = vsel %vm6435_vm9, 0, %v633_v4  ;;  %v857_v17 = vshrl.u32 %v4622_v62, 16  ;;  %v860_v51 = vshll.u32 %v4622_v62, 16  ;;  %v866_v6 = vshll.u32 %v4623_v11, 16  ;;  %5338 = vmatprep.mubr.bf16.mxu1 %v5705_v3  ;;  %5352 = vmatprep.subr.bf16.mxu1 %v5707_v38 }
 0x1b0   :  { %635 = vst [vmem:[#allocation2 + $0x40] sm:$0x1] %v634_v42  ;;  %v871_v22 = vshrl.u32 %v4624_v40, 16  ;;  %v874_v53 = vshll.u32 %v4624_v40, 16  ;;  %v880_v1 = vshll.u32 %v4625_v0, 16  ;;  %v885_v25 = vshrl.u32 %v4626_v8, 16 }
 0x1b1   :  { %v747_v58 = vld [vmem:[#allocation2 + $0x20] sm:$0x1f]  ;;  %v859_v33 = vrot.slane %v857_v17, 4  ;;  %v862_v12 = vrot.slane %v860_v51, 5  ;;  %v868_v13 = vrot.slane %v866_v6, 5  ;;  %v888_v16 = vshll.u32 %v4626_v8, 16 }
 0x1b2   :  { %v748_v46 = vld [vmem:[#allocation2 + $0x28] sm:$0x1f]  ;;  %v873_v26 = vrot.slane %v871_v22, 4  ;;  %v876_v19 = vrot.slane %v874_v53, 5  ;;  %v882_v27 = vrot.slane %v880_v1, 5  ;;  %v887_v48 = vrot.slane %v885_v25, 4  ;;  %5353 = vmatpush3.bf16.msra.mxu1 %v5707_v38 }
 0x1b3   :  { %v636_v49 = vld [vmem:[#allocation2 + $0x58] sm:$0x1]  ;;  %v863_v61 = vor.u32 %v862_v12, %v859_v33  ;;  %v890_v20 = vrot.slane %v888_v16, 5  ;;  %v894_v28 = vshll.u32 %v4627_v9, 16  ;;  %v4628_v30 = vcombine.low %v747_v58, %v747_v58  ;;  %5354 = vmatprep.subr.bf16.mxu1 %v5709_v32  ;;  %v6563_v24 = vld [vmem:[#allocation2 + $0x30] sm:$0x1f] }
 0x1b4   :  { %v637_v63 = vsel %vm6435_vm9, 0, %v636_v49  ;;  %v639_v35 = vld [vmem:[#allocation2 + $0x60] sm:$0x1]  ;;  %v877_v29 = vor.u32 %v876_v19, %v873_v26  ;;  %v5721_v36 = vld [vmem:[#allocation8 + $0x118] sm:$0xff]   ;;  %v4629_v31 = vcombine.high %v747_v58, %v747_v58  ;;  %v4630_v5 = vcombine.low %v748_v46, %v748_v46  ;;  %v589_v58 = vld [vmem:[#allocation2 + $0x70] sm:$0x1f] }
 0x1b5   :  { %638 = vst [vmem:[#allocation2 + $0x58] sm:$0x1] %v637_v63  ;;  %v640_v38 = vsel %vm6435_vm9, 0, %v639_v35  ;;  %v864_v57 = vrot.slane %v863_v61, 4  ;;  %v891_v44 = vor.u32 %v890_v20, %v887_v48  ;;  %v896_v39 = vrot.slane %v894_v28, 5  ;;  %v5727_v9 = vld [vmem:[#allocation8 + $0x120] sm:$0xff]  }
 0x1b6   :  { %641 = vst [vmem:[#allocation2 + $0x60] sm:$0x1] %v640_v38  ;;  %v878_v52 = vrot.slane %v877_v29, 4  ;;  %v4631_v55 = vcombine.high %v748_v46, %v748_v46  ;;  %v899_v60 = vshrl.u32 %v4628_v30, 16  ;;  %v902_v62 = vshll.u32 %v4628_v30, 16  ;;  %5355 = vmatpush3.bf16.msra.mxu1 %v5709_v32  ;;  %v5735_v12 = vld [vmem:[#allocation8 + $0x128] sm:$0xff]  }
 0x1b7   :  { %v5710_v11 = vld [vmem:[#allocation2 + $0x38] ss:$8 sps:$4 sm:$0xff]   ;;  %v869_v40 = vsel %vm6509_vm11, %v864_v57, %v868_v13  ;;  %v892_v45 = vrot.slane %v891_v44, 4  ;;  %v908_v56 = vshll.u32 %v4629_v31, 16  ;;  %v4632_v0 = vcombine.low %v6563_v24, %v6563_v24  ;;  %5356 = vmatprep.subr.bf16.mxu1 %v5721_v36  ;;  %v642_v42 = vld [vmem:[#allocation2 + $0x68] sm:$0x1] }
 0x1b8   :  { %v4652_v41 = vcombine.low %v6529_v37, %v869_v40  ;;  %v883_v3 = vsel %vm6509_vm11, %v878_v52, %v882_v27  ;;  %v901_v4 = vrot.slane %v899_v60, 4  ;;  %v904_v8 = vrot.slane %v902_v62, 5  ;;  %5339 = vmatmul.mubr.bf16.gmra.mrb[4].mxu1 %v5710_v11  ;;  %v5726_v37 = vld [vmem:[#allocation8 + $0x8] sm:$0xff]   ;;  %v681_v33 = vld [vmem:[#allocation2 + $0x38] sm:$0x10]  ;;  %v5734_v31 = vld [vmem:[#allocation8 + $0x10] sm:$0xff]  }
 0x1b9   :  { %v897_v32 = vsel %vm6509_vm11, %v892_v45, %v896_v39  ;;  %v910_v17 = vrot.slane %v908_v56, 5  ;;  %v913_v51 = vshrl.u32 %v4630_v5, 16  ;;  %v916_v6 = vshll.u32 %v4630_v5, 16  ;;  %v687_v19 = vld [vmem:[#allocation2 + $0x58] sm:$0x10]  ;;  %v5741_v60 = vld [vmem:[#allocation8 + $0x130] sm:$0xff]  }
 0x1ba   :  { %5238 = vmatprep.mubr.bf16.mxu0 %v4652_v41  ;;  %v4653_v22 = vcombine.low %v883_v3, %v897_v32  ;;  %v905_v53 = vor.u32 %v904_v8, %v901_v4  ;;  %v922_v1 = vshll.u32 %v4631_v55, 16  ;;  %v504_v25 = vrot.slane %v502_v2, 7  ;;  %5357 = vmatpush3.bf16.msra.mxu1 %v5721_v36  ;;  %v592_v30 = vld [vmem:[#allocation2 + $0x78] sm:$0x1f]  ;;  %v2068_v5 = vld [vmem:[#allocation2 + $0x8] sm:$0x1f] }
 0x1bb   :  { %v915_v13 = vrot.slane %v913_v51, 4  ;;  %v918_v16 = vrot.slane %v916_v6, 5  ;;  %v505_v46 = vshll.u32 %v6520_v34, 16  ;;  %v643_v26 = vsel %vm6435_vm9, 0, %v642_v42  ;;  %5358 = vmatprep.subr.bf16.mxu1 %v5727_v9  ;;  %v6594_v44 = vld [vmem:[#allocation2 + $0x10] sm:$0x1f] }
 0x1bc   :  { %5239 = vmatmul.mubr.bf16.vlgmr.msra.gmra.mrb[16].mxu0 %v4653_v22  ;;  %v906_v27 = vrot.slane %v905_v53, 4  ;;  %v924_v48 = vrot.slane %v922_v1, 5  ;;  %644 = vst [vmem:[#allocation2 + $0x68] sm:$0x1] %v643_v26  ;;  %v509_v49 = vshrl.u32 %v6541_v47, 16  ;;  %v512_v2 = vshll.u32 %v6541_v47, 16 }
 0x1bd   :  { %v5711_v61 = vld [vmem:[#allocation2 + $0x58] ss:$8 sps:$4 sm:$0xff]   ;;  %v919_v20 = vor.u32 %v918_v16, %v915_v13  ;;  %5255 = vmatpush3.bf16.msra.mxu0 %v6229_v50  ;;  %v507_v28 = vor.u32 %v505_v46, %v504_v25  ;;  %v682_v34 = vsel %vm6448_vm10, 0, %v681_v33  ;;  %v4633_v63 = vcombine.high %v6563_v24, %v6563_v24 }
 0x1be   :  { %v911_v35 = vsel %vm6509_vm11, %v906_v27, %v910_v17  ;;  %5256 = vmatprep.subr.bf16.mxu0 %v5726_v37  ;;  %v511_v29 = vrot.slane %v509_v49, 7  ;;  %683 = vst [vmem:[#allocation2 + $0x38] sm:$0x10] %v682_v34  ;;  %v927_v36 = vshrl.u32 %v4632_v0, 16  ;;  %v930_v47 = vshll.u32 %v4632_v0, 16  ;;  %5342 = vmatprep.mubr.bf16.mxu1 %v5711_v61  ;;  %v5740_v4 = vld [vmem:[#allocation8 + $0x18] sm:$0xff]  }
 0x1bf   :  { %v920_v50 = vrot.slane %v919_v20, 4  ;;  %v590_v38 = vsel %vm6397_vm6, %v507_v28, %v589_v58  ;;  %5359 = vmatpush3.bf16.msra.mxu1 %v5727_v9  ;;  %v936_v57 = vshll.u32 %v4633_v63, 16  ;;  %v688_v24 = vsel %vm6448_vm10, 0, %v687_v19  ;;  %v598_v9 = vld [vmem:[#allocation2 + $0x88] sm:$0x1f]  ;;  %v5752_v1 = vld [vmem:[#allocation8 + $0x138] sm:$0xff]  }
 0x1c0   :  { %591 = vst [vmem:[#allocation2 + $0x70] sm:$0x1f] %v590_v38  ;;  %v514_v39 = vor.u32 %v512_v2, %v511_v29  ;;  %v929_v52 = vrot.slane %v927_v36, 4  ;;  %v932_v55 = vrot.slane %v930_v47, 5  ;;  %5360 = vmatprep.subr.bf16.mxu1 %v5735_v12  ;;  %689 = vst [vmem:[#allocation2 + $0x58] sm:$0x10] %v688_v24  ;;  %v4764_v42 = vcombine.low %v2068_v5, %v2068_v5 }
 0x1c1   :  { %v407_v62 = vmax.f32 %v6554_v18, 0.0  ;;  %v925_v11 = vsel %vm6509_vm11, %v920_v50, %v924_v48  ;;  %5257 = vmatpush3.bf16.msra.mxu0 %v5726_v37  ;;  %v938_v40 = vrot.slane %v936_v57, 5  ;;  %v523_v45 = vshrl.u32 %v6556_v54, 16  ;;  %v6607_v51 = vld [vmem:[#allocation2 + $0x18] sm:$0x1f]  ;;  %v5751_v19 = vld [vmem:[#allocation8 + $0x20] sm:$0xff]  }
 0x1c2   :  { %v526_v56 = vshll.u32 %v6556_v54, 16  ;;  %v4654_v0 = vcombine.low %v911_v35, %v925_v11  ;;  %v593_v41 = vsel %vm6397_vm6, %v514_v39, %v592_v30  ;;  %v933_v3 = vor.u32 %v932_v55, %v929_v52  ;;  %5258 = vmatprep.subr.bf16.mxu0 %v5734_v31  ;;  %v6623_v35 = vld [vmem:[#allocation8 + $0x140] sm:$0xff]   ;;  %v5757_v50 = vld [vmem:[#allocation8 + $0x28] sm:$0xff]  }
 0x1c3   :  { %v423_v8 = vpack.c.bf16 %v407_v62, %v407_v62  ;;  %594 = vst [vmem:[#allocation2 + $0x78] sm:$0x1f] %v593_v41  ;;  %5361 = vmatpush3.bf16.msra.mxu1 %v5735_v12  ;;  %v525_v18 = vrot.slane %v523_v45, 7  ;;  %v4765_v32 = vcombine.high %v2068_v5, %v2068_v5  ;;  %v6605_v17 = vcombine.low %v6594_v44, %v6594_v44  ;;  %v690_v55 = vld [vmem:[#allocation2 + $0x60] sm:$0x10] }
 0x1c4   :  { %5242 = vmatprep.mubr.bf16.mxu0 %v4654_v0  ;;  %v934_v54 = vrot.slane %v933_v3, 4  ;;  %5362 = vmatprep.subr.bf16.mxu1 %v5741_v60  ;;  %v4767_v53 = vcombine.high %v6594_v44, %v6594_v44  ;;  %v2165_v58 = vshrl.u32 %v4764_v42, 16  ;;  %v2168_v33 = vshll.u32 %v4764_v42, 16  ;;  %v693_v45 = vld [vmem:[#allocation2 + $0x68] sm:$0x10] }
 0x1c5   :  { %v530_v6 = vshrl.u32 %v423_v8, 16  ;;  %v533_v22 = vshll.u32 %v423_v8, 16  ;;  %v750_v37 = vld [vmem:[#allocation2 + $0x38] sm:$0x1f]  ;;  %5259 = vmatpush3.bf16.msra.mxu0 %v5734_v31  ;;  %v528_v25 = vor.u32 %v526_v56, %v525_v18  ;;  %v2174_v12 = vshll.u32 %v4765_v32, 16 }
 0x1c6   :  { %v4634_v13 = vcombine.low %v750_v37, %v750_v37  ;;  %v4635_v16 = vcombine.high %v750_v37, %v750_v37  ;;  %v6613_v46 = vsel %vm6509_vm11, %v934_v54, %v938_v40  ;;  %5260 = vmatprep.subr.bf16.mxu0 %v5740_v4  ;;  %v2167_v2 = vrot.slane %v2165_v58, 4  ;;  %v601_v31 = vld [vmem:[#allocation2 + $0x90] sm:$0x1f]  ;;  %v2071_v54 = vld [vmem:[#allocation2 + $0x20] sm:$0x1f] }
 0x1c7   :  { %v532_v26 = vrot.slane %v530_v6, 7  ;;  %v645_v27 = vld [vmem:[#allocation2 + $0x70] sm:$0x1]  ;;  %v752_v48 = vld [vmem:[#allocation2 + $0x58] sm:$0x1f]  ;;  %v599_v49 = vsel %vm6397_vm6, %v528_v25, %v598_v9  ;;  %5363 = vmatpush3.bf16.msra.mxu1 %v5741_v60  ;;  %v2170_v61 = vrot.slane %v2168_v33, 5  ;;  %v6619_v20 = vcombine.low %v6607_v51, %v6607_v51 }
 0x1c8   :  { %v646_v28 = vsel %vm6435_vm9, 0, %v645_v27  ;;  %v941_v30 = vshrl.u32 %v4634_v13, 16  ;;  %v944_v34 = vshll.u32 %v4634_v13, 16  ;;  %v950_v63 = vshll.u32 %v4635_v16, 16  ;;  %600 = vst [vmem:[#allocation2 + $0x88] sm:$0x1f] %v599_v49  ;;  %5364 = vmatprep.subr.bf16.mxu1 %v5752_v1 }
 0x1c9   :  { %647 = vst [vmem:[#allocation2 + $0x70] sm:$0x1] %v646_v28  ;;  %v4638_v29 = vcombine.low %v752_v48, %v752_v48  ;;  %v4639_v36 = vcombine.high %v752_v48, %v752_v48  ;;  %5261 = vmatpush3.bf16.msra.mxu0 %v5740_v4  ;;  %v535_v47 = vor.u32 %v533_v22, %v532_v26  ;;  %v2176_v52 = vrot.slane %v2174_v12, 5  ;;  %v696_v4 = vld [vmem:[#allocation2 + $0x70] sm:$0x10] }
 0x1ca   :  { %v2171_v5 = vor.u32 %v2170_v61, %v2167_v2  ;;  %v648_v38 = vld [vmem:[#allocation2 + $0x78] sm:$0x1]  ;;  %v943_v57 = vrot.slane %v941_v30, 4  ;;  %v946_v24 = vrot.slane %v944_v34, 5  ;;  %v952_v39 = vrot.slane %v950_v63, 5  ;;  %5262 = vmatprep.subr.bf16.mxu0 %v5751_v19  ;;  %v5771_v25 = vld [vmem:[#allocation8 + $0x30] sm:$0xff]  }
 0x1cb   :  { %v649_v60 = vsel %vm6435_vm9, 0, %v648_v38  ;;  %v969_v62 = vshrl.u32 %v4638_v29, 16  ;;  %v972_v11 = vshll.u32 %v4638_v29, 16  ;;  %v978_v40 = vshll.u32 %v4639_v36, 16  ;;  %5365 = vmatpush3.bf16.msra.mxu1 %v5752_v1  ;;  %v699_v32 = vld [vmem:[#allocation2 + $0x78] sm:$0x10] }
 0x1cc   :  { %650 = vst [vmem:[#allocation2 + $0x78] sm:$0x1] %v649_v60  ;;  %v947_v56 = vor.u32 %v946_v24, %v943_v57  ;;  %v602_v0 = vsel %vm6397_vm6, %v535_v47, %v601_v31  ;;  %v2172_v41 = vrot.slane %v2171_v5, 4  ;;  %v2179_v3 = vshrl.u32 %v6605_v17, 16  ;;  %5382 = vmatprep.subr.bf16.mxu1 %v6623_v35  ;;  %v6639_v37 = vld [vmem:[#allocation2 + $0x28] sm:$0x1f] }
 0x1cd   :  { %v971_v8 = vrot.slane %v969_v62, 4  ;;  %v974_v9 = vrot.slane %v972_v11, 5  ;;  %v980_v18 = vrot.slane %v978_v40, 5  ;;  %603 = vst [vmem:[#allocation2 + $0x90] sm:$0x1f] %v602_v0  ;;  %v2182_v42 = vshll.u32 %v6605_v17, 16  ;;  %5263 = vmatpush3.bf16.msra.mxu0 %v5751_v19 }
 0x1ce   :  { %v948_v6 = vrot.slane %v947_v56, 4  ;;  %v6634_v10 = vsel %vm6509_vm11, %v2172_v41, %v2176_v52  ;;  %v2181_v22 = vrot.slane %v2179_v3, 4  ;;  %v2188_v1 = vshll.u32 %v4767_v53, 16  ;;  %5264 = vmatprep.subr.bf16.mxu0 %v5757_v50  ;;  %v6657_v63 = vld [vmem:[#allocation2 + $0x30] sm:$0x1f]  ;;  %v6677_v40 = vld [vmem:[#allocation8 + $0x80] sm:$0xff]  }
 0x1cf   :  { %v975_v58 = vor.u32 %v974_v9, %v971_v8  ;;  %v654_v33 = vld [vmem:[#allocation2 + $0x88] sm:$0x1]  ;;  %v2184_v17 = vrot.slane %v2182_v42, 5  ;;  %v691_v12 = vsel %vm6448_vm10, 0, %v690_v55  ;;  %v694_v13 = vsel %vm6448_vm10, 0, %v693_v45 }
 0x1d0   :  { %v5728_v16 = vld [vmem:[#allocation2 + $0x68] ss:$8 sps:$4 sm:$0xff]   ;;  %v953_v26 = vsel %vm6509_vm11, %v948_v6, %v952_v39  ;;  %v655_v44 = vsel %vm6435_vm9, 0, %v654_v33  ;;  %v2190_v53 = vrot.slane %v2188_v1, 5  ;;  %692 = vst [vmem:[#allocation2 + $0x60] sm:$0x10] %v691_v12  ;;  %v4769_v19 = vcombine.high %v6607_v51, %v6607_v51 }
 0x1d1   :  { %695 = vst [vmem:[#allocation2 + $0x68] sm:$0x10] %v694_v13  ;;  %v4655_v27 = vcombine.low %v6613_v46, %v953_v26  ;;  %v976_v48 = vrot.slane %v975_v58, 4  ;;  %656 = vst [vmem:[#allocation2 + $0x88] sm:$0x1] %v655_v44  ;;  %v2185_v49 = vor.u32 %v2184_v17, %v2181_v22  ;;  %v697_v2 = vsel %vm6448_vm10, 0, %v696_v4  ;;  %5265 = vmatpush3.bf16.msra.mxu0 %v5757_v50 }
 0x1d2   :  { %5343 = vmatmul.mubr.bf16.gmra.mrb[8].mxu1 %v5728_v16  ;;  %698 = vst [vmem:[#allocation2 + $0x70] sm:$0x10] %v697_v2  ;;  %v700_v61 = vsel %vm6448_vm10, 0, %v699_v32  ;;  %v4770_v28 = vcombine.low %v2071_v54, %v2071_v54  ;;  %v4771_v30 = vcombine.high %v2071_v54, %v2071_v54  ;;  %v2193_v34 = vshrl.u32 %v6619_v20, 16  ;;  %5266 = vmatprep.subr.bf16.mxu0 %v5771_v25  ;;  %v5774_v51 = vld [vmem:[#allocation8 + $0x38] sm:$0xff]  }
 0x1d3   :  { %v5729_v46 = vld [vmem:[#allocation2 + $0x78] ss:$8 sps:$4 sm:$0xff]   ;;  %5243 = vmatmul.mubr.bf16.gmra.mrb[20].mxu0 %v4655_v27  ;;  %v981_v29 = vsel %vm6509_vm11, %v976_v48, %v980_v18  ;;  %v2186_v36 = vrot.slane %v2185_v49, 4  ;;  %701 = vst [vmem:[#allocation2 + $0x78] sm:$0x10] %v700_v61  ;;  %v2196_v47 = vshll.u32 %v6619_v20, 16  ;;  %v6664_v31 = vcombine.low %v6639_v37, %v6639_v37 }
 0x1d4   :  { %v4656_v5 = vcombine.low %v6536_v7, %v981_v29  ;;  %v657_v50 = vld [vmem:[#allocation2 + $0x90] sm:$0x1]  ;;  %v2195_v38 = vrot.slane %v2193_v34, 4  ;;  %v6667_v57 = vshll.u32 %v4769_v19, 16  ;;  %v2207_v24 = vshrl.u32 %v4770_v28, 16  ;;  %5346 = vmatprep.mubr.bf16.mxu1 %v5729_v46 }
 0x1d5   :  { %v658_v39 = vsel %vm6435_vm9, 0, %v657_v50  ;;  %v2191_v52 = vsel %vm6509_vm11, %v2186_v36, %v2190_v53  ;;  %v2198_v55 = vrot.slane %v2196_v47, 5  ;;  %v2210_v20 = vshll.u32 %v4770_v28, 16  ;;  %5267 = vmatpush3.bf16.msra.mxu0 %v5771_v25 }
 0x1d6   :  { %5246 = vmatprep.mubr.bf16.mxu0 %v4656_v5  ;;  %659 = vst [vmem:[#allocation2 + $0x90] sm:$0x1] %v658_v39  ;;  %v4796_v60 = vcombine.low %v6634_v10, %v2191_v52  ;;  %v2204_v7 = vrot.slane %v6667_v57, 5  ;;  %v2209_v62 = vrot.slane %v2207_v24, 4  ;;  %v6675_v11 = vshll.u32 %v4771_v30, 16  ;;  %5268 = vmatprep.subr.bf16.mxu0 %v5774_v51 }
 0x1d7   :  { %v753_v15 = vld [vmem:[#allocation2 + $0x60] sm:$0x1f]  ;;  %v2199_v56 = vor.u32 %v2198_v55, %v2195_v38  ;;  %v2212_v0 = vrot.slane %v2210_v20, 5  ;;  %v4773_v41 = vcombine.high %v6639_v37, %v6639_v37  ;;  %v6683_v3 = vcombine.low %v6657_v63, %v6657_v63 }
 0x1d8   :  { %v754_v45 = vld [vmem:[#allocation2 + $0x68] sm:$0x1f]  ;;  %v4640_v4 = vcombine.low %v753_v15, %v753_v15  ;;  %v4641_v8 = vcombine.high %v753_v15, %v753_v15  ;;  %v2218_v6 = vrot.slane %v6675_v11, 5  ;;  %v4775_v10 = vcombine.high %v6657_v63, %v6657_v63 }
 0x1d9   :  { %v4642_v9 = vcombine.low %v754_v45, %v754_v45  ;;  %v4643_v18 = vcombine.high %v754_v45, %v754_v45  ;;  %v755_v42 = vld [vmem:[#allocation2 + $0x70] sm:$0x1f]  ;;  %v2200_v32 = vrot.slane %v2199_v56, 4  ;;  %v2213_v54 = vor.u32 %v2212_v0, %v2209_v62  ;;  %5269 = vmatpush3.bf16.msra.mxu0 %v5774_v51 }
 0x1da   :  { %v983_v22 = vshrl.u32 %v4640_v4, 16  ;;  %v986_v1 = vshll.u32 %v4640_v4, 16  ;;  %v992_v37 = vshll.u32 %v4641_v8, 16  ;;  %v756_v58 = vld [vmem:[#allocation2 + $0x78] sm:$0x1f]  ;;  %5286 = vmatprep.subr.bf16.mxu0 %v6677_v40  ;;  %v4644_v12 = vcombine.low %v755_v42, %v755_v42 }
 0x1db   :  { %v997_v25 = vshrl.u32 %v4642_v9, 16  ;;  %v1000_v33 = vshll.u32 %v4642_v9, 16  ;;  %v1006_v17 = vshll.u32 %v4643_v18, 16  ;;  %v4645_v13 = vcombine.high %v755_v42, %v755_v42  ;;  %v705_v18 = vld [vmem:[#allocation2 + $0x88] sm:$0x10] }
 0x1dc   :  { %v985_v16 = vrot.slane %v983_v22, 4  ;;  %v988_v26 = vrot.slane %v986_v1, 5  ;;  %v994_v44 = vrot.slane %v992_v37, 5  ;;  %v4646_v49 = vcombine.low %v756_v58, %v756_v58 }
 0x1dd   :  { %v999_v53 = vrot.slane %v997_v25, 4  ;;  %v5742_v19 = vld [vmem:[#allocation2 + $0x88] ss:$8 sps:$4 sm:$0xff]   ;;  %v1002_v27 = vrot.slane %v1000_v33, 5  ;;  %v1008_v48 = vrot.slane %v1006_v17, 5  ;;  %v4647_v2 = vcombine.high %v756_v58, %v756_v58 }
 0x1de   :  { %v989_v61 = vor.u32 %v988_v26, %v985_v16  ;;  %v1011_v28 = vshrl.u32 %v4644_v12, 16  ;;  %v1014_v30 = vshll.u32 %v4644_v12, 16  ;;  %v1020_v34 = vshll.u32 %v4645_v13, 16  ;;  %5347 = vmatmul.mubr.bf16.gmra.mrb[12].mxu1 %v5742_v19  ;;  %v684_v33 = vld [vmem:[#allocation2 + $0x40] sm:$0x10] }
 0x1df   :  { %v1003_v51 = vor.u32 %v1002_v27, %v999_v53  ;;  %v1025_v46 = vshrl.u32 %v4646_v49, 16  ;;  %v1028_v29 = vshll.u32 %v4646_v49, 16  ;;  %v1034_v36 = vshll.u32 %v4647_v2, 16  ;;  %5366 = vmatprep.mubr.bf16.mxu1 %v4796_v60  ;;  %v2074_v13 = vld [vmem:[#allocation2 + $0x38] sm:$0x1f]  ;;  %v5775_v49 = vld [vmem:[#allocation8 + $0x150] sm:$0xff]  }
 0x1e0   :  { %v990_v47 = vrot.slane %v989_v61, 4  ;;  %v1013_v5 = vrot.slane %v1011_v28, 4  ;;  %v1016_v50 = vrot.slane %v1014_v30, 5  ;;  %v1022_v38 = vrot.slane %v1020_v34, 5  ;;  %v2076_v53 = vld [vmem:[#allocation2 + $0x58] sm:$0x1f] }
 0x1e1   :  { %v1004_v57 = vrot.slane %v1003_v51, 4  ;;  %v1027_v24 = vrot.slane %v1025_v46, 4  ;;  %v1030_v39 = vrot.slane %v1028_v29, 5  ;;  %v1036_v52 = vrot.slane %v1034_v36, 5  ;;  %v6715_v51 = vld [vmem:[#allocation2 + $0x60] sm:$0x1f] }
 0x1e2   :  { %v995_v55 = vsel %vm6509_vm11, %v990_v47, %v994_v44  ;;  %v1017_v20 = vor.u32 %v1016_v50, %v1013_v5  ;;  %v2205_v62 = vsel %vm6509_vm11, %v2200_v32, %v2204_v7  ;;  %v2214_v11 = vrot.slane %v2213_v54, 4  ;;  %v757_v32 = vld [vmem:[#allocation2 + $0x80] sm:$0x1f]  ;;  %v5772_v54 = vld [vmem:[#allocation8 + $0x148] sm:$0xff]  }
 0x1e3   :  { %v1009_v15 = vsel %vm6509_vm11, %v1004_v57, %v1008_v48  ;;  %v1031_v60 = vor.u32 %v1030_v39, %v1027_v24  ;;  %v2221_v45 = vshrl.u32 %v6664_v31, 16  ;;  %v2224_v56 = vshll.u32 %v6664_v31, 16  ;;  %v5786_v39 = vld [vmem:[#allocation8 + $0x158] sm:$0xff]  }
 0x1e4   :  { %v4657_v0 = vcombine.low %v995_v55, %v1009_v15  ;;  %v1018_v4 = vrot.slane %v1017_v20, 4  ;;  %v2219_v8 = vsel %vm6509_vm11, %v2214_v11, %v2218_v6  ;;  %v2230_v9 = vshll.u32 %v4773_v41, 16 }
 0x1e5   :  { %v1032_v42 = vrot.slane %v1031_v60, 4  ;;  %v4797_v22 = vcombine.low %v2205_v62, %v2219_v8  ;;  %v2223_v1 = vrot.slane %v2221_v45, 4  ;;  %v2226_v7 = vrot.slane %v2224_v56, 5 }
 0x1e6   :  { %5247 = vmatmul.mubr.bf16.gmra.mrb[24].mxu0 %v4657_v0  ;;  %v1023_v37 = vsel %vm6509_vm11, %v1018_v4, %v1022_v38  ;;  %v2232_v25 = vrot.slane %v2230_v9, 5  ;;  %v2235_v31 = vshrl.u32 %v6683_v3, 16  ;;  %v2238_v58 = vshll.u32 %v6683_v3, 16 }
 0x1e7   :  { %v1037_v41 = vsel %vm6509_vm11, %v1032_v42, %v1036_v52  ;;  %5367 = vmatmul.mubr.bf16.vlgmr.msra.gmra.mrb[0].mxu1 %v4797_v22  ;;  %v2227_v6 = vor.u32 %v2226_v7, %v2223_v1  ;;  %v2244_v17 = vshll.u32 %v4775_v10, 16  ;;  %v706_v12 = vsel %vm6448_vm10, 0, %v705_v18 }
 0x1e8   :  { %v4658_v16 = vcombine.low %v1023_v37, %v1037_v41  ;;  %5383 = vmatpush3.bf16.msra.mxu1 %v6623_v35  ;;  %v2237_v26 = vrot.slane %v2235_v31, 4  ;;  %v2240_v44 = vrot.slane %v2238_v58, 5  ;;  %707 = vst [vmem:[#allocation2 + $0x88] sm:$0x10] %v706_v12  ;;  %v4648_v3 = vcombine.low %v757_v32, %v757_v32 }
 0x1e9   :  { %v2228_v19 = vrot.slane %v2227_v6, 4  ;;  %v2246_v27 = vrot.slane %v2244_v17, 5  ;;  %v4649_v48 = vcombine.high %v757_v32, %v757_v32  ;;  %5384 = vmatprep.subr.bf16.mxu1 %v5772_v54  ;;  %v685_v63 = vsel %vm6448_vm10, 0, %v684_v33  ;;  %v5789_v32 = vld [vmem:[#allocation8 + $0x160] sm:$0xff]  }
 0x1ea   :  { %5250 = vmatprep.mubr.bf16.mxu0 %v4658_v16  ;;  %v2241_v10 = vor.u32 %v2240_v44, %v2237_v26  ;;  %v1039_v2 = vshrl.u32 %v4648_v3, 16  ;;  %v1042_v61 = vshll.u32 %v4648_v3, 16  ;;  %686 = vst [vmem:[#allocation2 + $0x40] sm:$0x10] %v685_v63  ;;  %v4776_v28 = vcombine.low %v2074_v13, %v2074_v13 }
 0x1eb   :  { %v2233_v35 = vsel %vm6509_vm11, %v2228_v19, %v2232_v25  ;;  %v1048_v30 = vshll.u32 %v4649_v48, 16  ;;  %v4777_v34 = vcombine.high %v2074_v13, %v2074_v13  ;;  %v4780_v46 = vcombine.low %v2076_v53, %v2076_v53  ;;  %v2078_v19 = vld [vmem:[#allocation2 + $0x68] sm:$0x1f] }
 0x1ec   :  { %v2242_v29 = vrot.slane %v2241_v10, 4  ;;  %v1041_v36 = vrot.slane %v1039_v2, 4  ;;  %v1044_v47 = vrot.slane %v1042_v61, 5  ;;  %5385 = vmatpush3.bf16.msra.mxu1 %v5772_v54  ;;  %v2249_v5 = vshrl.u32 %v4776_v28, 16  ;;  %v2079_v2 = vld [vmem:[#allocation2 + $0x70] sm:$0x1f] }
 0x1ed   :  { %v1050_v50 = vrot.slane %v1048_v30, 5  ;;  %5386 = vmatprep.subr.bf16.mxu1 %v5775_v49  ;;  %v2252_v38 = vshll.u32 %v4776_v28, 16  ;;  %v2258_v57 = vshll.u32 %v4777_v34, 16  ;;  %v4781_v24 = vcombine.high %v2076_v53, %v2076_v53 }
 0x1ee   :  { %v2247_v52 = vsel %vm6509_vm11, %v2242_v29, %v2246_v27  ;;  %v1045_v55 = vor.u32 %v1044_v47, %v1041_v36  ;;  %v2251_v20 = vrot.slane %v2249_v5, 4  ;;  %v4782_v62 = vcombine.low %v6715_v51, %v6715_v51  ;;  %v5800_v27 = vld [vmem:[#allocation8 + $0x168] sm:$0xff]  }
 0x1ef   :  { %v4798_v11 = vcombine.low %v2233_v35, %v2247_v52  ;;  %v758_v15 = vld [vmem:[#allocation2 + $0x88] sm:$0x1f]  ;;  %v2254_v60 = vrot.slane %v2252_v38, 5  ;;  %v2260_v45 = vrot.slane %v2258_v57, 5  ;;  %v4783_v56 = vcombine.high %v6715_v51, %v6715_v51  ;;  %v5803_v38 = vld [vmem:[#allocation8 + $0x170] sm:$0xff]  }
 0x1f0   :  { %v4650_v0 = vcombine.low %v758_v15, %v758_v15  ;;  %v4651_v4 = vcombine.high %v758_v15, %v758_v15  ;;  %v1046_v8 = vrot.slane %v1045_v55, 4  ;;  %5387 = vmatpush3.bf16.msra.mxu1 %v5775_v49  ;;  %v2277_v9 = vshrl.u32 %v4780_v46, 16 }
 0x1f1   :  { %5370 = vmatprep.mubr.bf16.mxu1 %v4798_v11  ;;  %v2075_v18 = vld [vmem:[#allocation2 + $0x40] sm:$0x1f]  ;;  %v2255_v42 = vor.u32 %v2254_v60, %v2251_v20  ;;  %v2280_v22 = vshll.u32 %v4780_v46, 16  ;;  %v2286_v1 = vshll.u32 %v4781_v24, 16  ;;  %v2291_v7 = vshrl.u32 %v4782_v62, 16  ;;  %5388 = vmatprep.subr.bf16.mxu1 %v5786_v39 }
 0x1f2   :  { %v1051_v54 = vsel %vm6509_vm11, %v1046_v8, %v1050_v50  ;;  %v1053_v37 = vshrl.u32 %v4650_v0, 16  ;;  %v1056_v25 = vshll.u32 %v4650_v0, 16  ;;  %v1062_v31 = vshll.u32 %v4651_v4, 16  ;;  %v5773_v20 = vld [vmem:[#allocation2] ss:$8 sps:$4 sm:$0xff]  }
 0x1f3   :  { %v4778_v58 = vcombine.low %v2075_v18, %v2075_v18  ;;  %v4779_v33 = vcombine.high %v2075_v18, %v2075_v18  ;;  %v2256_v41 = vrot.slane %v2255_v42, 4  ;;  %v2279_v6 = vrot.slane %v2277_v9, 4  ;;  %v2081_v60 = vld [vmem:[#allocation2 + $0x80] sm:$0x1f]  ;;  %v2080_v8 = vld [vmem:[#allocation2 + $0x78] sm:$0x1f] }
 0x1f4   :  { %v1055_v17 = vrot.slane %v1053_v37, 4  ;;  %v1058_v12 = vrot.slane %v1056_v25, 5  ;;  %v1064_v13 = vrot.slane %v1062_v31, 5  ;;  %v2282_v16 = vrot.slane %v2280_v22, 5  ;;  %5389 = vmatpush3.bf16.msra.mxu1 %v5786_v39  ;;  %v5814_v37 = vld [vmem:[#allocation8 + $0x178] sm:$0xff]  }
 0x1f5   :  { %v2261_v26 = vsel %vm6509_vm11, %v2256_v41, %v2260_v45  ;;  %v2263_v44 = vshrl.u32 %v4778_v58, 16  ;;  %v2266_v3 = vshll.u32 %v4778_v58, 16  ;;  %v2272_v53 = vshll.u32 %v4779_v33, 16  ;;  %5390 = vmatprep.subr.bf16.mxu1 %v5789_v32 }
 0x1f6   :  { %v1059_v48 = vor.u32 %v1058_v12, %v1055_v17  ;;  %v2283_v49 = vor.u32 %v2282_v16, %v2279_v6  ;;  %v2288_v63 = vrot.slane %v2286_v1, 5  ;;  %v2293_v10 = vrot.slane %v2291_v7, 4  ;;  %v5788_v16 = vld [vmem:[#allocation8 + $0x88] sm:$0xff]  }
 0x1f7   :  { %v2265_v61 = vrot.slane %v2263_v44, 4  ;;  %v2268_v28 = vrot.slane %v2266_v3, 5  ;;  %v2274_v35 = vrot.slane %v2272_v53, 5  ;;  %v2294_v30 = vshll.u32 %v4782_v62, 16 }
 0x1f8   :  { %v1060_v34 = vrot.slane %v1059_v48, 4  ;;  %v2284_v51 = vrot.slane %v2283_v49, 4  ;;  %v2300_v46 = vshll.u32 %v4783_v56, 16  ;;  %v4784_v29 = vcombine.low %v2078_v19, %v2078_v19  ;;  %5391 = vmatpush3.bf16.msra.mxu1 %v5789_v32  ;;  %v5787_v48 = vld [vmem:[#allocation2 + $0x20] ss:$8 sps:$4 sm:$0xff]  }
 0x1f9   :  { %v2269_v36 = vor.u32 %v2268_v28, %v2265_v61  ;;  %v2296_v47 = vrot.slane %v2294_v30, 5  ;;  %v4785_v5 = vcombine.high %v2078_v19, %v2078_v19  ;;  %v4786_v50 = vcombine.low %v2079_v2, %v2079_v2  ;;  %5392 = vmatprep.subr.bf16.mxu1 %v5800_v27  ;;  %v708_v19 = vld [vmem:[#allocation2 + $0x90] sm:$0x10]  ;;  %v2598_v61 = vld [vmem:[#allocation2 + $0x8] sm:$0x1e] }
 0x1fa   :  { %v1065_v57 = vsel %vm6509_vm11, %v1060_v34, %v1064_v13  ;;  %v2289_v24 = vsel %vm6509_vm11, %v2284_v51, %v2288_v63  ;;  %v2302_v39 = vrot.slane %v2300_v46, 5  ;;  %v4787_v52 = vcombine.high %v2079_v2, %v2079_v2  ;;  %v5784_v13 = vld [vmem:[#allocation2 + $0x10] ss:$8 sps:$4 sm:$0xff]   ;;  %v2082_v51 = vld [vmem:[#allocation2 + $0x88] sm:$0x1f] }
 0x1fb   :  { %v4659_v55 = vcombine.low %v1051_v54, %v1065_v57  ;;  %v2270_v62 = vrot.slane %v2269_v36, 4  ;;  %v2297_v11 = vor.u32 %v2296_v47, %v2293_v10  ;;  %v2305_v15 = vshrl.u32 %v4784_v29, 16 }
 0x1fc   :  { %v2308_v45 = vshll.u32 %v4784_v29, 16  ;;  %v2314_v56 = vshll.u32 %v4785_v5, 16  ;;  %v2319_v0 = vshrl.u32 %v4786_v50, 16  ;;  %v2322_v4 = vshll.u32 %v4786_v50, 16  ;;  %5393 = vmatpush3.bf16.msra.mxu1 %v5800_v27  ;;  %v6735_v27 = vld [vmem:[#allocation8 + $0x180] sm:$0xff]  }
 0x1fd   :  { %5251 = vmatmul.mubr.bf16.gmra.mrb[28].mxu0 %v4659_v55  ;;  %v2275_v9 = vsel %vm6509_vm11, %v2270_v62, %v2274_v35  ;;  %v2298_v18 = vrot.slane %v2297_v11, 4  ;;  %v2307_v42 = vrot.slane %v2305_v15, 4  ;;  %v2328_v22 = vshll.u32 %v4787_v52, 16  ;;  %5394 = vmatprep.subr.bf16.mxu1 %v5803_v38  ;;  %v2599_v55 = vld [vmem:[#allocation2 + $0x10] sm:$0x1e] }
 0x1fe   :  { %5270 = vmatprep.mubr.bf16.mxu0 %v5773_v20  ;;  %v4799_v1 = vcombine.low %v2261_v26, %v2275_v9  ;;  %v2310_v7 = vrot.slane %v2308_v45, 5  ;;  %v2316_v32 = vrot.slane %v2314_v56, 5  ;;  %v2321_v54 = vrot.slane %v2319_v0, 4  ;;  %v5799_v62 = vld [vmem:[#allocation8 + $0x90] sm:$0xff]   ;;  %v2600_v9 = vld [vmem:[#allocation2 + $0x18] sm:$0x1e] }
 0x1ff   :  { %v2303_v25 = vsel %vm6509_vm11, %v2298_v18, %v2302_v39  ;;  %v2324_v31 = vrot.slane %v2322_v4, 5  ;;  %v2330_v58 = vrot.slane %v2328_v22, 5  ;;  %v4788_v33 = vcombine.low %v2080_v8, %v2080_v8 }
 0x200   :  { %5371 = vmatmul.mubr.bf16.gmra.mrb[4].mxu1 %v4799_v1  ;;  %v4800_v41 = vcombine.low %v2289_v24, %v2303_v25  ;;  %v2311_v6 = vor.u32 %v2310_v7, %v2307_v42  ;;  %v4789_v17 = vcombine.high %v2080_v8, %v2080_v8  ;;  %v4790_v12 = vcombine.low %v2081_v60, %v2081_v60  ;;  %v5802_v25 = vld [vmem:[#allocation8 + $0x98] sm:$0xff]  }
 0x201   :  { %v2325_v44 = vor.u32 %v2324_v31, %v2321_v54  ;;  %v4791_v3 = vcombine.high %v2081_v60, %v2081_v60  ;;  %v2333_v26 = vshrl.u32 %v4788_v33, 16  ;;  %v2336_v53 = vshll.u32 %v4788_v33, 16  ;;  %5395 = vmatpush3.bf16.msra.mxu1 %v5803_v38  ;;  %v5990_v33 = vld [vmem:[#allocation2] sm:$0x1e] }
 0x202   :  { %5374 = vmatprep.mubr.bf16.mxu1 %v4800_v41  ;;  %v2312_v49 = vrot.slane %v2311_v6, 4  ;;  %v2342_v63 = vshll.u32 %v4789_v17, 16  ;;  %v2347_v10 = vshrl.u32 %v4790_v12, 16  ;;  %v2350_v2 = vshll.u32 %v4790_v12, 16  ;;  %5396 = vmatprep.subr.bf16.mxu1 %v5814_v37  ;;  %v5801_v6 = vld [vmem:[#allocation2 + $0x50] ss:$8 sps:$4 sm:$0xff]  }
 0x203   :  { %v2326_v28 = vrot.slane %v2325_v44, 4  ;;  %v2335_v35 = vrot.slane %v2333_v26, 4  ;;  %v2338_v30 = vrot.slane %v2336_v53, 5  ;;  %v2356_v34 = vshll.u32 %v4791_v3, 16 }
 0x204   :  { %v2317_v46 = vsel %vm6509_vm11, %v2312_v49, %v2316_v32  ;;  %v2344_v29 = vrot.slane %v2342_v63, 5  ;;  %v2349_v36 = vrot.slane %v2347_v10, 4  ;;  %v2352_v47 = vrot.slane %v2350_v2, 5  ;;  %v2601_v32 = vld [vmem:[#allocation2 + $0x20] sm:$0x1e] }
 0x205   :  { %5271 = vmatmul.mubr.bf16.vlgmr.msra.gmra.mrb[16].mxu0 %v5784_v13  ;;  %v2331_v5 = vsel %vm6509_vm11, %v2326_v28, %v2330_v58  ;;  %v2339_v50 = vor.u32 %v2338_v30, %v2335_v35  ;;  %v2358_v38 = vrot.slane %v2356_v34, 5  ;;  %v709_v57 = vsel %vm6448_vm10, 0, %v708_v19  ;;  %5397 = vmatpush3.bf16.msra.mxu1 %v5814_v37  ;;  %v5798_v37 = vld [vmem:[#allocation2 + $0x30] ss:$8 sps:$4 sm:$0xff]   ;;  %v5813_v2 = vld [vmem:[#allocation8 + $0xa0] sm:$0xff]  }
 0x206   :  { %5274 = vmatprep.mubr.bf16.mxu0 %v5787_v48  ;;  %5287 = vmatpush3.bf16.msra.mxu0 %v6677_v40  ;;  %v4801_v24 = vcombine.low %v2317_v46, %v2331_v5  ;;  %v2353_v39 = vor.u32 %v2352_v47, %v2349_v36  ;;  %710 = vst [vmem:[#allocation2 + $0x90] sm:$0x10] %v709_v57  ;;  %v2603_v34 = vld [vmem:[#allocation2 + $0x30] sm:$0x1e] }
 0x207   :  { %v4792_v52 = vcombine.low %v2082_v51, %v2082_v51  ;;  %5288 = vmatprep.subr.bf16.mxu0 %v5788_v16  ;;  %v2340_v20 = vrot.slane %v2339_v50, 4  ;;  %v4793_v11 = vcombine.high %v2082_v51, %v2082_v51  ;;  %v4812_v15 = vcombine.low %v2598_v61, %v2598_v61  ;;  %5414 = vmatprep.subr.bf16.mxu1 %v6735_v27 }
 0x208   :  { %5375 = vmatmul.mubr.bf16.gmra.mrb[8].mxu1 %v4801_v24  ;;  %v2354_v21 = vrot.slane %v2353_v39, 4  ;;  %v4813_v56 = vcombine.high %v2598_v61, %v2598_v61  ;;  %v4814_v4 = vcombine.low %v2599_v55, %v2599_v55  ;;  %v4815_v8 = vcombine.high %v2599_v55, %v2599_v55  ;;  %v2602_v61 = vld [vmem:[#allocation2 + $0x28] sm:$0x1e] }
 0x209   :  { %v2361_v60 = vshrl.u32 %v4792_v52, 16  ;;  %v2364_v45 = vshll.u32 %v4792_v52, 16  ;;  %v2345_v40 = vsel %vm6509_vm11, %v2340_v20, %v2344_v29  ;;  %v2370_v0 = vshll.u32 %v4793_v11, 16  ;;  %v1454_v24 = vld [vmem:[#allocation2 + $0x8] sm:$0x1e] }
 0x20a   :  { %5289 = vmatpush3.bf16.msra.mxu0 %v5788_v16  ;;  %v2359_v18 = vsel %vm6509_vm11, %v2354_v21, %v2358_v38  ;;  %v4844_v7 = vrot.slane %v4812_v15, 9  ;;  %v2696_v31 = vrot.slane %v4813_v56, 5  ;;  %v4845_v58 = vrot.slane %v4814_v4, 9  ;;  %v5816_v55 = vld [vmem:[#allocation8 + $0xa8] sm:$0xff]  }
 0x20b   :  { %v2363_v42 = vrot.slane %v2361_v60, 4  ;;  %v2366_v22 = vrot.slane %v2364_v45, 5  ;;  %v4802_v54 = vcombine.low %v2345_v40, %v2359_v18  ;;  %5290 = vmatprep.subr.bf16.mxu0 %v5799_v62  ;;  %v4685_v41 = vcombine.high %v5990_v33, %v5990_v33  ;;  %v5812_v20 = vld [vmem:[#allocation2 + $0x60] ss:$8 sps:$4 sm:$0xff]   ;;  %v2604_v60 = vld [vmem:[#allocation2 + $0x38] sm:$0x1e] }
 0x20c   :  { %v2700_v12 = vrot.slane %v4815_v8, 5  ;;  %v4816_v13 = vcombine.low %v2600_v9, %v2600_v9  ;;  %v4817_v16 = vcombine.high %v2600_v9, %v2600_v9  ;;  %v2372_v3 = vrot.slane %v2370_v0, 5  ;;  %v5815_v40 = vld [vmem:[#allocation2 + $0x70] ss:$8 sps:$4 sm:$0xff]   ;;  %v2605_v8 = vld [vmem:[#allocation2 + $0x40] sm:$0x1e] }
 0x20d   :  { %v2367_v17 = vor.u32 %v2366_v22, %v2363_v42  ;;  %5378 = vmatprep.mubr.bf16.mxu1 %v4802_v54  ;;  %5275 = vmatmul.mubr.bf16.gmra.mrb[20].mxu0 %v5798_v37  ;;  %v2083_v44 = vld [vmem:[#allocation2 + $0x90] sm:$0x1f]  ;;  %v2697_v26 = vsel %vm6751_vm14, %v4844_v7, %v2696_v31  ;;  %v4818_v53 = vcombine.low %v2601_v32, %v2601_v32  ;;  %v4716_v51 = vrot.slane %v4684_v59, 9 }
 0x20e   :  { %v4819_v19 = vcombine.high %v2601_v32, %v2601_v32  ;;  %5278 = vmatprep.mubr.bf16.mxu0 %v5801_v6  ;;  %5291 = vmatpush3.bf16.msra.mxu0 %v5799_v62  ;;  %v4794_v48 = vcombine.low %v2083_v44, %v2083_v44  ;;  %v4795_v49 = vcombine.high %v2083_v44, %v2083_v44  ;;  %v4846_v28 = vrot.slane %v4816_v13, 9  ;;  %v5827_v31 = vld [vmem:[#allocation8 + $0xb0] sm:$0xff]   ;;  %v2607_v44 = vld [vmem:[#allocation2 + $0x60] sm:$0x1e] }
 0x20f   :  { %v2368_v63 = vrot.slane %v2367_v17, 4  ;;  %v2701_v10 = vsel %vm6751_vm14, %v4845_v58, %v2700_v12  ;;  %5292 = vmatprep.subr.bf16.mxu0 %v5802_v25  ;;  %v2704_v35 = vrot.slane %v4817_v16, 5  ;;  %v4847_v30 = vrot.slane %v4818_v53, 9  ;;  %v2606_v17 = vld [vmem:[#allocation2 + $0x58] sm:$0x1e] }
 0x210   :  { %v2375_v46 = vshrl.u32 %v4794_v48, 16  ;;  %v2378_v29 = vshll.u32 %v4794_v48, 16  ;;  %v2384_v36 = vshll.u32 %v4795_v49, 16  ;;  %v6762_v47 = vcombine.low %v2697_v26, %v2701_v10  ;;  %v1455_v48 = vld [vmem:[#allocation2 + $0x10] sm:$0x1e] }
 0x211   :  { %v2373_v5 = vsel %vm6509_vm11, %v2368_v63, %v2372_v3  ;;  %v2708_v50 = vrot.slane %v4819_v19, 5  ;;  %v4820_v38 = vcombine.low %v2602_v61, %v2602_v61  ;;  %v4821_v57 = vcombine.high %v2602_v61, %v2602_v61  ;;  %v5826_v61 = vld [vmem:[#allocation2 + $0x80] ss:$8 sps:$4 sm:$0xff]  }
 0x212   :  { %5293 = vmatpush3.bf16.msra.mxu0 %v5802_v25  ;;  %v2377_v39 = vrot.slane %v2375_v46, 4  ;;  %v2380_v52 = vrot.slane %v2378_v29, 5  ;;  %v2705_v23 = vsel %vm6751_vm14, %v4846_v28, %v2704_v35  ;;  %v4822_v59 = vcombine.low %v2603_v34, %v2603_v34  ;;  %v5833_v28 = vld [vmem:[#allocation8 + $0xb8] sm:$0xff]  }
 0x213   :  { %5294 = vmatprep.subr.bf16.mxu0 %v5813_v2  ;;  %v2709_v62 = vsel %vm6751_vm14, %v4847_v30, %v2708_v50  ;;  %v4823_v11 = vcombine.high %v2603_v34, %v2603_v34  ;;  %v4848_v15 = vrot.slane %v4820_v38, 9  ;;  %v2712_v21 = vrot.slane %v4821_v57, 5  ;;  %v1457_v50 = vld [vmem:[#allocation2 + $0x20] sm:$0x1e] }
 0x214   :  { %v2381_v45 = vor.u32 %v2380_v52, %v2377_v39  ;;  %v2386_v56 = vrot.slane %v2384_v36, 5  ;;  %v4849_v0 = vrot.slane %v4822_v59, 9  ;;  %v4686_v4 = vcombine.low %v1454_v24, %v1454_v24  ;;  %v1458_v52 = vld [vmem:[#allocation2 + $0x28] sm:$0x1e] }
 0x215   :  { %5279 = vmatmul.mubr.bf16.gmra.mrb[24].mxu0 %v5812_v20  ;;  %v6770_v9 = vcombine.low %v2705_v23, %v2709_v62  ;;  %v2716_v18 = vrot.slane %v4823_v11, 5  ;;  %v4687_v42 = vcombine.high %v1454_v24, %v1454_v24  ;;  %v1554_v22 = vrot.slane %v4685_v41, 5 }
 0x216   :  { %v2382_v7 = vrot.slane %v2381_v45, 4  ;;  %5282 = vmatprep.mubr.bf16.mxu0 %v5815_v40  ;;  %5295 = vmatpush3.bf16.msra.mxu0 %v5813_v2  ;;  %v4717_v32 = vrot.slane %v4686_v4, 9  ;;  %v4824_v54 = vcombine.low %v2604_v60, %v2604_v60  ;;  %v4825_v37 = vcombine.high %v2604_v60, %v2604_v60  ;;  %v5828_v4 = vld [vmem:[#allocation8 + $0x188] sm:$0xff]  }
 0x217   :  { %5296 = vmatprep.subr.bf16.mxu0 %v5816_v55  ;;  %v2713_v25 = vsel %vm6751_vm14, %v4848_v15, %v2712_v21  ;;  %v1555_v58 = vsel %vm6751_vm14, %v4716_v51, %v1554_v22  ;;  %v1558_v33 = vrot.slane %v4687_v42, 5  ;;  %v4826_v6 = vcombine.low %v2605_v8, %v2605_v8  ;;  %v1456_v51 = vld [vmem:[#allocation2 + $0x18] sm:$0x1e]  ;;  %v2608_v21 = vld [vmem:[#allocation2 + $0x68] sm:$0x1e] }
 0x218   :  { %v2387_v41 = vsel %vm6509_vm11, %v2382_v7, %v2386_v56  ;;  %v2717_v12 = vsel %vm6751_vm14, %v4849_v0, %v2716_v18  ;;  %v4827_v13 = vcombine.high %v2605_v8, %v2605_v8  ;;  %v4850_v16 = vrot.slane %v4824_v54, 9  ;;  %v2609_v0 = vld [vmem:[#allocation2 + $0x70] sm:$0x1e]  ;;  %v2610_v7 = vld [vmem:[#allocation2 + $0x78] sm:$0x1e] }
 0x219   :  { %v4803_v3 = vcombine.low %v2373_v5, %v2387_v41  ;;  %v1559_v26 = vsel %vm6751_vm14, %v4717_v32, %v1558_v33  ;;  %v2720_v53 = vrot.slane %v4825_v37, 5  ;;  %v4851_v19 = vrot.slane %v4826_v6, 9 }
 0x21a   :  { %5297 = vmatpush3.bf16.msra.mxu0 %v5816_v55  ;;  %v4732_v49 = vcombine.low %v1555_v58, %v1559_v26  ;;  %v2724_v63 = vrot.slane %v4827_v13, 5  ;;  %v4828_v10 = vcombine.low %v2606_v17, %v2606_v17  ;;  %v4829_v2 = vcombine.high %v2606_v17, %v2606_v17 }
 0x21b   :  { %5379 = vmatmul.mubr.bf16.gmra.mrb[12].mxu1 %v4803_v3  ;;  %5298 = vmatprep.subr.bf16.mxu0 %v5827_v31  ;;  %v2721_v35 = vsel %vm6751_vm14, %v4850_v16, %v2720_v53  ;;  %v4830_v30 = vcombine.low %v2607_v44, %v2607_v44  ;;  %v4831_v34 = vcombine.high %v2607_v44, %v2607_v44  ;;  %v1459_v44 = vld [vmem:[#allocation2 + $0x30] sm:$0x1e] }
 0x21c   :  { %5398 = vmatprep.mubr.bf16.mxu1 %v6762_v47  ;;  %v2725_v46 = vsel %vm6751_vm14, %v4851_v19, %v2724_v63  ;;  %v6787_v29 = vrot.slane %v4828_v10, 9  ;;  %v6789_v36 = vrot.slane %v4829_v2, 5  ;;  %v4688_v5 = vcombine.low %v1455_v48, %v1455_v48  ;;  %v5834_v3 = vld [vmem:[#allocation8 + $0x190] sm:$0xff]  }
 0x21d   :  { %v4862_v38 = vcombine.low %v2713_v25, %v2717_v12  ;;  %5283 = vmatmul.mubr.bf16.gmra.mrb[28].mxu0 %v5826_v61  ;;  %v6791_v57 = vrot.slane %v4830_v30, 9  ;;  %v6793_v24 = vrot.slane %v4831_v34, 5  ;;  %v4689_v39 = vcombine.high %v1455_v48, %v1455_v48  ;;  %v1460_v48 = vld [vmem:[#allocation2 + $0x38] sm:$0x1e]  ;;  %v1461_v30 = vld [vmem:[#allocation2 + $0x50] sm:$0x1e] }
 0x21e   :  { %5299 = vmatpush3.bf16.msra.mxu0 %v5827_v31  ;;  %5302 = vmatprep.mubr.bf16.mxu0 %v4732_v49  ;;  %v6795_v47 = vcombine.low %v2721_v35, %v2725_v46  ;;  %v4690_v55 = vcombine.low %v1456_v51, %v1456_v51  ;;  %v4691_v23 = vcombine.high %v1456_v51, %v1456_v51  ;;  %v4718_v59 = vrot.slane %v4688_v5, 9  ;;  %v2611_v31 = vld [vmem:[#allocation2 + $0x80] sm:$0x1e] }
 0x21f   :  { %5300 = vmatprep.subr.bf16.mxu0 %v5833_v28  ;;  %v2729_v20 = vsel %vm6751_vm14, %v6787_v29, %v6789_v36  ;;  %v1562_v62 = vrot.slane %v4689_v39, 5  ;;  %v4692_v11 = vcombine.low %v1457_v50, %v1457_v50  ;;  %v4693_v15 = vcombine.high %v1457_v50, %v1457_v50  ;;  %v1462_v36 = vld [vmem:[#allocation2 + $0x58] sm:$0x1e]  ;;  %v2612_v39 = vld [vmem:[#allocation2 + $0x88] sm:$0x1e] }
 0x220   :  { %v2733_v60 = vsel %vm6751_vm14, %v6791_v57, %v6793_v24  ;;  %v4719_v45 = vrot.slane %v4690_v55, 9  ;;  %v1566_v56 = vrot.slane %v4691_v23, 5  ;;  %v4694_v40 = vcombine.low %v1458_v52, %v1458_v52  ;;  %v5847_v50 = vld [vmem:[#allocation8 + $0x198] sm:$0xff]  }
 0x221   :  { %v1563_v8 = vsel %vm6751_vm14, %v4718_v59, %v1562_v62  ;;  %v4695_v18 = vcombine.high %v1458_v52, %v1458_v52  ;;  %v4720_v42 = vrot.slane %v4692_v11, 9  ;;  %v1570_v22 = vrot.slane %v4693_v15, 5 }
 0x222   :  { %5301 = vmatpush3.bf16.msra.mxu0 %v5833_v28  ;;  %v1567_v32 = vsel %vm6751_vm14, %v4719_v45, %v1566_v56  ;;  %v4721_v54 = vrot.slane %v4694_v40, 9  ;;  %v4832_v37 = vcombine.low %v2608_v21, %v2608_v21  ;;  %v4833_v25 = vcombine.high %v2608_v21, %v2608_v21 }
 0x223   :  { %5399 = vmatmul.mubr.bf16.vlgmr.msra.gmra.mrb[0].mxu1 %v6770_v9  ;;  %v4733_v58 = vcombine.low %v1563_v8, %v1567_v32  ;;  %v1571_v33 = vsel %vm6751_vm14, %v4720_v42, %v1570_v22  ;;  %v1574_v6 = vrot.slane %v4695_v18, 5  ;;  %v4834_v17 = vcombine.low %v2609_v0, %v2609_v0 }
 0x224   :  { %5415 = vmatpush3.bf16.msra.mxu1 %v6735_v27  ;;  %5402 = vmatprep.mubr.bf16.mxu1 %v4862_v38  ;;  %v4835_v41 = vcombine.high %v2609_v0, %v2609_v0  ;;  %v4854_v12 = vrot.slane %v4832_v37, 9  ;;  %v2736_v13 = vrot.slane %v4833_v25, 5  ;;  %v4836_v16 = vcombine.low %v2610_v7, %v2610_v7  ;;  %v1463_v0 = vld [vmem:[#allocation2 + $0x60] sm:$0x1e]  ;;  %v1464_v37 = vld [vmem:[#allocation2 + $0x68] sm:$0x1e] }
 0x225   :  { %5416 = vmatprep.subr.bf16.mxu1 %v5828_v4  ;;  %5303 = vmatmul.mubr.bf16.vlgmr.msra.gmra.mrb[16].mxu0 %v4733_v58  ;;  %v1575_v9 = vsel %vm6751_vm14, %v4721_v54, %v1574_v6  ;;  %v4855_v26 = vrot.slane %v4834_v17, 9  ;;  %v4837_v53 = vcombine.high %v2610_v7, %v2610_v7  ;;  %v4838_v19 = vcombine.low %v2611_v31, %v2611_v31  ;;  %v1465_v6 = vld [vmem:[#allocation2 + $0x70] sm:$0x1e] }
 0x226   :  { %v4734_v49 = vcombine.low %v1571_v33, %v1575_v9  ;;  %v2737_v27 = vsel %vm6751_vm14, %v4854_v12, %v2736_v13  ;;  %v2740_v63 = vrot.slane %v4835_v41, 5  ;;  %v4839_v10 = vcombine.high %v2611_v31, %v2611_v31 }
 0x227   :  { %v4856_v2 = vrot.slane %v4836_v16, 9  ;;  %v2744_v61 = vrot.slane %v4837_v53, 5  ;;  %v4857_v28 = vrot.slane %v4838_v19, 9  ;;  %v4696_v35 = vcombine.low %v1459_v44, %v1459_v44  ;;  %v1466_v53 = vld [vmem:[#allocation2 + $0x78] sm:$0x1e] }
 0x228   :  { %5417 = vmatpush3.bf16.msra.mxu1 %v5828_v4  ;;  %5306 = vmatprep.mubr.bf16.mxu0 %v4734_v49  ;;  %v2741_v34 = vsel %vm6751_vm14, %v4855_v26, %v2740_v63  ;;  %v2748_v51 = vrot.slane %v4839_v10, 5  ;;  %v4697_v46 = vcombine.high %v1459_v44, %v1459_v44  ;;  %v4698_v29 = vcombine.low %v1460_v48, %v1460_v48  ;;  %v5852_v4 = vld [vmem:[#allocation8 + $0x1a0] sm:$0xff]   ;;  %v5865_v44 = vld [vmem:[#allocation8 + $0x1a8] sm:$0xff]  }
 0x229   :  { %5418 = vmatprep.subr.bf16.mxu1 %v5834_v3  ;;  %v4864_v5 = vcombine.low %v2729_v20, %v2733_v60  ;;  %v4865_v38 = vcombine.low %v2737_v27, %v2741_v34  ;;  %v4699_v57 = vcombine.high %v1460_v48, %v1460_v48  ;;  %v4722_v24 = vrot.slane %v4696_v35, 9  ;;  %v2613_v20 = vld [vmem:[#allocation2 + $0x90] sm:$0x1e]  ;;  %v1467_v63 = vld [vmem:[#allocation2 + $0x80] sm:$0x1e] }
 0x22a   :  { %v2745_v52 = vsel %vm6751_vm14, %v4856_v2, %v2744_v61  ;;  %v1578_v55 = vrot.slane %v4697_v46, 5  ;;  %v4723_v23 = vrot.slane %v4698_v29, 9  ;;  %v4700_v59 = vcombine.low %v1461_v30, %v1461_v30  ;;  %v1468_v35 = vld [vmem:[#allocation2 + $0x88] sm:$0x1e]  ;;  %v5870_v29 = vld [vmem:[#allocation8 + $0x1b0] sm:$0xff]  }
 0x22b   :  { %5403 = vmatmul.mubr.bf16.gmra.mrb[4].mxu1 %v6795_v47  ;;  %v2749_v62 = vsel %vm6751_vm14, %v4857_v28, %v2748_v51  ;;  %v1582_v11 = vrot.slane %v4699_v57, 5  ;;  %v4701_v15 = vcombine.high %v1461_v30, %v1461_v30  ;;  %v4702_v21 = vcombine.low %v1462_v36, %v1462_v36 }
 0x22c   :  { %5419 = vmatpush3.bf16.msra.mxu1 %v5834_v3  ;;  %5406 = vmatprep.mubr.bf16.mxu1 %v4864_v5  ;;  %v1579_v60 = vsel %vm6751_vm14, %v4722_v24, %v1578_v55  ;;  %v4703_v45 = vcombine.high %v1462_v36, %v1462_v36  ;;  %v4724_v56 = vrot.slane %v4700_v59, 9  ;;  %v4840_v40 = vcombine.low %v2612_v39, %v2612_v39 }
 0x22d   :  { %5420 = vmatprep.subr.bf16.mxu1 %v5847_v50  ;;  %v1583_v47 = vsel %vm6751_vm14, %v4723_v23, %v1582_v11  ;;  %v1586_v8 = vrot.slane %v4701_v15, 5  ;;  %v4725_v18 = vrot.slane %v4702_v21, 9  ;;  %v4841_v42 = vcombine.high %v2612_v39, %v2612_v39  ;;  %v6844_v21 = vld [vmem:[#allocation2 + $0x10] sm:$0x1f] }
 0x22e   :  { %v4735_v22 = vcombine.low %v1579_v60, %v1583_v47  ;;  %v1590_v7 = vrot.slane %v4703_v45, 5  ;;  %v4842_v32 = vcombine.low %v2613_v20, %v2613_v20  ;;  %v4843_v54 = vcombine.high %v2613_v20, %v2613_v20  ;;  %v5880_v60 = vld [vmem:[#allocation8 + $0x1b8] sm:$0xff]  }
 0x22f   :  { %v1587_v25 = vsel %vm6751_vm14, %v4724_v56, %v1586_v8  ;;  %v4858_v31 = vrot.slane %v4840_v40, 9  ;;  %v2752_v58 = vrot.slane %v4841_v42, 5  ;;  %v4704_v33 = vcombine.low %v1463_v0, %v1463_v0  ;;  %v6846_v40 = vld [vmem:[#allocation2 + $0x18] sm:$0x1f]  ;;  %v3213_v42 = vld [vmem:[#allocation2 + $0x20] sm:$0x1f] }
 0x230   :  { %5421 = vmatpush3.bf16.msra.mxu1 %v5847_v50  ;;  %5307 = vmatmul.mubr.bf16.gmra.mrb[20].mxu0 %v4735_v22  ;;  %v1591_v17 = vsel %vm6751_vm14, %v4725_v18, %v1590_v7  ;;  %v4859_v41 = vrot.slane %v4842_v32, 9  ;;  %v2756_v12 = vrot.slane %v4843_v54, 5  ;;  %v4705_v13 = vcombine.high %v1463_v0, %v1463_v0  ;;  %v5875_v0 = vld [vmem:[#allocation2 + $0x10] ss:$8 sps:$4 sm:$0xff]   ;;  %v5885_v22 = vld [vmem:[#allocation8 + $0x1c0] sm:$0xff]  }
 0x231   :  { %5422 = vmatprep.subr.bf16.mxu1 %v5852_v4  ;;  %v4866_v16 = vcombine.low %v2745_v52, %v2749_v62  ;;  %v4736_v3 = vcombine.low %v1587_v25, %v1591_v17  ;;  %v4706_v9 = vcombine.low %v1464_v37, %v1464_v37  ;;  %v4707_v26 = vcombine.high %v1464_v37, %v1464_v37  ;;  %v6856_v32 = vld [vmem:[#allocation2 + $0x28] sm:$0x1f] }
 0x232   :  { %v2753_v19 = vsel %vm6751_vm14, %v4858_v31, %v2752_v58  ;;  %v4726_v48 = vrot.slane %v4704_v33, 9  ;;  %v1594_v49 = vrot.slane %v4705_v13, 5  ;;  %v4708_v27 = vcombine.low %v1465_v6, %v1465_v6  ;;  %v6858_v31 = vld [vmem:[#allocation2 + $0x30] sm:$0x1f]  ;;  %v5892_v17 = vld [vmem:[#allocation8 + $0x1c8] sm:$0xff]  }
 0x233   :  { %5407 = vmatmul.mubr.bf16.gmra.mrb[8].mxu1 %v4865_v38  ;;  %5310 = vmatprep.mubr.bf16.mxu0 %v4736_v3  ;;  %v2757_v10 = vsel %vm6751_vm14, %v4859_v41, %v2756_v12  ;;  %v4727_v2 = vrot.slane %v4706_v9, 9  ;;  %v1598_v61 = vrot.slane %v4707_v26, 5  ;;  %v4709_v28 = vcombine.high %v1465_v6, %v1465_v6  ;;  %v5886_v6 = vld [vmem:[#allocation2 + $0x20] ss:$8 sps:$4 sm:$0xff]   ;;  %v6862_v12 = vld [vmem:[#allocation2 + $0x38] sm:$0x1f] }
 0x234   :  { %5423 = vmatpush3.bf16.msra.mxu1 %v5852_v4  ;;  %5410 = vmatprep.mubr.bf16.mxu1 %v4866_v16  ;;  %v1595_v30 = vsel %vm6751_vm14, %v4726_v48, %v1594_v49  ;;  %v4710_v34 = vcombine.low %v1466_v53, %v1466_v53  ;;  %v4711_v51 = vcombine.high %v1466_v53, %v1466_v53  ;;  %v4728_v46 = vrot.slane %v4708_v27, 9  ;;  %v5887_v13 = vld [vmem:[#allocation2 + $0x30] ss:$8 sps:$4 sm:$0xff]  }
 0x235   :  { %5424 = vmatprep.subr.bf16.mxu1 %v5865_v44  ;;  %v1599_v36 = vsel %vm6751_vm14, %v4727_v2, %v1598_v61  ;;  %v1602_v5 = vrot.slane %v4709_v28, 5  ;;  %v4712_v50 = vcombine.low %v1467_v63, %v1467_v63  ;;  %v4713_v38 = vcombine.high %v1467_v63, %v1467_v63  ;;  %v5893_v27 = vld [vmem:[#allocation8 + $0x1d0] sm:$0xff]  }
 0x236   :  { %v4737_v57 = vcombine.low %v1595_v30, %v1599_v36  ;;  %v4729_v24 = vrot.slane %v4710_v34, 9  ;;  %v1606_v39 = vrot.slane %v4711_v51, 5  ;;  %v4714_v52 = vcombine.low %v1468_v35, %v1468_v35  ;;  %v5894_v36 = vld [vmem:[#allocation2 + $0x40] ss:$8 sps:$4 sm:$0xff]  }
 0x237   :  { %v1603_v55 = vsel %vm6751_vm14, %v4728_v46, %v1602_v5  ;;  %v4715_v23 = vcombine.high %v1468_v35, %v1468_v35  ;;  %v4730_v59 = vrot.slane %v4712_v50, 9  ;;  %v1610_v62 = vrot.slane %v4713_v38, 5  ;;  %v5896_v5 = vld [vmem:[#allocation8 + $0x1d8] sm:$0xff]  }
 0x238   :  { %5425 = vmatpush3.bf16.msra.mxu1 %v5865_v44  ;;  %5311 = vmatmul.mubr.bf16.gmra.mrb[24].mxu0 %v4737_v57  ;;  %v1607_v11 = vsel %vm6751_vm14, %v4729_v24, %v1606_v39  ;;  %v4731_v15 = vrot.slane %v4714_v52, 9  ;;  %v4867_v20 = vcombine.low %v2753_v19, %v2757_v10  ;;  %v4892_v8 = vcombine.low %v6844_v21, %v6844_v21  ;;  %v5895_v24 = vld [vmem:[#allocation2 + $0x60] ss:$8 sps:$4 sm:$0xff]  }
 0x239   :  { %5426 = vmatprep.subr.bf16.mxu1 %v5870_v29  ;;  %v4738_v45 = vcombine.low %v1603_v55, %v1607_v11  ;;  %v1614_v56 = vrot.slane %v4715_v23, 5  ;;  %v1611_v4 = vsel %vm6751_vm14, %v4730_v59, %v1610_v62  ;;  %v4894_v18 = vcombine.low %v6846_v40, %v6846_v40 }
 0x23a   :  { %v3308_v54 = vshrl.u32 %v4892_v8, 16  ;;  %v3311_v37 = vshll.u32 %v4892_v8, 16  ;;  %v4896_v25 = vcombine.low %v3213_v42, %v3213_v42  ;;  %v4898_v41 = vcombine.low %v6856_v32, %v6856_v32  ;;  %v5897_v8 = vld [vmem:[#allocation8 + $0x1e0] sm:$0xff]  }
 0x23b   :  { %5411 = vmatmul.mubr.bf16.gmra.mrb[12].mxu1 %v4867_v20  ;;  %5314 = vmatprep.mubr.bf16.mxu0 %v4738_v45  ;;  %v1615_v47 = vsel %vm6751_vm14, %v4731_v15, %v1614_v56  ;;  %v3322_v58 = vshrl.u32 %v4894_v18, 16  ;;  %v3325_v33 = vshll.u32 %v4894_v18, 16  ;;  %v4900_v16 = vcombine.low %v6858_v31, %v6858_v31  ;;  %v6876_v56 = vld [vmem:[#allocation2 + $0x48] sm:$0x1f] }
 0x23c   :  { %5427 = vmatpush3.bf16.msra.mxu1 %v5870_v29  ;;  %5430 = vmatprep.mubr.bf16.mxu1 %v5875_v0  ;;  %v4739_v7 = vcombine.low %v1611_v4, %v1615_v47  ;;  %v3310_v44 = vrot.slane %v3308_v54, 4  ;;  %v3313_v3 = vrot.slane %v3311_v37, 5  ;;  %v3336_v9 = vshrl.u32 %v4896_v25, 16  ;;  %v6880_v47 = vld [vmem:[#allocation2 + $0x60] sm:$0x1f] }
 0x23d   :  { %5428 = vmatprep.subr.bf16.mxu1 %v5880_v60  ;;  %v3339_v26 = vshll.u32 %v4896_v25, 16  ;;  %v4893_v53 = vcombine.high %v6844_v21, %v6844_v21  ;;  %v3324_v19 = vrot.slane %v3322_v58, 4  ;;  %v3327_v48 = vrot.slane %v3325_v33, 5  ;;  %v3217_v21 = vld [vmem:[#allocation2 + $0x40] sm:$0x1f] }
 0x23e   :  { %v4902_v49 = vcombine.low %v6862_v12, %v6862_v12  ;;  %v3350_v63 = vshrl.u32 %v4898_v41, 16  ;;  %v3353_v10 = vshll.u32 %v4898_v41, 16  ;;  %v3364_v2 = vshrl.u32 %v4900_v16, 16 }
 0x23f   :  { %v3367_v61 = vshll.u32 %v4900_v16, 16  ;;  %v4895_v28 = vcombine.high %v6846_v40, %v6846_v40  ;;  %v4897_v35 = vcombine.high %v3213_v42, %v3213_v42  ;;  %v3314_v51 = vor.u32 %v3313_v3, %v3310_v44  ;;  %v5898_v44 = vld [vmem:[#allocation2 + $0x70] ss:$8 sps:$4 sm:$0xff]   ;;  %v5900_v3 = vld [vmem:[#allocation8 + $0x1e8] sm:$0xff]  }
 0x240   :  { %5429 = vmatpush3.bf16.msra.mxu1 %v5880_v60  ;;  %5315 = vmatmul.mubr.bf16.gmra.mrb[28].mxu0 %v4739_v7  ;;  %v3378_v30 = vshrl.u32 %v4902_v49, 16  ;;  %v3381_v34 = vshll.u32 %v4902_v49, 16  ;;  %v3338_v46 = vrot.slane %v3336_v9, 4  ;;  %v3341_v29 = vrot.slane %v3339_v26, 5 }
 0x241   :  { %5446 = vmatprep.subr.bf16.mxu1 %v5885_v22  ;;  %v3317_v50 = vshll.u32 %v4893_v53, 16  ;;  %v3328_v38 = vor.u32 %v3327_v48, %v3324_v19  ;;  %v4899_v57 = vcombine.high %v6856_v32, %v6856_v32  ;;  %v3352_v39 = vrot.slane %v3350_v63, 4  ;;  %v6882_v32 = vld [vmem:[#allocation2 + $0x68] sm:$0x1f] }
 0x242   :  { %v3355_v52 = vrot.slane %v3353_v10, 5  ;;  %v3366_v55 = vrot.slane %v3364_v2, 4  ;;  %v3369_v23 = vrot.slane %v3367_v61, 5  ;;  %v3331_v59 = vshll.u32 %v4895_v28, 16  ;;  %v5899_v48 = vld [vmem:[#allocation2 + $0x80] ss:$8 sps:$4 sm:$0xff]  }
 0x243   :  { %5431 = vmatmul.mubr.bf16.vlgmr.msra.gmra.mrb[0].mxu1 %v5886_v6  ;;  %v3345_v62 = vshll.u32 %v4897_v35, 16  ;;  %v3380_v11 = vrot.slane %v3378_v30, 4  ;;  %v3383_v15 = vrot.slane %v3381_v34, 5  ;;  %v3315_v20 = vrot.slane %v3314_v51, 4 }
 0x244   :  { %5447 = vmatpush3.bf16.msra.mxu1 %v5885_v22  ;;  %5434 = vmatprep.mubr.bf16.mxu1 %v5887_v13  ;;  %v3342_v60 = vor.u32 %v3341_v29, %v3338_v46  ;;  %v4901_v45 = vcombine.high %v6858_v31, %v6858_v31  ;;  %v3329_v40 = vrot.slane %v3328_v38, 4  ;;  %v3359_v0 = vshll.u32 %v4899_v57, 16  ;;  %v6904_v29 = vld [vmem:[#allocation2 + $0x70] sm:$0x1f] }
 0x245   :  { %5448 = vmatprep.subr.bf16.mxu1 %v5892_v17  ;;  %v4903_v4 = vcombine.high %v6862_v12, %v6862_v12  ;;  %v3319_v18 = vrot.slane %v3317_v50, 5  ;;  %v3356_v42 = vor.u32 %v3355_v52, %v3352_v39  ;;  %v3370_v22 = vor.u32 %v3369_v23, %v3366_v55 }
 0x246   :  { %v4904_v7 = vcombine.low %v3217_v21, %v3217_v21  ;;  %v3333_v54 = vrot.slane %v3331_v59, 5  ;;  %v3347_v37 = vrot.slane %v3345_v62, 5  ;;  %v3384_v25 = vor.u32 %v3383_v15, %v3380_v11 }
 0x247   :  { %v4906_v31 = vcombine.low %v6876_v56, %v6876_v56  ;;  %v6888_v58 = vsel %vm6509_vm11, %v3315_v20, %v3319_v18  ;;  %v3343_v33 = vrot.slane %v3342_v60, 4  ;;  %v3373_v6 = vshll.u32 %v4901_v45, 16 }
 0x248   :  { %5449 = vmatpush3.bf16.msra.mxu1 %v5892_v17  ;;  %v4908_v17 = vcombine.low %v6880_v47, %v6880_v47  ;;  %v6894_v41 = vsel %vm6509_vm11, %v3329_v40, %v3333_v54  ;;  %v3361_v12 = vrot.slane %v3359_v0, 5  ;;  %v3387_v13 = vshll.u32 %v4903_v4, 16  ;;  %v6932_v40 = vld [vmem:[#allocation2 + $0x88] sm:$0x1f]  ;;  %v5902_v0 = vld [vmem:[#allocation2 + $0x90] ss:$8 sps:$4 sm:$0xff]  }
 0x249   :  { %5450 = vmatprep.subr.bf16.mxu1 %v5893_v27  ;;  %v4910_v16 = vcombine.low %v6882_v32, %v6882_v32  ;;  %v3357_v9 = vrot.slane %v3356_v42, 4  ;;  %v3371_v26 = vrot.slane %v3370_v22, 4  ;;  %v4905_v53 = vcombine.high %v3217_v21, %v3217_v21  ;;  %v6926_v21 = vld [vmem:[#allocation2 + $0x80] sm:$0x1f]  ;;  %v5907_v4 = vld [vmem:[#allocation8 + $0x1f8] sm:$0xff]  }
 0x24a   :  { %v3392_v19 = vshrl.u32 %v4904_v7, 16  ;;  %v3385_v49 = vrot.slane %v3384_v25, 4  ;;  %v3406_v63 = vshrl.u32 %v4906_v31, 16  ;;  %v3409_v10 = vshll.u32 %v4906_v31, 16 }
 0x24b   :  { %5435 = vmatmul.mubr.bf16.gmra.mrb[4].mxu1 %v5894_v36  ;;  %v6900_v2 = vsel %vm6509_vm11, %v3343_v33, %v3347_v37  ;;  %v3375_v61 = vrot.slane %v3373_v6, 5  ;;  %v3420_v28 = vshrl.u32 %v4908_v17, 16  ;;  %v3423_v35 = vshll.u32 %v4908_v17, 16  ;;  %v5901_v36 = vld [vmem:[#allocation8 + $0x1f0] sm:$0xff]  }
 0x24c   :  { %5451 = vmatpush3.bf16.msra.mxu1 %v5893_v27  ;;  %5438 = vmatprep.mubr.bf16.mxu1 %v5895_v24  ;;  %v3395_v27 = vshll.u32 %v4904_v7, 16  ;;  %v3389_v30 = vrot.slane %v3387_v13, 5  ;;  %v4907_v34 = vcombine.high %v6876_v56, %v6876_v56  ;;  %v3434_v51 = vshrl.u32 %v4910_v16, 16  ;;  %v6916_v24 = vld [vmem:[#allocation2 + $0x78] sm:$0x1f]  ;;  %v5908_v13 = vld [vmem:[#allocation8 + $0x200] sm:$0xff]  }
 0x24d   :  { %5452 = vmatprep.subr.bf16.mxu1 %v5896_v5  ;;  %v3437_v46 = vshll.u32 %v4910_v16, 16  ;;  %v6912_v50 = vsel %vm6509_vm11, %v3371_v26, %v3375_v61  ;;  %v3394_v38 = vrot.slane %v3392_v19, 4  ;;  %v6914_v57 = vshll.u32 %v4905_v53, 16 }
 0x24e   :  { %v6920_v39 = vsel %vm6509_vm11, %v3385_v49, %v3389_v30  ;;  %v3397_v52 = vrot.slane %v3395_v27, 5  ;;  %v3408_v55 = vrot.slane %v3406_v63, 4  ;;  %v3411_v23 = vrot.slane %v3409_v10, 5 }
 0x24f   :  { %v4924_v59 = vcombine.low %v6888_v58, %v6894_v41  ;;  %v3422_v62 = vrot.slane %v3420_v28, 4  ;;  %v3425_v11 = vrot.slane %v3423_v35, 5  ;;  %v4912_v15 = vcombine.low %v6904_v29, %v6904_v29 }
 0x250   :  { %5453 = vmatpush3.bf16.msra.mxu1 %v5896_v5  ;;  %v6908_v5 = vsel %vm6509_vm11, %v3357_v9, %v3361_v12  ;;  %v6928_v20 = vshll.u32 %v4907_v34, 16  ;;  %v3436_v60 = vrot.slane %v3434_v51, 4  ;;  %v3439_v45 = vrot.slane %v3437_v46, 5  ;;  %v5917_v34 = vld [vmem:[#allocation8 + $0x208] sm:$0xff]  }
 0x251   :  { %5454 = vmatprep.subr.bf16.mxu1 %v5897_v8  ;;  %v4914_v56 = vcombine.low %v6916_v24, %v6916_v24  ;;  %v4926_v18 = vcombine.low %v6912_v50, %v6920_v39  ;;  %v3403_v42 = vrot.slane %v6914_v57, 5  ;;  %v4909_v22 = vcombine.high %v6880_v47, %v6880_v47 }
 0x252   :  { %v3398_v7 = vor.u32 %v3397_v52, %v3394_v38  ;;  %v3412_v54 = vor.u32 %v3411_v23, %v3408_v55  ;;  %v4911_v37 = vcombine.high %v6882_v32, %v6882_v32  ;;  %v4916_v25 = vcombine.low %v6926_v21, %v6926_v21 }
 0x253   :  { %5439 = vmatmul.mubr.bf16.gmra.mrb[8].mxu1 %v5898_v44  ;;  %v3426_v31 = vor.u32 %v3425_v11, %v3422_v62  ;;  %v3448_v58 = vshrl.u32 %v4912_v15, 16  ;;  %v3451_v33 = vshll.u32 %v4912_v15, 16  ;;  %v4918_v6 = vcombine.low %v6932_v40, %v6932_v40  ;;  %v5918_v15 = vld [vmem:[#allocation8 + $0x210] sm:$0xff]  }
 0x254   :  { %5455 = vmatpush3.bf16.msra.mxu1 %v5897_v8  ;;  %5442 = vmatprep.mubr.bf16.mxu1 %v5899_v48  ;;  %v4925_v8 = vcombine.low %v6900_v2, %v6908_v5  ;;  %v3417_v17 = vrot.slane %v6928_v20, 5  ;;  %v3440_v47 = vor.u32 %v3439_v45, %v3436_v60  ;;  %v3462_v41 = vshrl.u32 %v4914_v56, 16  ;;  %v6948_v48 = vld [vmem:[#allocation2 + $0x90] sm:$0x1f]  ;;  %v6952_v2 = vld [vmem:[#allocation2 + $0x98] sm:$0x1f] }
 0x255   :  { %5456 = vmatprep.subr.bf16.mxu1 %v5900_v3  ;;  %v3465_v12 = vshll.u32 %v4914_v56, 16  ;;  %v3476_v32 = vshrl.u32 %v4916_v25, 16  ;;  %v3479_v16 = vshll.u32 %v4916_v25, 16  ;;  %v3490_v44 = vshrl.u32 %v4918_v6, 16  ;;  %v5927_v25 = vld [vmem:[#allocation8 + $0x218] sm:$0xff]  }
 0x256   :  { %v3399_v9 = vrot.slane %v3398_v7, 4  ;;  %v3413_v26 = vrot.slane %v3412_v54, 4  ;;  %v3429_v53 = vshll.u32 %v4909_v22, 16  ;;  %v3443_v19 = vshll.u32 %v4911_v37, 16 }
 0x257   :  { %v3427_v49 = vrot.slane %v3426_v31, 4  ;;  %v4913_v27 = vcombine.high %v6904_v29, %v6904_v29  ;;  %v3450_v63 = vrot.slane %v3448_v58, 4  ;;  %v3453_v10 = vrot.slane %v3451_v33, 5 }
 0x258   :  { %5457 = vmatpush3.bf16.msra.mxu1 %v5900_v3  ;;  %v3493_v3 = vshll.u32 %v4918_v6, 16  ;;  %v3441_v61 = vrot.slane %v3440_v47, 4  ;;  %v4915_v28 = vcombine.high %v6916_v24, %v6916_v24  ;;  %v3464_v35 = vrot.slane %v3462_v41, 4 }
 0x259   :  { %5458 = vmatprep.subr.bf16.mxu1 %v5901_v36  ;;  %v3467_v30 = vrot.slane %v3465_v12, 5  ;;  %v3478_v51 = vrot.slane %v3476_v32, 4  ;;  %v3481_v46 = vrot.slane %v3479_v16, 5  ;;  %v3404_v29 = vsel %vm6509_vm11, %v3399_v9, %v3403_v42 }
 0x25a   :  { %v3495_v5 = vrot.slane %v3493_v3, 5  ;;  %v3431_v50 = vrot.slane %v3429_v53, 5  ;;  %v4920_v38 = vcombine.low %v6948_v48, %v6948_v48  ;;  %v4922_v57 = vcombine.low %v6952_v2, %v6952_v2  ;;  %v3742_v3 = vld [vmem:[#allocation2 + $0x18] sm:$0x1e] }
 0x25b   :  { %5443 = vmatmul.mubr.bf16.gmra.mrb[12].mxu1 %v5902_v0  ;;  %v3445_v24 = vrot.slane %v3443_v19, 5  ;;  %v3454_v39 = vor.u32 %v3453_v10, %v3450_v63  ;;  %v4917_v52 = vcombine.high %v6926_v21, %v6926_v21  ;;  %v4919_v55 = vcombine.high %v6932_v40, %v6932_v40  ;;  %v5928_v19 = vld [vmem:[#allocation8 + $0x220] sm:$0xff]  }
 0x25c   :  { %5459 = vmatpush3.bf16.msra.mxu1 %v5901_v36  ;;  %5462 = vmatprep.mubr.bf16.mxu1 %v4924_v59  ;;  %v3492_v36 = vrot.slane %v3490_v44, 4  ;;  %v3418_v23 = vsel %vm6509_vm11, %v3413_v26, %v3417_v17  ;;  %v3432_v59 = vsel %vm6509_vm11, %v3427_v49, %v3431_v50  ;;  %v3457_v62 = vshll.u32 %v4913_v27, 16  ;;  %v3741_v17 = vld [vmem:[#allocation2 + $0x10] sm:$0x1e]  ;;  %v3744_v50 = vld [vmem:[#allocation2 + $0x28] sm:$0x1e] }
 0x25d   :  { %5460 = vmatprep.subr.bf16.mxu1 %v5907_v4  ;;  %v3468_v11 = vor.u32 %v3467_v30, %v3464_v35  ;;  %v3446_v20 = vsel %vm6509_vm11, %v3441_v61, %v3445_v24  ;;  %v3471_v60 = vshll.u32 %v4915_v28, 16  ;;  %v3482_v21 = vor.u32 %v3481_v46, %v3478_v51  ;;  %v3743_v51 = vld [vmem:[#allocation2 + $0x20] sm:$0x1e]  ;;  %v5937_v46 = vld [vmem:[#allocation8 + $0x228] sm:$0xff]  }
 0x25e   :  { %v3496_v45 = vor.u32 %v3495_v5, %v3492_v36  ;;  %v3504_v56 = vshrl.u32 %v4920_v38, 16  ;;  %v3507_v40 = vshll.u32 %v4920_v38, 16  ;;  %v3518_v0 = vshrl.u32 %v4922_v57, 16 }
 0x25f   :  { %v3499_v42 = vshll.u32 %v4919_v55, 16  ;;  %v4927_v22 = vcombine.low %v3404_v29, %v3418_v23  ;;  %v4928_v7 = vcombine.low %v3432_v59, %v3446_v20  ;;  %v3459_v54 = vrot.slane %v3457_v62, 5  ;;  %v5938_v20 = vld [vmem:[#allocation8 + $0x230] sm:$0xff]  }
 0x260   :  { %5461 = vmatpush3.bf16.msra.mxu1 %v5907_v4  ;;  %v3521_v4 = vshll.u32 %v4922_v57, 16  ;;  %v3469_v37 = vrot.slane %v3468_v11, 4  ;;  %v3473_v31 = vrot.slane %v3471_v60, 5  ;;  %v3483_v58 = vrot.slane %v3482_v21, 4  ;;  %v3745_v11 = vld [vmem:[#allocation2 + $0x30] sm:$0x1e] }
 0x261   :  { %5478 = vmatprep.subr.bf16.mxu1 %v5908_v13  ;;  %v3497_v33 = vrot.slane %v3496_v45, 4  ;;  %v4923_v6 = vcombine.high %v6952_v2, %v6952_v2  ;;  %v3506_v47 = vrot.slane %v3504_v56, 4  ;;  %v3509_v41 = vrot.slane %v3507_v40, 5 }
 0x262   :  { %v3520_v12 = vrot.slane %v3518_v0, 4  ;;  %v3501_v44 = vrot.slane %v3499_v42, 5  ;;  %v3474_v9 = vsel %vm6509_vm11, %v3469_v37, %v3473_v31  ;;  %v4921_v26 = vcombine.high %v6948_v48, %v6948_v48  ;;  %v5947_v37 = vld [vmem:[#allocation8 + $0x238] sm:$0xff]   ;;  %v3748_v31 = vld [vmem:[#allocation2 + $0x48] sm:$0x1e] }
 0x263   :  { %5463 = vmatmul.mubr.bf16.vlgmr.msra.gmra.mrb[0].mxu1 %v4925_v8  ;;  %v3455_v8 = vrot.slane %v3454_v39, 4  ;;  %v4940_v53 = vcombine.low %v3741_v17, %v3741_v17  ;;  %v3527_v63 = vshll.u32 %v4923_v6, 16  ;;  %v4941_v10 = vcombine.high %v3741_v17, %v3741_v17 }
 0x264   :  { %5479 = vmatpush3.bf16.msra.mxu1 %v5908_v13  ;;  %5466 = vmatprep.mubr.bf16.mxu1 %v4926_v18  ;;  %v3485_v18 = vshll.u32 %v4917_v52, 16  ;;  %v3523_v13 = vrot.slane %v3521_v4, 5  ;;  %v3502_v27 = vsel %vm6509_vm11, %v3497_v33, %v3501_v44  ;;  %v3510_v2 = vor.u32 %v3509_v41, %v3506_v47  ;;  %v3749_v47 = vld [vmem:[#allocation2 + $0x60] sm:$0x1e] }
 0x265   :  { %5480 = vmatprep.subr.bf16.mxu1 %v5917_v34  ;;  %v3460_v32 = vsel %vm6509_vm11, %v3455_v8, %v3459_v54  ;;  %v4942_v28 = vcombine.low %v3742_v3, %v3742_v3  ;;  %v4943_v35 = vcombine.high %v3742_v3, %v3742_v3  ;;  %v3529_v36 = vrot.slane %v3527_v63, 5 }
 0x266   :  { %v3487_v16 = vrot.slane %v3485_v18, 5  ;;  %v3524_v61 = vor.u32 %v3523_v13, %v3520_v12  ;;  %v4929_v30 = vcombine.low %v3460_v32, %v3474_v9  ;;  %v4972_v5 = vrot.slane %v4940_v53, 9  ;;  %v3750_v13 = vld [vmem:[#allocation2 + $0x68] sm:$0x1e] }
 0x267   :  { %v3839_v29 = vrot.slane %v4941_v10, 5  ;;  %v3511_v38 = vrot.slane %v3510_v2, 4  ;;  %v4973_v24 = vrot.slane %v4942_v28, 9  ;;  %v3843_v39 = vrot.slane %v4943_v35, 5 }
 0x268   :  { %5481 = vmatpush3.bf16.msra.mxu1 %v5917_v34  ;;  %v3488_v49 = vsel %vm6509_vm11, %v3483_v58, %v3487_v16  ;;  %v3513_v34 = vshll.u32 %v4921_v26, 16  ;;  %v3525_v57 = vrot.slane %v3524_v61, 4  ;;  %v4944_v52 = vcombine.low %v3743_v51, %v3743_v51 }
 0x269   :  { %5482 = vmatprep.subr.bf16.mxu1 %v5918_v15  ;;  %v4930_v48 = vcombine.low %v3488_v49, %v3502_v27  ;;  %v4945_v23 = vcombine.high %v3743_v51, %v3743_v51  ;;  %v4946_v59 = vcombine.low %v3744_v50, %v3744_v50  ;;  %v4947_v62 = vcombine.high %v3744_v50, %v3744_v50  ;;  %v3751_v51 = vld [vmem:[#allocation2 + $0x70] sm:$0x1e] }
 0x26a   :  { %v3515_v55 = vrot.slane %v3513_v34, 5  ;;  %v3530_v21 = vsel %vm6509_vm11, %v3525_v57, %v3529_v36  ;;  %v3840_v45 = vsel %vm6751_vm14, %v4972_v5, %v3839_v29  ;;  %v3844_v56 = vsel %vm6751_vm14, %v4973_v24, %v3843_v39  ;;  %v3752_v36 = vld [vmem:[#allocation2 + $0x78] sm:$0x1e]  ;;  %v3753_v5 = vld [vmem:[#allocation2 + $0x80] sm:$0x1e] }
 0x26b   :  { %5467 = vmatmul.mubr.bf16.gmra.mrb[4].mxu1 %v4927_v22  ;;  %v4948_v40 = vcombine.low %v3745_v11, %v3745_v11  ;;  %v4949_v0 = vcombine.high %v3745_v11, %v3745_v11  ;;  %v4974_v18 = vrot.slane %v4944_v52, 9  ;;  %v3847_v42 = vrot.slane %v4945_v23, 5  ;;  %v3754_v29 = vld [vmem:[#allocation2 + $0x88] sm:$0x1e] }
 0x26c   :  { %5483 = vmatpush3.bf16.msra.mxu1 %v5918_v15  ;;  %5470 = vmatprep.mubr.bf16.mxu1 %v4928_v7  ;;  %v3746_v15 = vld [vmem:[#allocation2 + $0x38] sm:$0x1e]  ;;  %v3516_v60 = vsel %vm6509_vm11, %v3511_v38, %v3515_v55  ;;  %v4975_v22 = vrot.slane %v4946_v59, 9  ;;  %v3851_v7 = vrot.slane %v4947_v62, 5  ;;  %v4988_v14 = vcombine.low %v3840_v45, %v3844_v56 }
 0x26d   :  { %5484 = vmatprep.subr.bf16.mxu1 %v5927_v25  ;;  %v4950_v4 = vcombine.low %v3746_v15, %v3746_v15  ;;  %v4951_v8 = vcombine.high %v3746_v15, %v3746_v15  ;;  %v4931_v54 = vcombine.low %v3516_v60, %v3530_v21  ;;  %v4976_v58 = vrot.slane %v4948_v40, 9 }
 0x26e   :  { %v3855_v33 = vrot.slane %v4949_v0, 5  ;;  %v3848_v41 = vsel %vm6751_vm14, %v4974_v18, %v3847_v42  ;;  %v3852_v12 = vsel %vm6751_vm14, %v4975_v22, %v3851_v7  ;;  %v4954_v44 = vcombine.low %v3748_v31, %v3748_v31  ;;  %v3755_v0 = vld [vmem:[#allocation2 + $0x90] sm:$0x1e]  ;;  %v3756_v22 = vld [vmem:[#allocation2 + $0x98] sm:$0x1e] }
 0x26f   :  { %v4977_v6 = vrot.slane %v4950_v4, 9  ;;  %v3859_v17 = vrot.slane %v4951_v8, 5  ;;  %v4955_v3 = vcombine.high %v3748_v31, %v3748_v31  ;;  %v4956_v9 = vcombine.low %v3749_v47, %v3749_v47 }
 0x270   :  { %5485 = vmatpush3.bf16.msra.mxu1 %v5927_v25  ;;  %v3747_v25 = vld [vmem:[#allocation2 + $0x40] sm:$0x1e]  ;;  %v4957_v26 = vcombine.high %v3749_v47, %v3749_v47  ;;  %v3856_v53 = vsel %vm6751_vm14, %v4976_v58, %v3855_v33  ;;  %v4958_v49 = vcombine.low %v3750_v13, %v3750_v13  ;;  %v4959_v27 = vcombine.high %v3750_v13, %v3750_v13 }
 0x271   :  { %5486 = vmatprep.subr.bf16.mxu1 %v5928_v19  ;;  %v4952_v32 = vcombine.low %v3747_v25, %v3747_v25  ;;  %v4953_v16 = vcombine.high %v3747_v25, %v3747_v25  ;;  %v4989_v63 = vcombine.low %v3848_v41, %v3852_v12  ;;  %v4979_v61 = vrot.slane %v4954_v44, 9 }
 0x272   :  { %v3867_v28 = vrot.slane %v4955_v3, 5  ;;  %v3871_v34 = vrot.slane %v4957_v26, 5  ;;  %v4960_v57 = vcombine.low %v3751_v51, %v3751_v51  ;;  %v4961_v24 = vcombine.high %v3751_v51, %v3751_v51  ;;  %v5976_v51 = vld [vmem:[#allocation9] sm:$0xff]  }
 0x273   :  { %5471 = vmatmul.mubr.bf16.gmra.mrb[8].mxu1 %v4929_v30  ;;  %v4978_v10 = vrot.slane %v4952_v32, 9  ;;  %v3863_v2 = vrot.slane %v4953_v16, 5  ;;  %v4980_v30 = vrot.slane %v4956_v9, 9  ;;  %v4962_v52 = vcombine.low %v3752_v36, %v3752_v36  ;;  %5510 = vmatprep.subr.bf16.mxu0 %v5976_v51 }
 0x274   :  { %5487 = vmatpush3.bf16.msra.mxu1 %v5928_v19  ;;  %5474 = vmatprep.mubr.bf16.mxu1 %v4930_v48  ;;  %v3860_v19 = vsel %vm6751_vm14, %v4977_v6, %v3859_v17  ;;  %v4981_v48 = vrot.slane %v4958_v49, 9  ;;  %v3868_v38 = vsel %vm6751_vm14, %v4979_v61, %v3867_v28  ;;  %v4963_v55 = vcombine.high %v3752_v36, %v3752_v36  ;;  %v5979_v36 = vld [vmem:[#allocation9 + $0x18] sm:$0xff]  }
 0x275   :  { %5488 = vmatprep.subr.bf16.mxu1 %v5937_v46  ;;  %v4990_v35 = vcombine.low %v3856_v53, %v3860_v19  ;;  %v3864_v50 = vsel %vm6751_vm14, %v4978_v10, %v3863_v2  ;;  %v3872_v39 = vsel %vm6751_vm14, %v4980_v30, %v3871_v34  ;;  %v4964_v23 = vcombine.low %v3753_v5, %v3753_v5 }
 0x276   :  { %v4965_v62 = vcombine.high %v3753_v5, %v3753_v5  ;;  %v4966_v11 = vcombine.low %v3754_v29, %v3754_v29  ;;  %v4967_v15 = vcombine.high %v3754_v29, %v3754_v29  ;;  %v4982_v60 = vrot.slane %v4960_v57, 9  ;;  %5511 = vmatpush3.bf16.msra.mxu0 %v5976_v51  ;;  %v5980_v5 = vld [vmem:[#allocation9 + $0x20] sm:$0xff]   ;;  %v5981_v29 = vld [vmem:[#allocation9 + $0x28] sm:$0xff]  }
 0x277   :  { %v3879_v21 = vrot.slane %v4961_v24, 5  ;;  %v4983_v56 = vrot.slane %v4962_v52, 9  ;;  %v3883_v40 = vrot.slane %v4963_v55, 5  ;;  %v4984_v4 = vrot.slane %v4964_v23, 9 }
 0x278   :  { %5489 = vmatpush3.bf16.msra.mxu1 %v5937_v46  ;;  %v3875_v46 = vrot.slane %v4959_v27, 5  ;;  %v3887_v8 = vrot.slane %v4965_v62, 5  ;;  %v4985_v18 = vrot.slane %v4966_v11, 9  ;;  %v3891_v42 = vrot.slane %v4967_v15, 5 }
 0x279   :  { %5490 = vmatprep.subr.bf16.mxu1 %v5938_v20  ;;  %v3880_v7 = vsel %vm6751_vm14, %v4982_v60, %v3879_v21  ;;  %v4970_v25 = vcombine.low %v3756_v22, %v3756_v22  ;;  %v4971_v31 = vcombine.high %v3756_v22, %v3756_v22 }
 0x27a   :  { %v3876_v59 = vsel %vm6751_vm14, %v4981_v48, %v3875_v46  ;;  %v3888_v58 = vsel %vm6751_vm14, %v4984_v4, %v3887_v8  ;;  %v3892_v33 = vsel %vm6751_vm14, %v4985_v18, %v3891_v42  ;;  %v5977_v48 = vld [vmem:[#allocation9 + $0x8] sm:$0xff]   ;;  %v5978_v46 = vld [vmem:[#allocation9 + $0x10] sm:$0xff]  }
 0x27b   :  { %5475 = vmatmul.mubr.bf16.gmra.mrb[12].mxu1 %v4931_v54  ;;  %v4992_v45 = vcombine.low %v3872_v39, %v3876_v59  ;;  %v4968_v54 = vcombine.low %v3755_v0, %v3755_v0  ;;  %v4994_v47 = vcombine.low %v3888_v58, %v3892_v33  ;;  %v4987_v12 = vrot.slane %v4970_v25, 9  ;;  %5512 = vmatprep.subr.bf16.mxu0 %v5977_v48 }
 0x27c   :  { %5491 = vmatpush3.bf16.msra.mxu1 %v5938_v20  ;;  %5494 = vmatprep.mubr.bf16.mxu1 %v4988_v14  ;;  %v4991_v20 = vcombine.low %v3864_v50, %v3868_v38  ;;  %v4969_v14 = vcombine.high %v3755_v0, %v3755_v0  ;;  %v3899_v13 = vrot.slane %v4971_v31, 5  ;;  %v5982_v50 = vld [vmem:[#allocation9 + $0x30] sm:$0xff]   ;;  %v5983_v38 = vld [vmem:[#allocation9 + $0x38] sm:$0xff]  }
 0x27d   :  { %5492 = vmatprep.subr.bf16.mxu1 %v5947_v37  ;;  %v4986_v17 = vrot.slane %v4968_v54, 9  ;;  %5513 = vmatpush3.bf16.msra.mxu0 %v5977_v48 }
 0x27e   :  { %v3895_v41 = vrot.slane %v4969_v14, 5  ;;  %v3900_v16 = vsel %vm6751_vm14, %v4987_v12, %v3899_v13  ;;  %5514 = vmatprep.subr.bf16.mxu0 %v5978_v46 }
 0x280   :  { %5493 = vmatpush3.bf16.msra.mxu1 %v5947_v37  ;;  %v3884_v37 = vsel %vm6751_vm14, %v4983_v56, %v3883_v40  ;;  %v3896_v32 = vsel %vm6751_vm14, %v4986_v17, %v3895_v41 }
 0x281   :  { %v4993_v6 = vcombine.low %v3880_v7, %v3884_v37  ;;  %v4995_v44 = vcombine.low %v3896_v32, %v3900_v16  ;;  %5515 = vmatpush3.bf16.msra.mxu0 %v5978_v46 }
 0x282   :  { %5516 = vmatprep.subr.bf16.mxu0 %v5979_v36 }
 0x283   :  { %5495 = vmatmul.mubr.bf16.vlgmr.msra.gmra.mrb[0].mxu1 %v4989_v63 }
 0x284   :  { %5498 = vmatprep.mubr.bf16.mxu1 %v4990_v35 }
 0x285   :  { %5517 = vmatpush3.bf16.msra.mxu0 %v5979_v36 }
 0x286   :  { %5518 = vmatprep.subr.bf16.mxu0 %v5980_v5 }
 0x289   :  { %5519 = vmatpush3.bf16.msra.mxu0 %v5980_v5 }
 0x28a   :  { %5520 = vmatprep.subr.bf16.mxu0 %v5981_v29 }
 0x28b   :  { %5499 = vmatmul.mubr.bf16.gmra.mrb[4].mxu1 %v4991_v20 }
 0x28c   :  { %5502 = vmatprep.mubr.bf16.mxu1 %v4992_v45 }
 0x28d   :  { %5521 = vmatpush3.bf16.msra.mxu0 %v5981_v29 }
 0x28e   :  { %5522 = vmatprep.subr.bf16.mxu0 %v5982_v50 }
 0x291   :  { %5523 = vmatpush3.bf16.msra.mxu0 %v5982_v50 }
 0x292   :  { %5524 = vmatprep.subr.bf16.mxu0 %v5983_v38 }
 0x293   :  { %5503 = vmatmul.mubr.bf16.gmra.mrb[8].mxu1 %v4993_v6 }
 0x294   :  { %5506 = vmatprep.mubr.bf16.mxu1 %v4994_v47 }
 0x295   :  { %5525 = vmatpush3.bf16.msra.mxu0 %v5983_v38 }
 0x29b   :  { %5507 = vmatmul.mubr.bf16.gmra.mrb[12].mxu1 %v4995_v44 }
 0x2f8   :  { %v5304_v3 = vpop.f32.mrb[16].mxu0 }
 0x2f9   :  { %v1747_v9 = vpop.f32.mrb[17].mxu0 }
 0x2fa   :  { %v5305_v26 = vpop.f32.mrb[18].mxu0 }
 0x2fb   :  { %v1750_v53 = vpop.f32.mrb[19].mxu0 }
 0x303   :  { %v5308_v19 = vpop.f32.mrb[20].mxu0 }
 0x304   :  { %v1763_v49 = vpop.f32.mrb[21].mxu0 }
 0x305   :  { %v5309_v27 = vpop.f32.mrb[22].mxu0 }
 0x306   :  { %v1766_v63 = vpop.f32.mrb[23].mxu0 }
 0x30b   :  { %v7020_v10 = vpop.f32.mrb[24].mxu0 }
 0x30c   :  { %v7022_v2 = vpop.f32.mrb[25].mxu0 }
 0x30d   :  { %v7024_v61 = vpop.f32.mrb[26].mxu0 }
 0x30e   :  { %v7026_v28 = vpop.f32.mrb[27].mxu0 }
 0x313   :  { %v7028_v1 = vpop.f32.mrb[28].mxu0 }
 0x314   :  { %v7030_v35 = vpop.f32.mrb[29].mxu0 }
 0x315   :  { %v7032_v30 = vpop.f32.mrb[30].mxu0 }
 0x316   :  { %v7034_v34 = vpop.f32.mrb[31].mxu0 }
 0x356   :  { %v5496_v57 = vpop.f32.mrb[0].mxu1 }
 0x357   :  { %v7036_v24 = vadd.f32 %v5496_v57, %v5304_v3  ;;  %v4032_v39 = vpop.f32.mrb[1].mxu1 }
 0x358   :  { %v7038_v52 = vadd.f32 %v4032_v39, %v1747_v9  ;;  %v5497_v55 = vpop.f32.mrb[2].mxu1 }
 0x359   :  { %v7040_v23 = vadd.f32 %v5497_v55, %v5305_v26  ;;  %v4035_v59 = vpop.f32.mrb[3].mxu1  ;;  %v4134_v60 = vmul.f32 %v7036_v24, %v7036_v24 }
 0x35a   :  { %v7042_v62 = vadd.f32 %v4035_v59, %v1750_v53  ;;  %v4132_v11 = vmul.f32 %v7038_v52, %v7038_v52 }
 0x35b   :  { %v4135_v4 = vmul.f32 %v7040_v23, %v7040_v23 }
 0x35c   :  { %v4111_v15 = vadd.f32 %v7042_v62, %v7038_v52  ;;  %v4133_v20 = vmul.f32 %v7042_v62, %v7042_v62 }
 0x35e   :  { %v4112_v21 = vadd.f32 %v7036_v24, %v4111_v15  ;;  %v4148_v45 = vadd.f32 %v4133_v20, %v4132_v11  ;;  %v5500_v56 = vpop.f32.mrb[4].mxu1 }
 0x35f   :  { %v7053_v40 = vadd.f32 %v5500_v56, %v5308_v19  ;;  %v4048_v0 = vpop.f32.mrb[5].mxu1 }
 0x360   :  { %v4149_v8 = vadd.f32 %v4148_v45, %v4134_v60  ;;  %v7057_v18 = vadd.f32 %v4048_v0, %v1763_v49  ;;  %v4113_v42 = vadd.f32 %v7040_v23, %v4112_v21  ;;  %v5501_v22 = vpop.f32.mrb[6].mxu1 }
 0x361   :  { %v7060_v7 = vadd.f32 %v5501_v22, %v5309_v27  ;;  %v4051_v54 = vpop.f32.mrb[7].mxu1  ;;  %v4138_v17 = vmul.f32 %v7053_v40, %v7053_v40 }
 0x362   :  { %v4114_v37 = vadd.f32 %v7057_v18, %v4113_v42  ;;  %v4136_v14 = vmul.f32 %v7057_v18, %v7057_v18  ;;  %v4150_v25 = vadd.f32 %v4149_v8, %v4135_v4  ;;  %v7065_v31 = vadd.f32 %v4051_v54, %v1766_v63 }
 0x363   :  { %v4139_v16 = vmul.f32 %v7060_v7, %v7060_v7 }
 0x364   :  { %v4151_v58 = vadd.f32 %v4150_v25, %v4136_v14  ;;  %v4115_v33 = vadd.f32 %v7065_v31, %v4114_v37  ;;  %v4137_v6 = vmul.f32 %v7065_v31, %v7065_v31 }
 0x366   :  { %v4116_v47 = vadd.f32 %v7053_v40, %v4115_v33  ;;  %v4152_v41 = vadd.f32 %v4151_v58, %v4137_v6  ;;  %v5504_v12 = vpop.f32.mrb[8].mxu1 }
 0x367   :  { %v7074_v13 = vadd.f32 %v5504_v12, %v7020_v10  ;;  %v4064_v32 = vpop.f32.mrb[9].mxu1 }
 0x368   :  { %v4153_v44 = vadd.f32 %v4152_v41, %v4138_v17  ;;  %v7079_v3 = vadd.f32 %v4064_v32, %v7022_v2  ;;  %v4117_v9 = vadd.f32 %v7060_v7, %v4116_v47  ;;  %v5505_v26 = vpop.f32.mrb[10].mxu1 }
 0x369   :  { %v7083_v53 = vadd.f32 %v5505_v26, %v7024_v61  ;;  %v4067_v19 = vpop.f32.mrb[11].mxu1  ;;  %v4142_v61 = vmul.f32 %v7074_v13, %v7074_v13 }
 0x36a   :  { %v4118_v49 = vadd.f32 %v7079_v3, %v4117_v9  ;;  %v4140_v27 = vmul.f32 %v7079_v3, %v7079_v3  ;;  %v4154_v63 = vadd.f32 %v4153_v44, %v4139_v16  ;;  %v7089_v10 = vadd.f32 %v4067_v19, %v7026_v28 }
 0x36b   :  { %v4143_v28 = vmul.f32 %v7083_v53, %v7083_v53 }
 0x36c   :  { %v4155_v51 = vadd.f32 %v4154_v63, %v4140_v27  ;;  %v4119_v2 = vadd.f32 %v7089_v10, %v4118_v49  ;;  %v4141_v48 = vmul.f32 %v7089_v10, %v7089_v10 }
 0x36e   :  { %v4120_v46 = vadd.f32 %v7074_v13, %v4119_v2  ;;  %v4156_v36 = vadd.f32 %v4155_v51, %v4141_v48  ;;  %v5508_v5 = vpop.f32.mrb[12].mxu1 }
 0x36f   :  { %v7098_v29 = vadd.f32 %v5508_v5, %v7028_v1  ;;  %v4080_v50 = vpop.f32.mrb[13].mxu1 }
 0x370   :  { %v4157_v38 = vadd.f32 %v4156_v36, %v4142_v61  ;;  %v7103_v57 = vadd.f32 %v4080_v50, %v7030_v35  ;;  %v4121_v39 = vadd.f32 %v7083_v53, %v4120_v46  ;;  %v5509_v55 = vpop.f32.mrb[14].mxu1  ;;  %v5004_v36 = vld [vmem:[%s7277_s4 + $0x1] ss:$0 sm:$0xff] }
 0x371   :  { %v7107_v59 = vadd.f32 %v5509_v55, %v7032_v30  ;;  %v4083_v11 = vpop.f32.mrb[15].mxu1  ;;  %v4146_v35 = vmul.f32 %v7098_v29, %v7098_v29 }
 0x372   :  { %v4122_v15 = vadd.f32 %v7103_v57, %v4121_v39  ;;  %v4144_v1 = vmul.f32 %v7103_v57, %v7103_v57  ;;  %v4158_v20 = vadd.f32 %v4157_v38, %v4143_v28  ;;  %v5557_v60 = vadd.f32 %v4083_v11, %v7034_v34 }
 0x373   :  { %v4147_v30 = vmul.f32 %v7107_v59, %v7107_v59 }
 0x374   :  { %v4159_v21 = vadd.f32 %v4158_v20, %v4144_v1  ;;  %v4123_v45 = vadd.f32 %v5557_v60, %v4122_v15  ;;  %v4145_v56 = vmul.f32 %v5557_v60, %v5557_v60 }
 0x376   :  { %v4124_v0 = vadd.f32 %v7098_v29, %v4123_v45  ;;  %v4160_v4 = vadd.f32 %v4159_v21, %v4145_v56 }
 0x378   :  { %v4125_v8 = vadd.f32 %v7107_v59, %v4124_v0  ;;  %v4161_v42 = vadd.f32 %v4160_v4, %v4146_v35 }
 0x37a   :  { %v4126_v22 = vrot.slane %v4125_v8, 4  ;;  %v4162_v54 = vadd.f32 %v4161_v42, %v4147_v30 }
 0x37c   :  { %v4127_v37 = vadd.f32 %v4126_v22, %v4125_v8  ;;  %v4163_v14 = vrot.slane %v4162_v54, 4 }
 0x37e   :  { %v4128_v34 = vrot.slane %v4127_v37, 2  ;;  %v4164_v25 = vadd.f32 %v4163_v14, %v4162_v54 }
 0x380   :  { %v4129_v58 = vadd.f32 %v4128_v34, %v4127_v37  ;;  %v4165_v33 = vrot.slane %v4164_v25, 2 }
 0x382   :  { %v4130_v6 = vrot.slane %v4129_v58, 1  ;;  %v4166_v17 = vadd.f32 %v4165_v33, %v4164_v25 }
 0x384   :  { %v4131_v47 = vadd.f32 %v4130_v6, %v4129_v58  ;;  %v4167_v41 = vrot.slane %v4166_v17, 1 }
 0x386   :  { %v4168_v12 = vadd.f32 %v4167_v41, %v4166_v17  ;;  %v7119_v32 = vmul.f32 0.0078125, %v4131_v47 }
 0x388   :  { %v4170_v16 = vmul.f32 0.0078125, %v4168_v12  ;;  %v4171_v44 = vmul.f32 %v7119_v32, %v7119_v32  ;;  %v4187_v9 = vsub.f32 %v5557_v60, %v7119_v32  ;;  %v4174_v26 = vsub.f32 %v7038_v52, %v7119_v32 }
 0x389   :  { %v4175_v19 = vsub.f32 %v7042_v62, %v7119_v32  ;;  %v4176_v49 = vsub.f32 %v7036_v24, %v7119_v32  ;;  %v4177_v27 = vsub.f32 %v7040_v23, %v7119_v32  ;;  %v4178_v63 = vsub.f32 %v7057_v18, %v7119_v32 }
 0x38a   :  { %v4172_v51 = vsub.f32 %v4170_v16, %v4171_v44  ;;  %v4179_v2 = vsub.f32 %v7065_v31, %v7119_v32  ;;  %v4180_v48 = vsub.f32 %v7053_v40, %v7119_v32  ;;  %v4181_v52 = vsub.f32 %v7060_v7, %v7119_v32 }
 0x38b   :  { %v4182_v62 = vsub.f32 %v7079_v3, %v7119_v32  ;;  %v4183_v24 = vsub.f32 %v7089_v10, %v7119_v32  ;;  %v4184_v23 = vsub.f32 %v7074_v13, %v7119_v32  ;;  %v4185_v18 = vsub.f32 %v7083_v53, %v7119_v32  ;;  %v4192_v10 = vld [vmem:[%s7277_s4] sm:$0x1] }
 0x38c   :  { %v4173_v61 = vmax.f32 %v4172_v51, 0.0  ;;  %v4186_v31 = vsub.f32 %v7103_v57, %v7119_v32  ;;  %v4188_v40 = vsub.f32 %v7098_v29, %v7119_v32  ;;  %v4189_v7 = vsub.f32 %v7107_v59, %v7119_v32 }
 0x38e   :  { %v4190_v3 = vadd.f32 1e-05, %v4173_v61 }
 0x390   :  { %5986 = vrsqrt.f32 %v4190_v3 }
 0x39a   :  { %v5987_v13 = vpop.eup %5986 }
 0x39b   :  { %v4193_v46 = vmul.f32 %v5987_v13, %v4192_v10 }
 0x39d   :  { %v4197_v53 = vrot.slane %v4193_v46, %v6351_v43 }
 0x39f   :  { %v4211_v5 = vmul.f32 %v4197_v53, %v4187_v9  ;;  %v4198_v50 = vmul.f32 %v4197_v53, %v4174_v26  ;;  %v4199_v29 = vmul.f32 %v4197_v53, %v4175_v19  ;;  %v4200_v28 = vmul.f32 %v4197_v53, %v4176_v49 }
 0x3a0   :  { %v4201_v38 = vmul.f32 %v4197_v53, %v4177_v27  ;;  %v4202_v57 = vmul.f32 %v4197_v53, %v4178_v63  ;;  %v4203_v39 = vmul.f32 %v4197_v53, %v4179_v2  ;;  %v4204_v55 = vmul.f32 %v4197_v53, %v4180_v48 }
 0x3a1   :  { %v4219_v59 = vadd.f32 %v5004_v36, %v4198_v50  ;;  %v4220_v11 = vadd.f32 %v5004_v36, %v4199_v29  ;;  %v4221_v15 = vadd.f32 %v5004_v36, %v4200_v28  ;;  %v4205_v1 = vmul.f32 %v4197_v53, %v4181_v52 }
 0x3a2   :  { %v4222_v20 = vadd.f32 %v5004_v36, %v4201_v38  ;;  %v4223_v60 = vadd.f32 %v5004_v36, %v4202_v57  ;;  %v4224_v21 = vadd.f32 %v5004_v36, %v4203_v39  ;;  %v4225_v45 = vadd.f32 %v5004_v36, %v4204_v55 }
 0x3a3   :  { %v4235_v56 = vmax.f32 %v4219_v59, 0.0  ;;  %v4236_v35 = vmax.f32 %v4220_v11, 0.0  ;;  %v4237_v0 = vmax.f32 %v4221_v15, 0.0  ;;  %v4226_v4 = vadd.f32 %v5004_v36, %v4205_v1 }
 0x3a4   :  { %v4238_v30 = vmax.f32 %v4222_v20, 0.0  ;;  %v4239_v8 = vmax.f32 %v4223_v60, 0.0  ;;  %v4240_v42 = vmax.f32 %v4224_v21, 0.0  ;;  %v4241_v22 = vmax.f32 %v4225_v45, 0.0 }
 0x3a5   :  { %v4251_v54 = vpack.c.bf16 %v4236_v35, %v4235_v56  ;;  %v4242_v37 = vmax.f32 %v4226_v4, 0.0  ;;  %v4206_v14 = vmul.f32 %v4197_v53, %v4182_v62  ;;  %v4207_v34 = vmul.f32 %v4197_v53, %v4183_v24 }
 0x3a6   :  { %v4252_v25 = vpack.c.bf16 %v4238_v30, %v4237_v0  ;;  %v4253_v58 = vpack.c.bf16 %v4240_v42, %v4239_v8  ;;  %v4208_v33 = vmul.f32 %v4197_v53, %v4184_v23  ;;  %v4209_v6 = vmul.f32 %v4197_v53, %v4185_v18 }
 0x3a7   :  { %5526 = vmatprep.mubr.bf16.mxu0 %v4251_v54  ;;  %v4254_v17 = vpack.c.bf16 %v4242_v37, %v4241_v22  ;;  %v4227_v47 = vadd.f32 %v5004_v36, %v4206_v14  ;;  %v4228_v41 = vadd.f32 %v5004_v36, %v4207_v34  ;;  %v4210_v12 = vmul.f32 %v4197_v53, %v4186_v31 }
 0x3a8   :  { %5527 = vmatmul.mubr.bf16.vlgmr.msra.gmra.mrb[32].mxu0 %v4252_v25  ;;  %v4229_v32 = vadd.f32 %v5004_v36, %v4208_v33  ;;  %v4230_v16 = vadd.f32 %v5004_v36, %v4209_v6  ;;  %v4232_v44 = vadd.f32 %v5004_v36, %v4211_v5  ;;  %v4212_v9 = vmul.f32 %v4197_v53, %v4188_v40 }
 0x3a9   :  { %5530 = vmatprep.mubr.bf16.mxu0 %v4253_v58  ;;  %v4243_v26 = vmax.f32 %v4227_v47, 0.0  ;;  %v4244_v19 = vmax.f32 %v4228_v41, 0.0  ;;  %v4231_v49 = vadd.f32 %v5004_v36, %v4210_v12  ;;  %v4213_v27 = vmul.f32 %v4197_v53, %v4189_v7 }
 0x3aa   :  { %v4245_v63 = vmax.f32 %v4229_v32, 0.0  ;;  %v4246_v51 = vmax.f32 %v4230_v16, 0.0  ;;  %v4248_v2 = vmax.f32 %v4232_v44, 0.0  ;;  %v4233_v48 = vadd.f32 %v5004_v36, %v4212_v9 }
 0x3ab   :  { %v4255_v52 = vpack.c.bf16 %v4244_v19, %v4243_v26  ;;  %v4247_v62 = vmax.f32 %v4231_v49, 0.0  ;;  %v4234_v24 = vadd.f32 %v5004_v36, %v4213_v27 }
 0x3ac   :  { %v4256_v23 = vpack.c.bf16 %v4246_v51, %v4245_v63  ;;  %v4249_v18 = vmax.f32 %v4233_v48, 0.0 }
 0x3ad   :  { %v4257_v61 = vpack.c.bf16 %v4248_v2, %v4247_v62  ;;  %v4250_v31 = vmax.f32 %v4234_v24, 0.0 }
 0x3af   :  { %v4258_v3 = vpack.c.bf16 %v4250_v31, %v4249_v18 }
 0x3b0   :  { %5531 = vmatmul.mubr.bf16.gmra.mrb[36].mxu0 %v4254_v17 }
 0x3b1   :  { %5534 = vmatprep.mubr.bf16.mxu0 %v4255_v52 }
 0x3b8   :  { %5535 = vmatmul.mubr.bf16.gmra.mrb[40].mxu0 %v4256_v23 }
 0x3b9   :  { %5538 = vmatprep.mubr.bf16.mxu0 %v4257_v61 }
 0x3c0   :  { %5539 = vmatmul.mubr.bf16.gmra.mrb[44].mxu0 %v4258_v3 }
 0x47b   :  { %v7161_v40 = vpop.f32.mrb[32].mxu0 }
 0x47c   :  { %v7163_v7 = vpop.f32.mrb[33].mxu0  ;;  %v4443_v5 = vmul.f32 %v7161_v40, %v7161_v40 }
 0x47d   :  { %v7165_v10 = vpop.f32.mrb[34].mxu0  ;;  %v4441_v46 = vmul.f32 %v7163_v7, %v7163_v7 }
 0x47e   :  { %v7167_v13 = vpop.f32.mrb[35].mxu0  ;;  %v4444_v28 = vmul.f32 %v7165_v10, %v7165_v10 }
 0x47f   :  { %v4420_v53 = vadd.f32 %v7167_v13, %v7163_v7  ;;  %v4442_v36 = vmul.f32 %v7167_v13, %v7167_v13 }
 0x481   :  { %v4421_v50 = vadd.f32 %v7161_v40, %v4420_v53  ;;  %v4457_v29 = vadd.f32 %v4442_v36, %v4441_v46 }
 0x483   :  { %v4458_v38 = vadd.f32 %v4457_v29, %v4443_v5  ;;  %v7180_v57 = vpop.f32.mrb[36].mxu0  ;;  %v4422_v39 = vadd.f32 %v7165_v10, %v4421_v50 }
 0x484   :  { %v7183_v55 = vpop.f32.mrb[37].mxu0  ;;  %v4447_v56 = vmul.f32 %v7180_v57, %v7180_v57 }
 0x485   :  { %v4423_v59 = vadd.f32 %v4422_v39, %v7183_v55  ;;  %v4445_v11 = vmul.f32 %v7183_v55, %v7183_v55  ;;  %v4459_v15 = vadd.f32 %v4458_v38, %v4444_v28  ;;  %v7188_v1 = vpop.f32.mrb[38].mxu0 }
 0x486   :  { %v7190_v20 = vpop.f32.mrb[39].mxu0  ;;  %v4448_v4 = vmul.f32 %v7188_v1, %v7188_v1 }
 0x487   :  { %v4460_v60 = vadd.f32 %v4459_v15, %v4445_v11  ;;  %v4424_v21 = vadd.f32 %v4423_v59, %v7190_v20  ;;  %v4446_v45 = vmul.f32 %v7190_v20, %v7190_v20 }
 0x489   :  { %v4425_v35 = vadd.f32 %v7180_v57, %v4424_v21  ;;  %v4461_v0 = vadd.f32 %v4460_v60, %v4446_v45 }
 0x48b   :  { %v4462_v30 = vadd.f32 %v4461_v0, %v4447_v56  ;;  %v7200_v8 = vpop.f32.mrb[40].mxu0  ;;  %v4426_v42 = vadd.f32 %v7188_v1, %v4425_v35 }
 0x48c   :  { %v7203_v22 = vpop.f32.mrb[41].mxu0  ;;  %v4451_v17 = vmul.f32 %v7200_v8, %v7200_v8 }
 0x48d   :  { %v4427_v54 = vadd.f32 %v4426_v42, %v7203_v22  ;;  %v4449_v37 = vmul.f32 %v7203_v22, %v7203_v22  ;;  %v4463_v14 = vadd.f32 %v4462_v30, %v4448_v4  ;;  %v7208_v34 = vpop.f32.mrb[42].mxu0 }
 0x48e   :  { %v7210_v25 = vpop.f32.mrb[43].mxu0  ;;  %v4452_v12 = vmul.f32 %v7208_v34, %v7208_v34 }
 0x48f   :  { %v4464_v58 = vadd.f32 %v4463_v14, %v4449_v37  ;;  %v4428_v33 = vadd.f32 %v4427_v54, %v7210_v25  ;;  %v4450_v6 = vmul.f32 %v7210_v25, %v7210_v25 }
 0x491   :  { %v4429_v47 = vadd.f32 %v7200_v8, %v4428_v33  ;;  %v4465_v41 = vadd.f32 %v4464_v58, %v4450_v6 }
 0x493   :  { %v4466_v32 = vadd.f32 %v4465_v41, %v4451_v17  ;;  %v7220_v16 = vpop.f32.mrb[44].mxu0  ;;  %v4430_v44 = vadd.f32 %v7208_v34, %v4429_v47 }
 0x494   :  { %v7223_v9 = vpop.f32.mrb[45].mxu0  ;;  %v4455_v52 = vmul.f32 %v7220_v16, %v7220_v16 }
 0x495   :  { %v4431_v26 = vadd.f32 %v4430_v44, %v7223_v9  ;;  %v4453_v19 = vmul.f32 %v7223_v9, %v7223_v9  ;;  %v4467_v49 = vadd.f32 %v4466_v32, %v4452_v12  ;;  %v7228_v27 = vpop.f32.mrb[46].mxu0  ;;  %v4557_v12 = vld [vmem:[#allocation3 + $0x68] sm:$0xff] }
 0x496   :  { %v4408_v63 = vpop.f32.mrb[47].mxu0  ;;  %v4456_v23 = vmul.f32 %v7228_v27, %v7228_v27 }
 0x497   :  { %v4468_v51 = vadd.f32 %v4467_v49, %v4453_v19  ;;  %v4432_v2 = vadd.f32 %v4431_v26, %v4408_v63  ;;  %v4454_v48 = vmul.f32 %v4408_v63, %v4408_v63 }
 0x499   :  { %v4433_v62 = vadd.f32 %v7220_v16, %v4432_v2  ;;  %v4469_v24 = vadd.f32 %v4468_v51, %v4454_v48 }
 0x49b   :  { %v4434_v18 = vadd.f32 %v7228_v27, %v4433_v62  ;;  %v4470_v61 = vadd.f32 %v4469_v24, %v4455_v52 }
 0x49d   :  { %v4435_v31 = vrot.slane %v4434_v18, 4  ;;  %v4471_v3 = vadd.f32 %v4470_v61, %v4456_v23  ;;  %v4544_v23 = vld [vmem:[#allocation3] sm:$0xff]  ;;  %v4546_v61 = vld [vmem:[#allocation3 + $0x10] sm:$0xff] }
 0x49f   :  { %v4436_v46 = vadd.f32 %v4435_v31, %v4434_v18  ;;  %v4472_v53 = vrot.slane %v4471_v3, 4  ;;  %v4545_v18 = vld [vmem:[#allocation3 + $0x8] sm:$0xff] }
 0x4a1   :  { %v4437_v36 = vrot.slane %v4436_v46, 2  ;;  %v4473_v5 = vadd.f32 %v4472_v53, %v4471_v3 }
 0x4a3   :  { %v4438_v50 = vadd.f32 %v4437_v36, %v4436_v46  ;;  %v4474_v29 = vrot.slane %v4473_v5, 2  ;;  %v4547_v36 = vld [vmem:[#allocation3 + $0x18] sm:$0xff] }
 0x4a5   :  { %v4439_v28 = vrot.slane %v4438_v50, 1  ;;  %v4475_v38 = vadd.f32 %v4474_v29, %v4473_v5  ;;  %v4548_v5 = vld [vmem:[#allocation3 + $0x20] sm:$0xff] }
 0x4a7   :  { %v4440_v39 = vadd.f32 %v4439_v28, %v4438_v50  ;;  %v4476_v59 = vrot.slane %v4475_v38, 1  ;;  %v4549_v50 = vld [vmem:[#allocation3 + $0x28] sm:$0xff] }
 0x4a9   :  { %v4477_v11 = vadd.f32 %v4476_v59, %v4475_v38  ;;  %v4478_v15 = vmul.f32 0.0078125, %v4440_v39  ;;  %v4550_v59 = vld [vmem:[#allocation3 + $0x30] sm:$0xff] }
 0x4ab   :  { %v4479_v60 = vmul.f32 0.0078125, %v4477_v11  ;;  %v4480_v21 = vmul.f32 %v4478_v15, %v4478_v15  ;;  %v4496_v45 = vsub.f32 %v4408_v63, %v4478_v15  ;;  %v4483_v56 = vsub.f32 %v7163_v7, %v4478_v15  ;;  %v4551_v11 = vld [vmem:[#allocation3 + $0x38] sm:$0xff] }
 0x4ac   :  { %v4484_v35 = vsub.f32 %v7167_v13, %v4478_v15  ;;  %v4485_v0 = vsub.f32 %v7161_v40, %v4478_v15  ;;  %v4486_v4 = vsub.f32 %v7165_v10, %v4478_v15  ;;  %v4487_v30 = vsub.f32 %v7183_v55, %v4478_v15 }
 0x4ad   :  { %v4481_v42 = vsub.f32 %v4479_v60, %v4480_v21  ;;  %v4488_v54 = vsub.f32 %v7190_v20, %v4478_v15  ;;  %v4489_v37 = vsub.f32 %v7180_v57, %v4478_v15  ;;  %v4490_v14 = vsub.f32 %v7188_v1, %v4478_v15  ;;  %v4501_v57 = vld [vmem:[%s7279_s6] sm:$0x1] }
 0x4ae   :  { %v4491_v58 = vsub.f32 %v7203_v22, %v4478_v15  ;;  %v4492_v33 = vsub.f32 %v7210_v25, %v4478_v15  ;;  %v4493_v7 = vsub.f32 %v7200_v8, %v4478_v15  ;;  %v4494_v13 = vsub.f32 %v7208_v34, %v4478_v15  ;;  %v5013_v8 = vld [vmem:[%s7279_s6 + $0x1] ss:$0 sm:$0xff]  ;;  %s6118_s6 = smov [#allocation11]  }
 0x4af   :  { %v4482_v40 = vmax.f32 %v4481_v42, 0.0  ;;  %v4495_v10 = vsub.f32 %v7223_v9, %v4478_v15  ;;  %v4497_v55 = vsub.f32 %v7220_v16, %v4478_v15  ;;  %v4498_v6 = vsub.f32 %v7228_v27, %v4478_v15  ;;  %v4552_v15 = vld [vmem:[#allocation3 + $0x40] sm:$0xff]  ;;  %s4597_s17 = sshll.u32 %s6118_s6, 4  ;;  %s4598_s17 = int_to_ptr.vmem [resolvable:$true] %s4597_s17 }
 0x4b0   :  { %v4556_v42 = vld [vmem:[#allocation3 + $0x60] sm:$0xff]  ;;  %s6079_s18 = scalar_lea.vmem %s4598_s17, 2048  ;;  %p6084_p5 = scmp.lt.s32.totalorder %s4598_s17, %s4598_s17 }
 0x4b1   :  { %v4499_v20 = vadd.f32 1e-05, %v4482_v40  ;;  %p6080_p4 = scmp.ne.s32.totalorder %s4598_s17, %s6079_s18  ;;  %p6085_p6 = scmp.lt.s32.totalorder %s6079_s18, %s6079_s18 }
 0x4b3   :  { %5988 = vrsqrt.f32 %v4499_v20  ;;  %p6086_p7 = por %p6085_p6, %p6084_p5 }
 0x4b5   :  { %p6087_p8 = pnand %p6086_p7, %p6080_p4 }
 0x4bd   :  { %v5989_v1 = vpop.eup %5988 }
 0x4be   :  { %v4502_v22 = vmul.f32 %v5989_v1, %v4501_v57 }
 0x4c0   :  { %v4506_v25 = vrot.slane %v4502_v22, %v6351_v43 }
 0x4c2   :  { %v4520_v34 = vmul.f32 %v4506_v25, %v4496_v45  ;;  %v4507_v17 = vmul.f32 %v4506_v25, %v4483_v56  ;;  %v4508_v47 = vmul.f32 %v4506_v25, %v4484_v35  ;;  %v4509_v41 = vmul.f32 %v4506_v25, %v4485_v0  ;;  %v4553_v35 = vld [vmem:[#allocation3 + $0x48] sm:$0xff]  ;;  %v4554_v0 = vld [vmem:[#allocation3 + $0x50] sm:$0xff] }
 0x4c3   :  { %v4510_v32 = vmul.f32 %v4506_v25, %v4486_v4  ;;  %v4511_v16 = vmul.f32 %v4506_v25, %v4487_v30  ;;  %v4512_v44 = vmul.f32 %v4506_v25, %v4488_v54  ;;  %v4513_v9 = vmul.f32 %v4506_v25, %v4489_v37  ;;  %v4555_v4 = vld [vmem:[#allocation3 + $0x58] sm:$0xff]  ;;  %v4558_v54 = vld [vmem:[#allocation3 + $0x70] sm:$0xff] }
 0x4c4   :  { %v4541_v26 = vadd.f32 %v5013_v8, %v4520_v34  ;;  %v4514_v19 = vmul.f32 %v4506_v25, %v4490_v14  ;;  %v4515_v49 = vmul.f32 %v4506_v25, %v4491_v58  ;;  %v4516_v27 = vmul.f32 %v4506_v25, %v4492_v33  ;;  %v4559_v37 = vld [vmem:[#allocation3 + $0x78] sm:$0xff] }
 0x4c5   :  { %v4517_v63 = vmul.f32 %v4506_v25, %v4493_v7  ;;  %v4518_v51 = vmul.f32 %v4506_v25, %v4494_v13  ;;  %v4519_v43 = vmul.f32 %v4506_v25, %v4495_v10  ;;  %v4521_v2 = vmul.f32 %v4506_v25, %v4497_v55 }
 0x4c6   :  { %v4573_v48 = vadd.f32 %v4557_v12, %v4541_v26  ;;  %v4522_v52 = vmul.f32 %v4506_v25, %v4498_v6  ;;  %v4528_v62 = vadd.f32 %v5013_v8, %v4507_v17  ;;  %v4529_v24 = vadd.f32 %v5013_v8, %v4508_v47 }
 0x4c7   :  { %v4530_v31 = vadd.f32 %v5013_v8, %v4509_v41  ;;  %v4531_v3 = vadd.f32 %v5013_v8, %v4510_v32  ;;  %v4532_v46 = vadd.f32 %v5013_v8, %v4511_v16  ;;  %v4533_v53 = vadd.f32 %v5013_v8, %v4512_v44 }
 0x4c8   :  { %4589 = vst [vmem:[#allocation11 + $0x68] sm:$0xff] %v4573_v48  ;;  %v4534_v29 = vadd.f32 %v5013_v8, %v4513_v9  ;;  %v4535_v28 = vadd.f32 %v5013_v8, %v4514_v19  ;;  %v4536_v38 = vadd.f32 %v5013_v8, %v4515_v49  ;;  %v4537_v39 = vadd.f32 %v5013_v8, %v4516_v27 }
 0x4c9   :  { %v4538_v60 = vadd.f32 %v5013_v8, %v4517_v63  ;;  %v4539_v21 = vadd.f32 %v5013_v8, %v4518_v51  ;;  %v4540_v45 = vadd.f32 %v5013_v8, %v4519_v43  ;;  %v4542_v56 = vadd.f32 %v5013_v8, %v4521_v2 }
 0x4ca   :  { %v4543_v30 = vadd.f32 %v5013_v8, %v4522_v52  ;;  %v4560_v14 = vadd.f32 %v4544_v23, %v4528_v62  ;;  %v4561_v58 = vadd.f32 %v4545_v18, %v4529_v24  ;;  %v4562_v33 = vadd.f32 %v4546_v61, %v4530_v31 }
 0x4cb   :  { %v4563_v7 = vadd.f32 %v4547_v36, %v4531_v3  ;;  %v4564_v13 = vadd.f32 %v4548_v5, %v4532_v46  ;;  %v4565_v40 = vadd.f32 %v4549_v50, %v4533_v53  ;;  %v4566_v10 = vadd.f32 %v4550_v59, %v4534_v29 }
 0x4cc   :  { %v4567_v55 = vadd.f32 %v4551_v11, %v4535_v28  ;;  %v4568_v6 = vadd.f32 %v4552_v15, %v4536_v38  ;;  %v4569_v20 = vadd.f32 %v4553_v35, %v4537_v39  ;;  %v4570_v57 = vadd.f32 %v4554_v0, %v4538_v60  ;;  %4576 = vst [vmem:[#allocation11] sm:$0xff] %v4560_v14 }
 0x4cd   :  { %4577 = vst [vmem:[#allocation11 + $0x8] sm:$0xff] %v4561_v58  ;;  %4578 = vst [vmem:[#allocation11 + $0x10] sm:$0xff] %v4562_v33  ;;  %v4571_v1 = vadd.f32 %v4555_v4, %v4539_v21  ;;  %v4572_v22 = vadd.f32 %v4556_v42, %v4540_v45  ;;  %v4574_v25 = vadd.f32 %v4558_v54, %v4542_v56 }
 0x4ce   :  { %v4575_v8 = vadd.f32 %v4559_v37, %v4543_v30  ;;  %4579 = vst [vmem:[#allocation11 + $0x18] sm:$0xff] %v4563_v7  ;;  %4580 = vst [vmem:[#allocation11 + $0x20] sm:$0xff] %v4564_v13 }
 0x4cf   :  { %4581 = vst [vmem:[#allocation11 + $0x28] sm:$0xff] %v4565_v40  ;;  %4582 = vst [vmem:[#allocation11 + $0x30] sm:$0xff] %v4566_v10 }
 0x4d0   :  { %4583 = vst [vmem:[#allocation11 + $0x38] sm:$0xff] %v4567_v55  ;;  %4584 = vst [vmem:[#allocation11 + $0x40] sm:$0xff] %v4568_v6 }
 0x4d1   :  { %4585 = vst [vmem:[#allocation11 + $0x48] sm:$0xff] %v4569_v20  ;;  %4586 = vst [vmem:[#allocation11 + $0x50] sm:$0xff] %v4570_v57 }
 0x4d2   :  { %4587 = vst [vmem:[#allocation11 + $0x58] sm:$0xff] %v4571_v1  ;;  %4588 = vst [vmem:[#allocation11 + $0x60] sm:$0xff] %v4572_v22 }
 0x4d3   :  { %4590 = vst [vmem:[#allocation11 + $0x70] sm:$0xff] %v4574_v25  ;;  %4591 = vst [vmem:[#allocation11 + $0x78] sm:$0xff] %v4575_v8 }
 0x4d4   :  { %6090 = shalt.err (!%p6087_p8)
}
 0x4d5   :  { %s6091_s19 = scalar_lea.hbm %s7280_s7, 2048 }
 0x4d6   :  { %p6092_p9 = scmp.ne.s32.totalorder %s7280_s7, %s6091_s19  ;;  %p6095_p10 = scmp.lt.u32.totalorder %s6091_s19, %s7280_s7 }
 0x4d8   :  { %p6097_p11 = pnand %p6095_p10, %p6092_p9 }
 0x4da   :  { %6100 = shalt.err (!%p6097_p11)
}
 0x4db   :  { %4603 = dma.vmem_to_hbm [thread:$0]  %s4598_s17, 2048, %s7280_s7, [#allocation5], %s6113_s1, %s6113_s1, %s6114_s25  }
 0x4dc   :  { %6107 = dma.done.wait [#allocation5], 2048  }
 0x4dd   :  { %6108 = vsyncadd [#allocation5], 4294965248 }
 0x4de   :  { %4607 = vsyncpa [#allocation4], 1 }
 0x4df   :  { %4608 = vsyncpa [#allocation7], 1 }
 0x4e0   :  { %4609 = vsyncpa [#allocation10], 1 }
 0x4e1   :  { %4610 = vsyncpa [#allocation5], 1 }

</bundles_post_ra>
